<compile_context>
chip_gen: v6e
topology: v6e:2x2x1
jax: 0.10.0
libtpu: 0.0.40
codegen_flags: <defaults>
</compile_context>

<pallas_src>
import functools

import jax
import jax.numpy as jnp
from jax.experimental import pallas as pl
from jax.experimental.pallas import tpu as pltpu  # noqa: F401  (imported for TPU backend use)


# ----------------------------- Pallas kernel ---------------------------------


def _convT_bn_lrelu_kernel(xcol_ref, w_ref, gamma_ref, beta_ref, o_ref, *,
                           n_batch, wo, howo, eps, neg_slope):
    """Fused 3x3 conv (as 3 shifted matmuls) + BatchNorm(train) + LeakyReLU.

    xcol_ref  : (C_in*3, N, Hp*Wo)  kw-unfolded activation, pixels lane-dense
    w_ref     : (3, C_out, C_in*3)  conv weight grouped by kh, columns ordered (ci, kw)
    gamma_ref : (C_out, 1)          BN weight
    beta_ref  : (C_out, 1)          BN bias
    o_ref     : (C_out, N, Ho*Wo)   output, channels-first, lane-dense pixel axis
    """
    c_out = o_ref.shape[0]

    # ---- conv: per batch element, 3 kh-shifted slices feed accumulating matmuls ----
    ys = []
    for n in range(n_batch):
        acc = None
        for kh in range(3):
            xs = xcol_ref[:, n, kh * wo: kh * wo + howo]          # (C_in*3, Ho*Wo)
            p = jnp.dot(w_ref[kh], xs, preferred_element_type=jnp.float32)
            acc = p if acc is None else acc + p
        ys.append(acc)                                            # (C_out, Ho*Wo) f32

    # ---- BatchNorm (training mode, biased variance), single reduction pass ----
    # Conv bias omitted on purpose: it is exactly cancelled by the mean subtraction.
    s = jnp.zeros((c_out, 1), jnp.float32)
    ss = jnp.zeros((c_out, 1), jnp.float32)
    for yn in ys:
        s = s + jnp.sum(yn, axis=1, keepdims=True)
        ss = ss + jnp.sum(yn * yn, axis=1, keepdims=True)
    inv_count = 1.0 / float(n_batch * howo)
    mean = s * inv_count
    var = ss * inv_count - mean * mean
    scale = gamma_ref[...] * jax.lax.rsqrt(var + eps)             # (C_out, 1)
    shift = beta_ref[...] - mean * scale                          # (C_out, 1)

    # ---- single fused affine + LeakyReLU pass, lane-dense stores ----
    for n in range(n_batch):
        z = ys[n] * scale + shift
        o_ref[:, n, :] = jnp.maximum(z, neg_slope * z).astype(o_ref.dtype)


# --------------------------- wrapper / plumbing -------------------------------


def _dilate_and_pad(x, stride, pad_lo, pad_hi):
    """x: (C, N, H, W). Zero-dilate spatially by `stride`, then pad H/W by (pad_lo, pad_hi)."""
    c, n, h, w = x.shape
    if stride > 1:
        hd, wd = (h - 1) * stride + 1, (w - 1) * stride + 1
        xd = jnp.zeros((c, n, hd, wd), x.dtype).at[:, :, ::stride, ::stride].set(x)
    else:
        xd = x
    return jnp.pad(xd, ((0, 0), (0, 0), (pad_lo, pad_hi), (pad_lo, pad_hi)))


def _kw_unfold(xp, wo):
    """(C, N, Hp, Wp) -> (C*3, N, Hp*Wo); channel order (c, kw), pixel order (h, ow)."""
    c, n, hp, _ = xp.shape
    cols = [xp[:, :, :, kw:kw + wo] for kw in range(3)]           # each (C, N, Hp, Wo)
    xcol = jnp.stack(cols, axis=1)                                # (C, 3, N, Hp, Wo)
    return xcol.reshape(c * 3, n, hp * wo)


def prepare_stage_params(wt, b, gamma, beta):
    """One-time parameter prep (hoisted out of the forward path).

    wt: ConvTranspose2d weight in torch layout (C_in, C_out, 3, 3).
    The conv bias `b` is intentionally dropped: a per-channel constant added before
    training-mode BatchNorm is exactly cancelled by the mean subtraction.
    Returns (w3 (3, C_out, C_in*3), gamma (C_out,1), beta (C_out,1)).
    """
    del b
    c_in, c_out = wt.shape[0], wt.shape[1]
    # Equivalent forward-conv kernel: flip spatially, swap in/out channel axes.
    w_conv = jnp.flip(wt, axis=(2, 3)).transpose(1, 0, 2, 3)      # (C_out, C_in, 3, 3)
    # Group by kh; columns ordered (ci, kw) to match the kw-unfold channel layout.
    w3 = w_conv.transpose(2, 0, 1, 3).reshape(3, c_out, c_in * 3).astype(jnp.float32)
    return (w3,
            gamma.reshape(c_out, 1).astype(jnp.float32),
            beta.reshape(c_out, 1).astype(jnp.float32))


def _stage_forward(x_cnhw, stage_params, *, stride, padding, output_padding,
                   eps=1e-5, neg_slope=0.2):
    """One ConvTranspose2d+BN+LeakyReLU stage. x_cnhw: (C_in, N, H, W) -> (C_out, N, Ho, Wo)."""
    w3, gamma, beta = stage_params
    c_in, n, h, w = x_cnhw.shape
    c_out = w3.shape[1]
    k = 3
    pad_lo = k - 1 - padding
    pad_hi = k - 1 - padding + output_padding
    ho = (h - 1) * stride - 2 * padding + k + output_padding
    wo = (w - 1) * stride - 2 * padding + k + output_padding
    howo = ho * wo

    # Layout plumbing only: dilate/pad and a 3x kw-unfold (no 9x im2col, no transposes).
    xp = _dilate_and_pad(x_cnhw.astype(jnp.float32), stride, pad_lo, pad_hi)
    xcol = _kw_unfold(xp, wo)                                     # (C_in*3, N, Hp*Wo)
    c3 = c_in * 3
    hpwo = xcol.shape[-1]

    kernel = functools.partial(_convT_bn_lrelu_kernel, n_batch=n, wo=wo,
                               howo=howo, eps=eps, neg_slope=neg_slope)
    # Whole stage in a single grid step: decoder-sized tensors fit easily in VMEM,
    # BN batch statistics are exact, and the pixel axis (Ho*Wo) is a multiple of 128
    # so stores are unmasked lane-dense.
    y = pl.pallas_call(
        kernel,
        out_shape=jax.ShapeDtypeStruct((c_out, n, howo), jnp.float32),
        in_specs=[
            pl.BlockSpec((c3, n, hpwo), lambda: (0, 0, 0)),       # kw-unfolded activation
            pl.BlockSpec((3, c_out, c3), lambda: (0, 0, 0)),      # weight (grouped by kh)
            pl.BlockSpec((c_out, 1), lambda: (0, 0)),             # BN gamma
            pl.BlockSpec((c_out, 1), lambda: (0, 0)),             # BN beta
        ],
        out_specs=pl.BlockSpec((c_out, n, howo), lambda: (0, 0, 0)),
    )(xcol, w3, gamma, beta)

    return y.reshape(c_out, n, ho, wo)                            # stay channels-first


@jax.jit
def decoder_forward(x_nchw, params):
    p1, p2, p3 = params
    x = x_nchw.astype(jnp.float32).transpose(1, 0, 2, 3)          # NCHW -> CNHW (once)
    y = _stage_forward(x, p1, stride=2, padding=1, output_padding=1)
    y = _stage_forward(y, p2, stride=1, padding=1, output_padding=0)
    y = _stage_forward(y, p3, stride=1, padding=1, output_padding=0)
    return y.transpose(1, 0, 2, 3)                                # CNHW -> NCHW (once)


# --------------------------- pure-JAX reference -------------------------------


def _ref_stage(x, wt, b, gamma, beta, *, stride, padding, output_padding,
               eps=1e-5, neg_slope=0.2):
    w_conv = jnp.flip(wt, axis=(2, 3)).transpose(1, 0, 2, 3)
    k = 3
    pad_lo = k - 1 - padding
    pad_hi = k - 1 - padding + output_padding
    y = jax.lax.conv_general_dilated(
        x.astype(jnp.float32), w_conv.astype(jnp.float32),
        window_strides=(1, 1),
        padding=((pad_lo, pad_hi), (pad_lo, pad_hi)),
        lhs_dilation=(stride, stride),
        dimension_numbers=("NCHW", "OIHW", "NCHW"))
    y = y + b.reshape(1, -1, 1, 1)
    mean = y.mean(axis=(0, 2, 3), keepdims=True)
    var = jnp.square(y - mean).mean(axis=(0, 2, 3), keepdims=True)
    y = (y - mean) / jnp.sqrt(var + eps)
    y = y * gamma.reshape(1, -1, 1, 1) + beta.reshape(1, -1, 1, 1)
    return jnp.where(y >= 0.0, y, neg_slope * y)


def decoder_reference(x, raw_params):
    r1, r2, r3 = raw_params
    y = _ref_stage(x, *r1, stride=2, padding=1, output_padding=1)
    y = _ref_stage(y, *r2, stride=1, padding=1, output_padding=0)
    y = _ref_stage(y, *r3, stride=1, padding=1, output_padding=0)
    return y


# ----------------------------------- main -------------------------------------


if __name__ == "__main__":
    # Decoder(ch_list=[4, 8]) on (2, 4, 16, 16)  ->  (2, 8, 32, 32).
    N, H, W = 2, 16, 16
    ch_list = [4, 8]
    key = jax.random.PRNGKey(0)
    keys = jax.random.split(key, 13)

    x = jax.random.normal(keys[0], (N, ch_list[0], H, W), dtype=jnp.float32)

    def init_stage(kw, kb, kg, kbe, c_in, c_out):
        bound = 1.0 / ((c_in * 9) ** 0.5)
        wt = jax.random.uniform(kw, (c_in, c_out, 3, 3), minval=-bound, maxval=bound,
                                dtype=jnp.float32)
        b = jax.random.uniform(kb, (c_out,), minval=-bound, maxval=bound,
                               dtype=jnp.float32)
        gamma = 1.0 + 0.1 * jax.random.normal(kg, (c_out,), dtype=jnp.float32)
        beta = 0.1 * jax.random.normal(kbe, (c_out,), dtype=jnp.float32)
        return wt, b, gamma, beta

    raw1 = init_stage(keys[1], keys[2], keys[3], keys[4], ch_list[0], ch_list[1])
    raw2 = init_stage(keys[5], keys[6], keys[7], keys[8], ch_list[1], ch_list[1])
    raw3 = init_stage(keys[9], keys[10], keys[11], keys[12], ch_list[1], ch_list[1])

    # One-time parameter prep (weight flip / kh-grouping hoisted out of the per-call path).
    params = (prepare_stage_params(*raw1),
              prepare_stage_params(*raw2),
              prepare_stage_params(*raw3))

    y = decoder_forward(x, params)
    y = jax.block_until_ready(y)
    assert y.shape == (N, ch_list[1], 2 * H, 2 * W), y.shape

    # Check against a pure-JAX reference of the same forward (with conv bias + 2-pass BN;
    # the kernel's dropped bias / one-pass variance must match within tolerance).
    y_ref = decoder_reference(x, (raw1, raw2, raw3))
    max_err = float(jnp.max(jnp.abs(y - y_ref)))
    assert jnp.allclose(y, y_ref, atol=1e-3, rtol=1e-3), f"mismatch, max_err={max_err}"

    print("KERNEL_OK")
</pallas_src>

<mosaic_0001>
module attributes {stable_mosaic.version = 11 : i64} {
  func.func @_convT_bn_lrelu_kernel(%arg0: memref<12x2x1088xf32, #tpu.memory_space<vmem>>, %arg1: memref<3x8x12xf32, #tpu.memory_space<vmem>>, %arg2: memref<8x1xf32, #tpu.memory_space<vmem>>, %arg3: memref<8x1xf32, #tpu.memory_space<vmem>>, %arg4: memref<8x2x1024xf32, #tpu.memory_space<vmem>>) attributes {dimension_semantics = [], scalar_prefetch = 0 : i64, scratch_operands = 0 : i64, tpu.core_type = #tpu.core_type<tc>} {
    %c0 = arith.constant 0 : index
    %c0_0 = arith.constant 0 : index
    %c0_1 = arith.constant 0 : index
    %0 = vector.load %arg0[%c0, %c0_0, %c0_1] : memref<12x2x1088xf32, #tpu.memory_space<vmem>>, vector<12x1x1024xf32>
    %1 = vector.shape_cast %0 : vector<12x1x1024xf32> to vector<12x1024xf32>
    %c0_2 = arith.constant 0 : index
    %c0_3 = arith.constant 0 : index
    %c0_4 = arith.constant 0 : index
    %2 = vector.load %arg1[%c0_2, %c0_3, %c0_4] : memref<3x8x12xf32, #tpu.memory_space<vmem>>, vector<1x8x12xf32>
    %3 = vector.shape_cast %2 : vector<1x8x12xf32> to vector<8x12xf32>
    %cst = arith.constant dense<0.000000e+00> : vector<8x1024xf32>
    %4 = tpu.matmul %3, %1, %cst {dimension_numbers = #tpu.dot_dimension_numbers<[1], [0], [0], [1], [0, 0, 1, 1], [], []>} : vector<8x12xf32>, vector<12x1024xf32>, vector<8x1024xf32> -> vector<8x1024xf32>
    %c0_5 = arith.constant 0 : index
    %c0_6 = arith.constant 0 : index
    %c32 = arith.constant 32 : index
    %5 = vector.load %arg0[%c0_5, %c0_6, %c32] : memref<12x2x1088xf32, #tpu.memory_space<vmem>>, vector<12x1x1024xf32>
    %6 = vector.shape_cast %5 : vector<12x1x1024xf32> to vector<12x1024xf32>
    %c1 = arith.constant 1 : index
    %c0_7 = arith.constant 0 : index
    %c0_8 = arith.constant 0 : index
    %7 = vector.load %arg1[%c1, %c0_7, %c0_8] : memref<3x8x12xf32, #tpu.memory_space<vmem>>, vector<1x8x12xf32>
    %8 = vector.shape_cast %7 : vector<1x8x12xf32> to vector<8x12xf32>
    %cst_9 = arith.constant dense<0.000000e+00> : vector<8x1024xf32>
    %9 = tpu.matmul %8, %6, %cst_9 {dimension_numbers = #tpu.dot_dimension_numbers<[1], [0], [0], [1], [0, 0, 1, 1], [], []>} : vector<8x12xf32>, vector<12x1024xf32>, vector<8x1024xf32> -> vector<8x1024xf32>
    %10 = arith.addf %4, %9 : vector<8x1024xf32>
    %c0_10 = arith.constant 0 : index
    %c0_11 = arith.constant 0 : index
    %c64 = arith.constant 64 : index
    %11 = vector.load %arg0[%c0_10, %c0_11, %c64] : memref<12x2x1088xf32, #tpu.memory_space<vmem>>, vector<12x1x1024xf32>
    %12 = vector.shape_cast %11 : vector<12x1x1024xf32> to vector<12x1024xf32>
    %c2 = arith.constant 2 : index
    %c0_12 = arith.constant 0 : index
    %c0_13 = arith.constant 0 : index
    %13 = vector.load %arg1[%c2, %c0_12, %c0_13] : memref<3x8x12xf32, #tpu.memory_space<vmem>>, vector<1x8x12xf32>
    %14 = vector.shape_cast %13 : vector<1x8x12xf32> to vector<8x12xf32>
    %cst_14 = arith.constant dense<0.000000e+00> : vector<8x1024xf32>
    %15 = tpu.matmul %14, %12, %cst_14 {dimension_numbers = #tpu.dot_dimension_numbers<[1], [0], [0], [1], [0, 0, 1, 1], [], []>} : vector<8x12xf32>, vector<12x1024xf32>, vector<8x1024xf32> -> vector<8x1024xf32>
    %16 = arith.addf %10, %15 : vector<8x1024xf32>
    %c0_15 = arith.constant 0 : index
    %c1_16 = arith.constant 1 : index
    %c0_17 = arith.constant 0 : index
    %17 = vector.load %arg0[%c0_15, %c1_16, %c0_17] : memref<12x2x1088xf32, #tpu.memory_space<vmem>>, vector<12x1x1024xf32>
    %18 = vector.shape_cast %17 : vector<12x1x1024xf32> to vector<12x1024xf32>
    %c0_18 = arith.constant 0 : index
    %c0_19 = arith.constant 0 : index
    %c0_20 = arith.constant 0 : index
    %19 = vector.load %arg1[%c0_18, %c0_19, %c0_20] : memref<3x8x12xf32, #tpu.memory_space<vmem>>, vector<1x8x12xf32>
    %20 = vector.shape_cast %19 : vector<1x8x12xf32> to vector<8x12xf32>
    %cst_21 = arith.constant dense<0.000000e+00> : vector<8x1024xf32>
    %21 = tpu.matmul %20, %18, %cst_21 {dimension_numbers = #tpu.dot_dimension_numbers<[1], [0], [0], [1], [0, 0, 1, 1], [], []>} : vector<8x12xf32>, vector<12x1024xf32>, vector<8x1024xf32> -> vector<8x1024xf32>
    %c0_22 = arith.constant 0 : index
    %c1_23 = arith.constant 1 : index
    %c32_24 = arith.constant 32 : index
    %22 = vector.load %arg0[%c0_22, %c1_23, %c32_24] : memref<12x2x1088xf32, #tpu.memory_space<vmem>>, vector<12x1x1024xf32>
    %23 = vector.shape_cast %22 : vector<12x1x1024xf32> to vector<12x1024xf32>
    %c1_25 = arith.constant 1 : index
    %c0_26 = arith.constant 0 : index
    %c0_27 = arith.constant 0 : index
    %24 = vector.load %arg1[%c1_25, %c0_26, %c0_27] : memref<3x8x12xf32, #tpu.memory_space<vmem>>, vector<1x8x12xf32>
    %25 = vector.shape_cast %24 : vector<1x8x12xf32> to vector<8x12xf32>
    %cst_28 = arith.constant dense<0.000000e+00> : vector<8x1024xf32>
    %26 = tpu.matmul %25, %23, %cst_28 {dimension_numbers = #tpu.dot_dimension_numbers<[1], [0], [0], [1], [0, 0, 1, 1], [], []>} : vector<8x12xf32>, vector<12x1024xf32>, vector<8x1024xf32> -> vector<8x1024xf32>
    %27 = arith.addf %21, %26 : vector<8x1024xf32>
    %c0_29 = arith.constant 0 : index
    %c1_30 = arith.constant 1 : index
    %c64_31 = arith.constant 64 : index
    %28 = vector.load %arg0[%c0_29, %c1_30, %c64_31] : memref<12x2x1088xf32, #tpu.memory_space<vmem>>, vector<12x1x1024xf32>
    %29 = vector.shape_cast %28 : vector<12x1x1024xf32> to vector<12x1024xf32>
    %c2_32 = arith.constant 2 : index
    %c0_33 = arith.constant 0 : index
    %c0_34 = arith.constant 0 : index
    %30 = vector.load %arg1[%c2_32, %c0_33, %c0_34] : memref<3x8x12xf32, #tpu.memory_space<vmem>>, vector<1x8x12xf32>
    %31 = vector.shape_cast %30 : vector<1x8x12xf32> to vector<8x12xf32>
    %cst_35 = arith.constant dense<0.000000e+00> : vector<8x1024xf32>
    %32 = tpu.matmul %31, %29, %cst_35 {dimension_numbers = #tpu.dot_dimension_numbers<[1], [0], [0], [1], [0, 0, 1, 1], [], []>} : vector<8x12xf32>, vector<12x1024xf32>, vector<8x1024xf32> -> vector<8x1024xf32>
    %33 = arith.addf %27, %32 : vector<8x1024xf32>
    %cst_36 = arith.constant 0.000000e+00 : f32
    %34 = vector.broadcast %cst_36 : f32 to vector<8x1xf32>
    %cst_37 = arith.constant 0.000000e+00 : f32
    %35 = vector.broadcast %cst_37 : f32 to vector<8x1xf32>
    %cst_38 = arith.constant dense<0.000000e+00> : vector<8xf32>
    %36 = vector.multi_reduction <add>, %16, %cst_38 [1] : vector<8x1024xf32> to vector<8xf32>
    %37 = vector.shape_cast %36 : vector<8xf32> to vector<8x1xf32>
    %38 = arith.addf %34, %37 : vector<8x1xf32>
    %39 = arith.mulf %16, %16 : vector<8x1024xf32>
    %cst_39 = arith.constant dense<0.000000e+00> : vector<8xf32>
    %40 = vector.multi_reduction <add>, %39, %cst_39 [1] : vector<8x1024xf32> to vector<8xf32>
    %41 = vector.shape_cast %40 : vector<8xf32> to vector<8x1xf32>
    %42 = arith.addf %35, %41 : vector<8x1xf32>
    %cst_40 = arith.constant dense<0.000000e+00> : vector<8xf32>
    %43 = vector.multi_reduction <add>, %33, %cst_40 [1] : vector<8x1024xf32> to vector<8xf32>
    %44 = vector.shape_cast %43 : vector<8xf32> to vector<8x1xf32>
    %45 = arith.addf %38, %44 : vector<8x1xf32>
    %46 = arith.mulf %33, %33 : vector<8x1024xf32>
    %cst_41 = arith.constant dense<0.000000e+00> : vector<8xf32>
    %47 = vector.multi_reduction <add>, %46, %cst_41 [1] : vector<8x1024xf32> to vector<8xf32>
    %48 = vector.shape_cast %47 : vector<8xf32> to vector<8x1xf32>
    %49 = arith.addf %42, %48 : vector<8x1xf32>
    %cst_42 = arith.constant 4.8828125E-4 : f32
    %50 = vector.broadcast %cst_42 : f32 to vector<8x1xf32>
    %51 = arith.mulf %45, %50 : vector<8x1xf32>
    %cst_43 = arith.constant 4.8828125E-4 : f32
    %52 = vector.broadcast %cst_43 : f32 to vector<8x1xf32>
    %53 = arith.mulf %49, %52 : vector<8x1xf32>
    %54 = arith.mulf %51, %51 : vector<8x1xf32>
    %55 = arith.subf %53, %54 : vector<8x1xf32>
    %c0_44 = arith.constant 0 : index
    %c0_45 = arith.constant 0 : index
    %56 = vector.load %arg2[%c0_44, %c0_45] : memref<8x1xf32, #tpu.memory_space<vmem>>, vector<8x1xf32>
    %cst_46 = arith.constant 9.99999974E-6 : f32
    %57 = vector.broadcast %cst_46 : f32 to vector<8x1xf32>
    %58 = arith.addf %55, %57 : vector<8x1xf32>
    %59 = math.rsqrt %58 : vector<8x1xf32>
    %60 = arith.mulf %56, %59 : vector<8x1xf32>
    %c0_47 = arith.constant 0 : index
    %c0_48 = arith.constant 0 : index
    %61 = vector.load %arg3[%c0_47, %c0_48] : memref<8x1xf32, #tpu.memory_space<vmem>>, vector<8x1xf32>
    %62 = arith.mulf %51, %60 : vector<8x1xf32>
    %63 = arith.subf %61, %62 : vector<8x1xf32>
    %64 = vector.broadcast %60 : vector<8x1xf32> to vector<8x1024xf32>
    %65 = arith.mulf %16, %64 : vector<8x1024xf32>
    %66 = vector.broadcast %63 : vector<8x1xf32> to vector<8x1024xf32>
    %67 = arith.addf %65, %66 : vector<8x1024xf32>
    %cst_49 = arith.constant 2.000000e-01 : f32
    %68 = vector.broadcast %cst_49 : f32 to vector<8x1024xf32>
    %69 = arith.mulf %68, %67 : vector<8x1024xf32>
    %70 = arith.maximumf %67, %69 : vector<8x1024xf32>
    %c0_50 = arith.constant 0 : index
    %c0_51 = arith.constant 0 : index
    %c0_52 = arith.constant 0 : index
    %71 = vector.load %arg4[%c0_50, %c0_51, %c0_52] : memref<8x2x1024xf32, #tpu.memory_space<vmem>>, vector<8x1x1024xf32>
    %72 = vector.shape_cast %71 : vector<8x1x1024xf32> to vector<8x1024xf32>
    %73 = vector.shape_cast %70 : vector<8x1024xf32> to vector<8x1x1024xf32>
    tpu.vector_store %arg4[%c0_50, %c0_51, %c0_52], %73 {strides = array<i32>} : memref<8x2x1024xf32, #tpu.memory_space<vmem>>, vector<8x1x1024xf32>,
    %74 = vector.broadcast %60 : vector<8x1xf32> to vector<8x1024xf32>
    %75 = arith.mulf %33, %74 : vector<8x1024xf32>
    %76 = vector.broadcast %63 : vector<8x1xf32> to vector<8x1024xf32>
    %77 = arith.addf %75, %76 : vector<8x1024xf32>
    %cst_53 = arith.constant 2.000000e-01 : f32
    %78 = vector.broadcast %cst_53 : f32 to vector<8x1024xf32>
    %79 = arith.mulf %78, %77 : vector<8x1024xf32>
    %80 = arith.maximumf %77, %79 : vector<8x1024xf32>
    %c0_54 = arith.constant 0 : index
    %c1_55 = arith.constant 1 : index
    %c0_56 = arith.constant 0 : index
    %81 = vector.load %arg4[%c0_54, %c1_55, %c0_56] : memref<8x2x1024xf32, #tpu.memory_space<vmem>>, vector<8x1x1024xf32>
    %82 = vector.shape_cast %81 : vector<8x1x1024xf32> to vector<8x1024xf32>
    %83 = vector.shape_cast %80 : vector<8x1024xf32> to vector<8x1x1024xf32>
    tpu.vector_store %arg4[%c0_54, %c1_55, %c0_56], %83 {strides = array<i32>} : memref<8x2x1024xf32, #tpu.memory_space<vmem>>, vector<8x1x1024xf32>,
    return
  }
}

module attributes {stable_mosaic.version = 11 : i64} {
  func.func @_convT_bn_lrelu_kernel(%arg0: memref<24x2x1088xf32, #tpu.memory_space<vmem>>, %arg1: memref<3x8x24xf32, #tpu.memory_space<vmem>>, %arg2: memref<8x1xf32, #tpu.memory_space<vmem>>, %arg3: memref<8x1xf32, #tpu.memory_space<vmem>>, %arg4: memref<8x2x1024xf32, #tpu.memory_space<vmem>>) attributes {dimension_semantics = [], scalar_prefetch = 0 : i64, scratch_operands = 0 : i64, tpu.core_type = #tpu.core_type<tc>} {
    %c0 = arith.constant 0 : index
    %c0_0 = arith.constant 0 : index
    %c0_1 = arith.constant 0 : index
    %0 = vector.load %arg0[%c0, %c0_0, %c0_1] : memref<24x2x1088xf32, #tpu.memory_space<vmem>>, vector<24x1x1024xf32>
    %1 = vector.shape_cast %0 : vector<24x1x1024xf32> to vector<24x1024xf32>
    %c0_2 = arith.constant 0 : index
    %c0_3 = arith.constant 0 : index
    %c0_4 = arith.constant 0 : index
    %2 = vector.load %arg1[%c0_2, %c0_3, %c0_4] : memref<3x8x24xf32, #tpu.memory_space<vmem>>, vector<1x8x24xf32>
    %3 = vector.shape_cast %2 : vector<1x8x24xf32> to vector<8x24xf32>
    %cst = arith.constant dense<0.000000e+00> : vector<8x1024xf32>
    %4 = tpu.matmul %3, %1, %cst {dimension_numbers = #tpu.dot_dimension_numbers<[1], [0], [0], [1], [0, 0, 1, 1], [], []>} : vector<8x24xf32>, vector<24x1024xf32>, vector<8x1024xf32> -> vector<8x1024xf32>
    %c0_5 = arith.constant 0 : index
    %c0_6 = arith.constant 0 : index
    %c32 = arith.constant 32 : index
    %5 = vector.load %arg0[%c0_5, %c0_6, %c32] : memref<24x2x1088xf32, #tpu.memory_space<vmem>>, vector<24x1x1024xf32>
    %6 = vector.shape_cast %5 : vector<24x1x1024xf32> to vector<24x1024xf32>
    %c1 = arith.constant 1 : index
    %c0_7 = arith.constant 0 : index
    %c0_8 = arith.constant 0 : index
    %7 = vector.load %arg1[%c1, %c0_7, %c0_8] : memref<3x8x24xf32, #tpu.memory_space<vmem>>, vector<1x8x24xf32>
    %8 = vector.shape_cast %7 : vector<1x8x24xf32> to vector<8x24xf32>
    %cst_9 = arith.constant dense<0.000000e+00> : vector<8x1024xf32>
    %9 = tpu.matmul %8, %6, %cst_9 {dimension_numbers = #tpu.dot_dimension_numbers<[1], [0], [0], [1], [0, 0, 1, 1], [], []>} : vector<8x24xf32>, vector<24x1024xf32>, vector<8x1024xf32> -> vector<8x1024xf32>
    %10 = arith.addf %4, %9 : vector<8x1024xf32>
    %c0_10 = arith.constant 0 : index
    %c0_11 = arith.constant 0 : index
    %c64 = arith.constant 64 : index
    %11 = vector.load %arg0[%c0_10, %c0_11, %c64] : memref<24x2x1088xf32, #tpu.memory_space<vmem>>, vector<24x1x1024xf32>
    %12 = vector.shape_cast %11 : vector<24x1x1024xf32> to vector<24x1024xf32>
    %c2 = arith.constant 2 : index
    %c0_12 = arith.constant 0 : index
    %c0_13 = arith.constant 0 : index
    %13 = vector.load %arg1[%c2, %c0_12, %c0_13] : memref<3x8x24xf32, #tpu.memory_space<vmem>>, vector<1x8x24xf32>
    %14 = vector.shape_cast %13 : vector<1x8x24xf32> to vector<8x24xf32>
    %cst_14 = arith.constant dense<0.000000e+00> : vector<8x1024xf32>
    %15 = tpu.matmul %14, %12, %cst_14 {dimension_numbers = #tpu.dot_dimension_numbers<[1], [0], [0], [1], [0, 0, 1, 1], [], []>} : vector<8x24xf32>, vector<24x1024xf32>, vector<8x1024xf32> -> vector<8x1024xf32>
    %16 = arith.addf %10, %15 : vector<8x1024xf32>
    %c0_15 = arith.constant 0 : index
    %c1_16 = arith.constant 1 : index
    %c0_17 = arith.constant 0 : index
    %17 = vector.load %arg0[%c0_15, %c1_16, %c0_17] : memref<24x2x1088xf32, #tpu.memory_space<vmem>>, vector<24x1x1024xf32>
    %18 = vector.shape_cast %17 : vector<24x1x1024xf32> to vector<24x1024xf32>
    %c0_18 = arith.constant 0 : index
    %c0_19 = arith.constant 0 : index
    %c0_20 = arith.constant 0 : index
    %19 = vector.load %arg1[%c0_18, %c0_19, %c0_20] : memref<3x8x24xf32, #tpu.memory_space<vmem>>, vector<1x8x24xf32>
    %20 = vector.shape_cast %19 : vector<1x8x24xf32> to vector<8x24xf32>
    %cst_21 = arith.constant dense<0.000000e+00> : vector<8x1024xf32>
    %21 = tpu.matmul %20, %18, %cst_21 {dimension_numbers = #tpu.dot_dimension_numbers<[1], [0], [0], [1], [0, 0, 1, 1], [], []>} : vector<8x24xf32>, vector<24x1024xf32>, vector<8x1024xf32> -> vector<8x1024xf32>
    %c0_22 = arith.constant 0 : index
    %c1_23 = arith.constant 1 : index
    %c32_24 = arith.constant 32 : index
    %22 = vector.load %arg0[%c0_22, %c1_23, %c32_24] : memref<24x2x1088xf32, #tpu.memory_space<vmem>>, vector<24x1x1024xf32>
    %23 = vector.shape_cast %22 : vector<24x1x1024xf32> to vector<24x1024xf32>
    %c1_25 = arith.constant 1 : index
    %c0_26 = arith.constant 0 : index
    %c0_27 = arith.constant 0 : index
    %24 = vector.load %arg1[%c1_25, %c0_26, %c0_27] : memref<3x8x24xf32, #tpu.memory_space<vmem>>, vector<1x8x24xf32>
    %25 = vector.shape_cast %24 : vector<1x8x24xf32> to vector<8x24xf32>
    %cst_28 = arith.constant dense<0.000000e+00> : vector<8x1024xf32>
    %26 = tpu.matmul %25, %23, %cst_28 {dimension_numbers = #tpu.dot_dimension_numbers<[1], [0], [0], [1], [0, 0, 1, 1], [], []>} : vector<8x24xf32>, vector<24x1024xf32>, vector<8x1024xf32> -> vector<8x1024xf32>
    %27 = arith.addf %21, %26 : vector<8x1024xf32>
    %c0_29 = arith.constant 0 : index
    %c1_30 = arith.constant 1 : index
    %c64_31 = arith.constant 64 : index
    %28 = vector.load %arg0[%c0_29, %c1_30, %c64_31] : memref<24x2x1088xf32, #tpu.memory_space<vmem>>, vector<24x1x1024xf32>
    %29 = vector.shape_cast %28 : vector<24x1x1024xf32> to vector<24x1024xf32>
    %c2_32 = arith.constant 2 : index
    %c0_33 = arith.constant 0 : index
    %c0_34 = arith.constant 0 : index
    %30 = vector.load %arg1[%c2_32, %c0_33, %c0_34] : memref<3x8x24xf32, #tpu.memory_space<vmem>>, vector<1x8x24xf32>
    %31 = vector.shape_cast %30 : vector<1x8x24xf32> to vector<8x24xf32>
    %cst_35 = arith.constant dense<0.000000e+00> : vector<8x1024xf32>
    %32 = tpu.matmul %31, %29, %cst_35 {dimension_numbers = #tpu.dot_dimension_numbers<[1], [0], [0], [1], [0, 0, 1, 1], [], []>} : vector<8x24xf32>, vector<24x1024xf32>, vector<8x1024xf32> -> vector<8x1024xf32>
    %33 = arith.addf %27, %32 : vector<8x1024xf32>
    %cst_36 = arith.constant 0.000000e+00 : f32
    %34 = vector.broadcast %cst_36 : f32 to vector<8x1xf32>
    %cst_37 = arith.constant 0.000000e+00 : f32
    %35 = vector.broadcast %cst_37 : f32 to vector<8x1xf32>
    %cst_38 = arith.constant dense<0.000000e+00> : vector<8xf32>
    %36 = vector.multi_reduction <add>, %16, %cst_38 [1] : vector<8x1024xf32> to vector<8xf32>
    %37 = vector.shape_cast %36 : vector<8xf32> to vector<8x1xf32>
    %38 = arith.addf %34, %37 : vector<8x1xf32>
    %39 = arith.mulf %16, %16 : vector<8x1024xf32>
    %cst_39 = arith.constant dense<0.000000e+00> : vector<8xf32>
    %40 = vector.multi_reduction <add>, %39, %cst_39 [1] : vector<8x1024xf32> to vector<8xf32>
    %41 = vector.shape_cast %40 : vector<8xf32> to vector<8x1xf32>
    %42 = arith.addf %35, %41 : vector<8x1xf32>
    %cst_40 = arith.constant dense<0.000000e+00> : vector<8xf32>
    %43 = vector.multi_reduction <add>, %33, %cst_40 [1] : vector<8x1024xf32> to vector<8xf32>
    %44 = vector.shape_cast %43 : vector<8xf32> to vector<8x1xf32>
    %45 = arith.addf %38, %44 : vector<8x1xf32>
    %46 = arith.mulf %33, %33 : vector<8x1024xf32>
    %cst_41 = arith.constant dense<0.000000e+00> : vector<8xf32>
    %47 = vector.multi_reduction <add>, %46, %cst_41 [1] : vector<8x1024xf32> to vector<8xf32>
    %48 = vector.shape_cast %47 : vector<8xf32> to vector<8x1xf32>
    %49 = arith.addf %42, %48 : vector<8x1xf32>
    %cst_42 = arith.constant 4.8828125E-4 : f32
    %50 = vector.broadcast %cst_42 : f32 to vector<8x1xf32>
    %51 = arith.mulf %45, %50 : vector<8x1xf32>
    %cst_43 = arith.constant 4.8828125E-4 : f32
    %52 = vector.broadcast %cst_43 : f32 to vector<8x1xf32>
    %53 = arith.mulf %49, %52 : vector<8x1xf32>
    %54 = arith.mulf %51, %51 : vector<8x1xf32>
    %55 = arith.subf %53, %54 : vector<8x1xf32>
    %c0_44 = arith.constant 0 : index
    %c0_45 = arith.constant 0 : index
    %56 = vector.load %arg2[%c0_44, %c0_45] : memref<8x1xf32, #tpu.memory_space<vmem>>, vector<8x1xf32>
    %cst_46 = arith.constant 9.99999974E-6 : f32
    %57 = vector.broadcast %cst_46 : f32 to vector<8x1xf32>
    %58 = arith.addf %55, %57 : vector<8x1xf32>
    %59 = math.rsqrt %58 : vector<8x1xf32>
    %60 = arith.mulf %56, %59 : vector<8x1xf32>
    %c0_47 = arith.constant 0 : index
    %c0_48 = arith.constant 0 : index
    %61 = vector.load %arg3[%c0_47, %c0_48] : memref<8x1xf32, #tpu.memory_space<vmem>>, vector<8x1xf32>
    %62 = arith.mulf %51, %60 : vector<8x1xf32>
    %63 = arith.subf %61, %62 : vector<8x1xf32>
    %64 = vector.broadcast %60 : vector<8x1xf32> to vector<8x1024xf32>
    %65 = arith.mulf %16, %64 : vector<8x1024xf32>
    %66 = vector.broadcast %63 : vector<8x1xf32> to vector<8x1024xf32>
    %67 = arith.addf %65, %66 : vector<8x1024xf32>
    %cst_49 = arith.constant 2.000000e-01 : f32
    %68 = vector.broadcast %cst_49 : f32 to vector<8x1024xf32>
    %69 = arith.mulf %68, %67 : vector<8x1024xf32>
    %70 = arith.maximumf %67, %69 : vector<8x1024xf32>
    %c0_50 = arith.constant 0 : index
    %c0_51 = arith.constant 0 : index
    %c0_52 = arith.constant 0 : index
    %71 = vector.load %arg4[%c0_50, %c0_51, %c0_52] : memref<8x2x1024xf32, #tpu.memory_space<vmem>>, vector<8x1x1024xf32>
    %72 = vector.shape_cast %71 : vector<8x1x1024xf32> to vector<8x1024xf32>
    %73 = vector.shape_cast %70 : vector<8x1024xf32> to vector<8x1x1024xf32>
    tpu.vector_store %arg4[%c0_50, %c0_51, %c0_52], %73 {strides = array<i32>} : memref<8x2x1024xf32, #tpu.memory_space<vmem>>, vector<8x1x1024xf32>,
    %74 = vector.broadcast %60 : vector<8x1xf32> to vector<8x1024xf32>
    %75 = arith.mulf %33, %74 : vector<8x1024xf32>
    %76 = vector.broadcast %63 : vector<8x1xf32> to vector<8x1024xf32>
    %77 = arith.addf %75, %76 : vector<8x1024xf32>
    %cst_53 = arith.constant 2.000000e-01 : f32
    %78 = vector.broadcast %cst_53 : f32 to vector<8x1024xf32>
    %79 = arith.mulf %78, %77 : vector<8x1024xf32>
    %80 = arith.maximumf %77, %79 : vector<8x1024xf32>
    %c0_54 = arith.constant 0 : index
    %c1_55 = arith.constant 1 : index
    %c0_56 = arith.constant 0 : index
    %81 = vector.load %arg4[%c0_54, %c1_55, %c0_56] : memref<8x2x1024xf32, #tpu.memory_space<vmem>>, vector<8x1x1024xf32>
    %82 = vector.shape_cast %81 : vector<8x1x1024xf32> to vector<8x1024xf32>
    %83 = vector.shape_cast %80 : vector<8x1024xf32> to vector<8x1x1024xf32>
    tpu.vector_store %arg4[%c0_54, %c1_55, %c0_56], %83 {strides = array<i32>} : memref<8x2x1024xf32, #tpu.memory_space<vmem>>, vector<8x1x1024xf32>,
    return
  }
}

</mosaic_0001>

<bundles_post_ra>
// kernel: decoder_forward.3
= control target key start
LH: loop header
LB: loop body
LE: loop exit
PB: predicated region body
PF: predicated region fallthrough
CT: control target
= control target key end

     0   :  { %v102_v0 = vlaneseq  ;;  %v4126_v4 = vmov 1966171168   ;;  %s4127_s13 = smov 96   ;;  %s4129_s11 = smov 64   ;;  %vm404_vm0 = vcmask 785408   ;;  %vm433_vm1 = vcmask 1043456   ;;  %s5389_s0 = inlined_call_operand.vmem [shape: f32[12,2,1088], index: 0, kind: input, shape index: {}]   ;;  %s5390_s1 = inlined_call_operand.vmem [shape: f32[3,8,12], index: 1, kind: input, shape index: {}]   ;;  %s5391_s2 = inlined_call_operand.vmem [shape: f32[8,1], index: 2, kind: input, shape index: {}]   ;;  %s5392_s3 = inlined_call_operand.vmem [shape: f32[8,1], index: 3, kind: input, shape index: {}]   ;;  %s5393_s4 = inlined_call_operand.vmem [shape: f32[8,2,1024], index: 4, kind: output, shape index: {}]  }
   0x1   :  { %v3941_v1 = vld [vmem:[%s5389_s0 + $0x90] ss:$2 sm:$0xff]  ;;  %v100_v5 = vunpack.c.l.s4 %v4126_v4  ;;  %v17_v9 = vld [vmem:[%s5389_s0] ss:$2 sm:$0xff]  ;;  %vm429_vm2 = vcmask 97280   ;;  %vm1408_vm3 = vcmask 523264  }
   0x2   :  { %v3942_v2 = vld [vmem:[%s5389_s0 + $0xa2] ss:$2 sm:$0xff]  ;;  %v103_v7 = vshrl.u32 %v102_v0, 7  ;;  %v3934_v14 = vld [vmem:[%s5389_s0 + $0x12] ss:$2 sm:$0xff] }
   0x3   :  { %v3943_v3 = vld [vmem:[%s5389_s0 + $0xb4] ss:$2 sm:$0xff]  ;;  %v276_v8 = vcombine.low %v3941_v1, %v3942_v2  ;;  %v101_v10 = vunpack.c.0.s8 %v100_v5  ;;  %v277_v12 = vcombine.high %v3941_v1, %v3942_v2  ;;  %v3935_v15 = vld [vmem:[%s5389_s0 + $0x24] ss:$2 sm:$0xff]  ;;  %v91_v20 = vcombine.low %v17_v9, %v3934_v14 }
   0x4   :  { %v3944_v6 = vld [vmem:[%s5389_s0 + $0xc6] ss:$2 sm:$0xff]  ;;  %v3936_v16 = vld [vmem:[%s5389_s0 + $0x36] ss:$2 sm:$0xff]  ;;  %v92_v37 = vcombine.high %v17_v9, %v3934_v14 }
   0x5   :  { %v278_v11 = vcombine.low %v3943_v3, %v3944_v6  ;;  %v279_v13 = vcombine.high %v3943_v3, %v3944_v6  ;;  %v3937_v17 = vld [vmem:[%s5389_s0 + $0x48] ss:$2 sm:$0xff]  ;;  %v93_v21 = vcombine.low %v3935_v15, %v3936_v16  ;;  %v4189_v22 = vsub.s32 %v101_v10, %v103_v7  ;;  %v3953_v59 = vld [vmem:[%s5389_s0 + $0xa0] ss:$2 sm:$0x1] }
   0x6   :  { %v3938_v18 = vld [vmem:[%s5389_s0 + $0x5a] ss:$2 sm:$0xff]  ;;  %v94_v44 = vcombine.high %v3935_v15, %v3936_v16  ;;  %v3954_v60 = vld [vmem:[%s5389_s0 + $0xb2] ss:$2 sm:$0x1] }
   0x7   :  { %v3939_v19 = vld [vmem:[%s5389_s0 + $0x6c] ss:$2 sm:$0xff]  ;;  %v95_v24 = vcombine.low %v3937_v17, %v3938_v18  ;;  %v286_v26 = vrot.slane %v276_v8, %v4189_v22  ;;  %v300_v27 = vrot.slane %v278_v11, %v4189_v22  ;;  %v4197_v28 = vrot.slane %v277_v12, %v4189_v22  ;;  %v3955_v61 = vld [vmem:[%s5389_s0 + $0xc4] ss:$2 sm:$0x1] }
   0x8   :  { %v3940_v23 = vld [vmem:[%s5389_s0 + $0x7e] ss:$2 sm:$0xff]  ;;  %v4200_v29 = vrot.slane %v279_v13, %v4189_v22  ;;  %v105_v30 = vrot.slane %v91_v20, %v4189_v22  ;;  %v119_v31 = vrot.slane %v93_v21, %v4189_v22  ;;  %v96_v45 = vcombine.high %v3937_v17, %v3938_v18  ;;  %v3956_v62 = vld [vmem:[%s5389_s0 + $0xd6] ss:$2 sm:$0x1] }
   0x9   :  { %v97_v25 = vcombine.low %v3939_v19, %v3940_v23  ;;  %v133_v32 = vrot.slane %v95_v24, %v4189_v22  ;;  %v309_v34 = vcombine.high %v286_v26, %v300_v27  ;;  %v308_v35 = vcombine.low %v286_v26, %v300_v27  ;;  %v3945_v63 = vld [vmem:[%s5389_s0 + $0x10] ss:$2 sm:$0x1]  ;;  %v3946_v0 = vld [vmem:[%s5389_s0 + $0x22] ss:$2 sm:$0x1] }
   0xa   :  { %v310_v36 = vcombine.low %v4197_v28, %v4200_v29  ;;  %v156_v38 = vcombine.high %v105_v30, %v119_v31  ;;  %v155_v40 = vcombine.low %v105_v30, %v119_v31  ;;  %v98_v49 = vcombine.high %v3939_v19, %v3940_v23  ;;  %v3947_v3 = vld [vmem:[%s5389_s0 + $0x34] ss:$2 sm:$0x1]  ;;  %v3948_v4 = vld [vmem:[%s5389_s0 + $0x46] ss:$2 sm:$0x1] }
   0xb   :  { %v147_v33 = vrot.slane %v97_v25, %v4189_v22  ;;  %v4209_v42 = vrot.slane %v309_v34, %v4189_v22  ;;  %v4212_v43 = vrot.slane %v308_v35, %v4189_v22  ;;  %v112_v53 = vrot.slane %v92_v37, %v4189_v22  ;;  %v3949_v8 = vld [vmem:[%s5389_s0 + $0x58] ss:$2 sm:$0x1]  ;;  %v3950_v9 = vld [vmem:[%s5389_s0 + $0x6a] ss:$2 sm:$0x1] }
   0xc   :  { %v4215_v46 = vrot.slane %v310_v36, %v4189_v22  ;;  %v4218_v47 = vrot.slane %v156_v38, %v4189_v22  ;;  %v169_v51 = vrot.slane %v155_v40, %v4189_v22  ;;  %v126_v54 = vrot.slane %v94_v44, %v4189_v22  ;;  %v3951_v12 = vld [vmem:[%s5389_s0 + $0x7c] ss:$2 sm:$0x1]  ;;  %v3952_v13 = vld [vmem:[%s5389_s0 + $0x8e] ss:$2 sm:$0x1] }
   0xd   :  { %v160_v39 = vcombine.high %v133_v32, %v147_v33  ;;  %v159_v41 = vcombine.low %v133_v32, %v147_v33  ;;  %388 = vrot.lane.b32.xlu0 %v4209_v42, %s4127_s13  ;;  %386 = vrot.lane.b32.xlu1 %v4212_v43, %s4127_s13  ;;  %v4229_v50 = vcombine.high %v4212_v43, %v4212_v43  ;;  %v4311_v25 = vld [vmem:[%s5389_s0 + $0x90] ss:$2 sm:$0xff]  ;;  %v5394_v31 = vmov 0.0   ;;  %v4338_v36 = vld [vmem:[%s5389_s0] ss:$2 sm:$0xff] }
   0xe   :  { %v140_v55 = vrot.slane %v96_v45, %v4189_v22  ;;  %v154_v56 = vrot.slane %v98_v49, %v4189_v22  ;;  %v157_v1 = vcombine.low %v112_v53, %v126_v54  ;;  %v4277_v5 = vcombine.high %v4209_v42, %v4209_v42  ;;  %v4328_v30 = vld [vmem:[%s5389_s0 + $0xc6] ss:$2 sm:$0xff]  ;;  %514 = vmatprep.mubr.f32.mxu0 %v5394_v31  ;;  %v4361_v44 = vld [vmem:[%s5389_s0 + $0x36] ss:$2 sm:$0xff] }
   0xf   :  { %v4221_v48 = vrot.slane %v160_v39, %v4189_v22  ;;  %v197_v52 = vrot.slane %v159_v41, %v4189_v22  ;;  %v311_v7 = vcombine.high %v4197_v28, %v4200_v29  ;;  %v344_v10 = vcombine.low %v3953_v59, %v3954_v60  ;;  %v4318_v28 = vld [vmem:[%s5389_s0 + $0xa2] ss:$2 sm:$0xff]  ;;  %v4343_v37 = vld [vmem:[%s5389_s0 + $0x12] ss:$2 sm:$0xff]  ;;  %585 = vmatprep.mubr.f32.mxu1 %v5394_v31 }
  0x10   :  { %v161_v2 = vcombine.low %v140_v55, %v154_v56  ;;  %v345_v11 = vcombine.low %v3955_v61, %v3956_v62  ;;  %v158_v14 = vcombine.high %v112_v53, %v126_v54  ;;  %v162_v15 = vcombine.high %v140_v55, %v154_v56  ;;  %v4323_v29 = vld [vmem:[%s5389_s0 + $0xb4] ss:$2 sm:$0xff]  ;;  %v4348_v38 = vld [vmem:[%s5389_s0 + $0x24] ss:$2 sm:$0xff] }
  0x11   :  { %394 = vrot.lane.b32.xlu1 %v4215_v46, %s4127_s13  ;;  %390 = vrot.lane.b32.xlu0 %v4229_v50, %s4127_s13  ;;  %v4243_v57 = vcombine.low %v4218_v47, %v4221_v48  ;;  %v4245_v58 = vcombine.high %v169_v51, %v197_v52  ;;  %v4279_v6 = vcombine.low %v169_v51, %v197_v52  ;;  %v4366_v45 = vld [vmem:[%s5389_s0 + $0x48] ss:$2 sm:$0xff] }
  0x12   :  { %v227_v16 = vcombine.low %v3945_v63, %v3946_v0  ;;  %v228_v17 = vcombine.low %v3947_v3, %v3948_v4  ;;  %v176_v18 = vrot.slane %v157_v1, %v4189_v22  ;;  %v204_v19 = vrot.slane %v161_v2, %v4189_v22  ;;  %v4371_v49 = vld [vmem:[%s5389_s0 + $0x5a] ss:$2 sm:$0xff] }
  0x13   :  { %v229_v20 = vcombine.low %v3949_v8, %v3950_v9  ;;  %v4302_v21 = vrot.slane %v311_v7, %v4189_v22  ;;  %v4306_v23 = vcombine.high %v4215_v46, %v4215_v46  ;;  %v230_v24 = vcombine.low %v3951_v12, %v3952_v13  ;;  %v4385_v52 = vld [vmem:[%s5389_s0 + $0x6c] ss:$2 sm:$0xff] }
  0x14   :  { %v352_v26 = vrot.slane %v344_v10, %v4189_v22  ;;  %v359_v27 = vrot.slane %v345_v11, %v4189_v22  ;;  %v190_v32 = vrot.slane %v158_v14, %v4189_v22  ;;  %v218_v33 = vrot.slane %v162_v15, %v4189_v22  ;;  %v4390_v53 = vld [vmem:[%s5389_s0 + $0x7e] ss:$2 sm:$0xff] }
  0x15   :  { %370 = vrot.lane.b32.xlu1 %v4243_v57, %s4127_s13  ;;  %372 = vrot.lane.b32.xlu0 %v4245_v58, %s4127_s13  ;;  %v237_v34 = vrot.slane %v227_v16, %v4189_v22  ;;  %v244_v35 = vrot.slane %v228_v17, %v4189_v22  ;;  %v4353_v39 = vcombine.high %v4218_v47, %v4221_v48 }
  0x16   :  { %v4355_v40 = vcombine.low %v176_v18, %v204_v19  ;;  %v251_v41 = vrot.slane %v229_v20, %v4189_v22  ;;  %v258_v47 = vrot.slane %v230_v24, %v4189_v22  ;;  %v1280_v48 = vcombine.low %v4311_v25, %v4318_v28 }
  0x17   :  { %v1282_v51 = vcombine.low %v4323_v29, %v4328_v30  ;;  %v4392_v54 = vcombine.low %v190_v32, %v218_v33  ;;  %v4394_v55 = vcombine.high %v176_v18, %v204_v19  ;;  %v360_v56 = vcombine.low %v352_v26, %v359_v27 }
  0x18   :  { %v259_v59 = vcombine.low %v237_v34, %v244_v35  ;;  %v1095_v60 = vcombine.low %v4338_v36, %v4343_v37  ;;  %v1097_v61 = vcombine.low %v4348_v38, %v4361_v44  ;;  %v1099_v62 = vcombine.low %v4366_v45, %v4371_v49 }
  0x19   :  { %392 = vrot.lane.b32.xlu0 %v4277_v5, %s4127_s13  ;;  %368 = vrot.lane.b32.xlu1 %v4279_v6, %s4127_s13  ;;  %v1101_v63 = vcombine.low %v4385_v52, %v4390_v53  ;;  %v260_v0 = vcombine.low %v251_v41, %v258_v47  ;;  %v1290_v1 = vrot.slane %v1280_v48, %v4189_v22 }
  0x1a   :  { %v1304_v2 = vrot.slane %v1282_v51, %v4189_v22  ;;  %v4412_v3 = vcombine.high %v4302_v21, %v4302_v21  ;;  %v367_v4 = vrot.slane %v360_v56, %v4189_v22  ;;  %v267_v7 = vrot.slane %v259_v59, %v4189_v22 }
  0x1b   :  { %v1109_v8 = vrot.slane %v1095_v60, %v4189_v22  ;;  %v1123_v9 = vrot.slane %v1097_v61, %v4189_v22  ;;  %v1137_v10 = vrot.slane %v1099_v62, %v4189_v22  ;;  %v274_v11 = vrot.slane %v260_v0, %v4189_v22  ;;  %v4004_v62 = vld [vmem:[%s5389_s0 + $0xd6] ss:$2 sm:$0x1]  ;;  %v4482_v0 = vld [vmem:[%s5389_s0 + $0x91] ss:$2 sm:$0xff] }
  0x1c   :  { %v1312_v12 = vcombine.low %v1290_v1, %v1304_v2  ;;  %v1151_v13 = vrot.slane %v1101_v63, %v4189_v22  ;;  %v4425_v14 = vcombine.high %v190_v32, %v218_v33  ;;  %v1313_v15 = vcombine.high %v1290_v1, %v1304_v2  ;;  %v4487_v1 = vld [vmem:[%s5389_s0 + $0xa3] ss:$2 sm:$0xff] }
  0x1d   :  { %396 = vrot.lane.b32.xlu0 %v4302_v21, %s4127_s13  ;;  %398 = vrot.lane.b32.xlu1 %v4306_v23, %s4127_s13  ;;  %v1160_v16 = vcombine.high %v1109_v8, %v1123_v9  ;;  %v275_v17 = vcombine.low %v267_v7, %v274_v11  ;;  %v1159_v20 = vcombine.low %v1109_v8, %v1123_v9  ;;  %v4495_v8 = vld [vmem:[%s5389_s0 + $0xb5] ss:$2 sm:$0xff] }
  0x1e   :  { %v1322_v18 = vrot.slane %v1312_v12, %v4189_v22  ;;  %v1164_v19 = vcombine.high %v1137_v10, %v1151_v13  ;;  %v1163_v24 = vcombine.low %v1137_v10, %v1151_v13  ;;  %v1336_v26 = vrot.slane %v1313_v15, %v4189_v22  ;;  %v4500_v9 = vld [vmem:[%s5389_s0 + $0xc7] ss:$2 sm:$0xff] }
  0x1f   :  { %v1281_v27 = vcombine.high %v4311_v25, %v4318_v28  ;;  %v1283_v32 = vcombine.high %v4323_v29, %v4328_v30  ;;  %v4440_v34 = vrot.slane %v1160_v16, %v4189_v22  ;;  %v1173_v41 = vrot.slane %v1159_v20, %v4189_v22 }
  0x20   :  { %v1344_v33 = vcombine.high %v1322_v18, %v1322_v18  ;;  %v4443_v35 = vrot.slane %v1164_v19, %v4189_v22  ;;  %v1201_v47 = vrot.slane %v1163_v24, %v4189_v22  ;;  %v1096_v29 = vcombine.high %v4338_v36, %v4343_v37 }
  0x21   :  { %374 = vrot.lane.b32.xlu0 %v4353_v39, %s4127_s13  ;;  %376 = vrot.lane.b32.xlu1 %v4355_v40, %s4127_s13  ;;  %v1297_v25 = vrot.slane %v1281_v27, %v4189_v22  ;;  %v1311_v28 = vrot.slane %v1283_v32, %v4189_v22  ;;  %v1098_v30 = vcombine.high %v4348_v38, %v4361_v44  ;;  %v3982_v27 = vld [vmem:[%s5389_s0 + $0x10] ss:$2 sm:$0x1]  ;;  %v3984_v32 = vld [vmem:[%s5389_s0 + $0x22] ss:$2 sm:$0x1] }
  0x22   :  { %v1227_v48 = vcombine.low %v4440_v34, %v4443_v35  ;;  %v1100_v51 = vcombine.high %v4366_v45, %v4371_v49  ;;  %v1102_v56 = vcombine.high %v4385_v52, %v4390_v53  ;;  %v1224_v59 = vcombine.high %v1173_v41, %v1201_v47  ;;  %v3998_v45 = vld [vmem:[%s5389_s0 + $0xa0] ss:$2 sm:$0x1]  ;;  %v4000_v49 = vld [vmem:[%s5389_s0 + $0xb2] ss:$2 sm:$0x1] }
  0x23   :  { %v1223_v60 = vcombine.low %v1173_v41, %v1201_v47  ;;  %v1314_v36 = vcombine.low %v1297_v25, %v1311_v28  ;;  %v1116_v37 = vrot.slane %v1096_v29, %v4189_v22  ;;  %v1130_v38 = vrot.slane %v1098_v30, %v4189_v22  ;;  %v4002_v53 = vld [vmem:[%s5389_s0 + $0xc4] ss:$2 sm:$0x1]  ;;  %v3988_v41 = vld [vmem:[%s5389_s0 + $0x46] ss:$2 sm:$0x1] }
  0x24   :  { %v1144_v44 = vrot.slane %v1100_v51, %v4189_v22  ;;  %v1158_v61 = vrot.slane %v1102_v56, %v4189_v22  ;;  %v1315_v52 = vcombine.high %v1297_v25, %v1311_v28  ;;  %v1346_v63 = vcombine.high %v1336_v26, %v1336_v26  ;;  %v3990_v47 = vld [vmem:[%s5389_s0 + $0x58] ss:$2 sm:$0x1]  ;;  %v3992_v25 = vld [vmem:[%s5389_s0 + $0x6a] ss:$2 sm:$0x1] }
  0x25   :  { %378 = vrot.lane.b32.xlu0 %v4392_v54, %s4127_s13  ;;  %380 = vrot.lane.b32.xlu1 %v4394_v55, %s4127_s13  ;;  %v1329_v2 = vrot.slane %v1314_v36, %v4189_v22  ;;  %v1348_v10 = vcombine.low %v3998_v45, %v4000_v49  ;;  %v1349_v11 = vcombine.low %v4002_v53, %v4004_v62  ;;  %v3994_v28 = vld [vmem:[%s5389_s0 + $0x7c] ss:$2 sm:$0x1]  ;;  %v3996_v29 = vld [vmem:[%s5389_s0 + $0x8e] ss:$2 sm:$0x1] }
  0x26   :  { %v1165_v7 = vcombine.low %v1144_v44, %v1158_v61  ;;  %v4503_v12 = vrot.slane %v1315_v52, %v4189_v22  ;;  %v1162_v13 = vcombine.high %v1116_v37, %v1130_v38  ;;  %v1166_v15 = vcombine.high %v1144_v44, %v1158_v61  ;;  %v4560_v36 = vld [vmem:[%s5389_s0 + $0x25] ss:$2 sm:$0xff] }
  0x27   :  { %v2001_v16 = vcombine.low %v4482_v0, %v4487_v1  ;;  %v1356_v24 = vrot.slane %v1348_v10, %v4189_v22  ;;  %v4570_v44 = vld [vmem:[%s5389_s0 + $0x37] ss:$2 sm:$0xff]  ;;  %v1231_v52 = vcombine.low %v3982_v27, %v3984_v32  ;;  %v1233_v62 = vcombine.low %v3990_v47, %v3992_v25 }
  0x28   :  { %v1208_v20 = vrot.slane %v1165_v7, %v4189_v22  ;;  %v4540_v30 = vrot.slane %v1162_v13, %v4189_v22  ;;  %v4575_v61 = vld [vmem:[%s5389_s0 + $0x49] ss:$2 sm:$0xff] }
  0x29   :  { %400 = vrot.lane.b32.xlu0 %v4412_v3, %s4127_s13  ;;  %402 = vrot.lane.b32.xlu1 %v367_v4, %s4127_s13  ;;  %v1161_v4 = vcombine.low %v1116_v37, %v1130_v38  ;;  %v2011_v51 = vrot.slane %v2001_v16, %v4189_v22  ;;  %v1228_v37 = vcombine.high %v4440_v34, %v4443_v35  ;;  %v4580_v49 = vld [vmem:[%s5389_s0 + $0x5b] ss:$2 sm:$0xff] }
  0x2a   :  { %v4585_v34 = vld [vmem:[%s5389_s0 + $0x6d] ss:$2 sm:$0xff]  ;;  %v1820_v13 = vcombine.low %v4575_v61, %v4580_v49  ;;  %v1347_v16 = vcombine.high %v4503_v12, %v4503_v12 }
  0x2b   :  { %v1180_v19 = vrot.slane %v1161_v4, %v4189_v22  ;;  %v4590_v35 = vld [vmem:[%s5389_s0 + $0x7f] ss:$2 sm:$0xff] }
  0x2d   :  { %382 = vrot.lane.b32.xlu0 %v4425_v14, %s4127_s13  ;;  %384 = vrot.lane.b32.xlu1 %v275_v17, %s4127_s13  ;;  %v2003_v17 = vcombine.low %v4495_v8, %v4500_v9  ;;  %v1225_v38 = vcombine.low %v1180_v19, %v1208_v20  ;;  %v1226_v4 = vcombine.high %v1180_v19, %v1208_v20 }
  0x2e   :  { %v1255_v19 = vrot.slane %v1233_v62, %v4189_v22  ;;  %v2004_v62 = vcombine.high %v4495_v8, %v4500_v9 }
  0x2f   :  { %v2025_v56 = vrot.slane %v2003_v17, %v4189_v22  ;;  %v1241_v17 = vrot.slane %v1231_v52, %v4189_v22 }
  0x31   :  { %1392 = vrot.lane.b32.xlu0 %v1336_v26, %s4129_s11  ;;  %1394 = vrot.lane.b32.xlu1 %v1344_v33, %s4129_s11  ;;  %v1363_v26 = vrot.slane %v1349_v11, %v4189_v22  ;;  %v3986_v33 = vld [vmem:[%s5389_s0 + $0x34] ss:$2 sm:$0x1]  ;;  %v2033_v7 = vcombine.low %v2011_v51, %v2025_v56  ;;  %v1818_v11 = vcombine.low %v4560_v36, %v4570_v44 }
  0x32   :  { %v1232_v53 = vcombine.low %v3986_v33, %v3988_v41  ;;  %v1858_v33 = vrot.slane %v1820_v13, %v4189_v22 }
  0x33   :  { %v1364_v45 = vcombine.low %v1356_v24, %v1363_v26  ;;  %v2034_v26 = vcombine.high %v2011_v51, %v2025_v56  ;;  %v4612_v27 = vrot.slane %v2033_v7, %v4189_v22 }
  0x35   :  { %1390 = vrot.lane.b32.xlu0 %v1322_v18, %s4129_s11  ;;  %1374 = vrot.lane.b32.xlu1 %v1227_v48, %s4129_s11  ;;  %v1345_v18 = vcombine.high %v1329_v2, %v1329_v2  ;;  %v4543_v48 = vrot.slane %v1166_v15, %v4189_v22  ;;  %v1822_v15 = vcombine.low %v4585_v34, %v4590_v35 }
  0x36   :  { %v1371_v24 = vrot.slane %v1364_v45, %v4189_v22 }
  0x37   :  { %v1872_v41 = vrot.slane %v1822_v15, %v4189_v22 }
  0x39   :  { %1376 = vrot.lane.b32.xlu0 %v1224_v59, %s4129_s11  ;;  %1372 = vrot.lane.b32.xlu1 %v1223_v60, %s4129_s11  ;;  %v4550_v59 = vld [vmem:[%s5389_s0 + $0x1] ss:$2 sm:$0xff]  ;;  %v1885_v56 = vcombine.high %v1858_v33, %v1872_v41  ;;  %v1884_v52 = vcombine.low %v1858_v33, %v1872_v41 }
  0x3a   :  { %v4555_v60 = vld [vmem:[%s5389_s0 + $0x13] ss:$2 sm:$0xff]  ;;  %v4035_v33 = vld [vmem:[%s5389_s0 + $0x6b] ss:$2 sm:$0x1] }
  0x3b   :  { %v1816_v10 = vcombine.low %v4550_v59, %v4555_v60  ;;  %v1922_v8 = vrot.slane %v1884_v52, %v4189_v22 }
  0x3d   :  { %1396 = vrot.lane.b32.xlu0 %v1346_v63, %s4129_s11  ;;  %1398 = vrot.lane.b32.xlu1 %v1329_v2, %s4129_s11  ;;  %v1234_v63 = vcombine.low %v3994_v28, %v3996_v29  ;;  %v1229_v2 = vcombine.low %v4540_v30, %v4543_v48  ;;  %v1830_v32 = vrot.slane %v1816_v10, %v4189_v22 }
  0x3e   :  { %v4621_v28 = vrot.slane %v2034_v26, %v4189_v22  ;;  %v4627_v29 = vcombine.high %v4612_v27, %v4612_v27  ;;  %v2032_v10 = vrot.slane %v2004_v62, %v4189_v22 }
  0x3f   :  { %v1262_v20 = vrot.slane %v1234_v63, %v4189_v22  ;;  %v1230_v63 = vcombine.high %v4540_v30, %v4543_v48  ;;  %v1819_v30 = vcombine.high %v4560_v36, %v4570_v44 }
  0x40   :  { %v4703_v26 = vcombine.high %v4621_v28, %v4621_v28 }
  0x41   :  { %1400 = vrot.lane.b32.xlu0 %v4503_v12, %s4129_s11  ;;  %1402 = vrot.lane.b32.xlu1 %v1345_v18, %s4129_s11  ;;  %v1248_v18 = vrot.slane %v1232_v53, %v4189_v22  ;;  %v1844_v12 = vrot.slane %v1818_v11, %v4189_v22  ;;  %v1264_v25 = vcombine.low %v1255_v19, %v1262_v20  ;;  %v4031_v19 = vld [vmem:[%s5389_s0 + $0x23] ss:$2 sm:$0x1]  ;;  %v4032_v20 = vld [vmem:[%s5389_s0 + $0x35] ss:$2 sm:$0x1] }
  0x42   :  { %v2002_v53 = vcombine.high %v4482_v0, %v4487_v1  ;;  %v1817_v1 = vcombine.high %v4550_v59, %v4555_v60  ;;  %v1821_v59 = vcombine.high %v4575_v61, %v4580_v49  ;;  %v1823_v60 = vcombine.high %v4585_v34, %v4590_v35  ;;  %v4038_v49 = vld [vmem:[%s5389_s0 + $0xa1] ss:$2 sm:$0x1]  ;;  %v4039_v34 = vld [vmem:[%s5389_s0 + $0xb3] ss:$2 sm:$0x1] }
  0x43   :  { %v1263_v47 = vcombine.low %v1241_v17, %v1248_v18  ;;  %v1881_v51 = vcombine.high %v1830_v32, %v1844_v12  ;;  %v1880_v45 = vcombine.low %v1830_v32, %v1844_v12  ;;  %v1851_v15 = vrot.slane %v1819_v30, %v4189_v22  ;;  %v4040_v35 = vld [vmem:[%s5389_s0 + $0xc5] ss:$2 sm:$0x1]  ;;  %v4041_v17 = vld [vmem:[%s5389_s0 + $0xd7] ss:$2 sm:$0x1] }
  0x44   :  { %v2018_v9 = vrot.slane %v2002_v53, %v4189_v22  ;;  %v1837_v44 = vrot.slane %v1817_v1, %v4189_v22  ;;  %v1879_v61 = vrot.slane %v1823_v60, %v4189_v22  ;;  %v4030_v18 = vld [vmem:[%s5389_s0 + $0x11] ss:$2 sm:$0x1]  ;;  %v4034_v12 = vld [vmem:[%s5389_s0 + $0x59] ss:$2 sm:$0x1]  ;;  %v2070_v52 = vcombine.low %v4040_v35, %v4041_v17 }
  0x45   :  { %1378 = vrot.lane.b32.xlu0 %v1228_v37, %s4129_s11  ;;  %1380 = vrot.lane.b32.xlu1 %v1225_v38, %s4129_s11  ;;  %v1271_v37 = vrot.slane %v1263_v47, %v4189_v22  ;;  %v1278_v38 = vrot.slane %v1264_v25, %v4189_v22  ;;  %v1894_v0 = vrot.slane %v1880_v45, %v4189_v22  ;;  %v4747_v60 = vld [vmem:[%s5389_s0 + $0xa3] ss:$2 sm:$0xff] }
  0x46   :  { %v2035_v36 = vcombine.low %v2018_v9, %v2032_v10  ;;  %v2036_v32 = vcombine.high %v2018_v9, %v2032_v10  ;;  %v1882_v47 = vcombine.low %v1837_v44, %v1851_v15  ;;  %v1952_v53 = vcombine.low %v4030_v18, %v4031_v19  ;;  %v4740_v10 = vld [vmem:[%s5389_s0 + $0x91] ss:$2 sm:$0xff] }
  0x47   :  { %v1279_v7 = vcombine.low %v1271_v37, %v1278_v38  ;;  %v4666_v11 = vcombine.high %v1894_v0, %v1922_v8  ;;  %v4668_v13 = vcombine.low %v1894_v0, %v1922_v8  ;;  %v1883_v37 = vcombine.high %v1837_v44, %v1851_v15  ;;  %v4757_v44 = vld [vmem:[%s5389_s0 + $0xc7] ss:$2 sm:$0xff] }
  0x48   :  { %v4716_v41 = vrot.slane %v2035_v36, %v4189_v22  ;;  %v2069_v38 = vcombine.low %v4038_v49, %v4039_v34  ;;  %v1901_v8 = vrot.slane %v1882_v47, %v4189_v22  ;;  %v4752_v36 = vld [vmem:[%s5389_s0 + $0xb5] ss:$2 sm:$0xff] }
  0x49   :  { %1382 = vrot.lane.b32.xlu0 %v1229_v2, %s4129_s11  ;;  %1384 = vrot.lane.b32.xlu1 %v1226_v4, %s4129_s11  ;;  %v4642_v2 = vrot.slane %v1881_v51, %v4189_v22  ;;  %v4645_v4 = vrot.slane %v1885_v56, %v4189_v22  ;;  %v4036_v51 = vld [vmem:[%s5389_s0 + $0x7d] ss:$2 sm:$0x1]  ;;  %v4037_v56 = vld [vmem:[%s5389_s0 + $0x8f] ss:$2 sm:$0x1]  ;;  %v1915_v30 = vrot.slane %v1883_v37, %v4189_v22 }
  0x4a   :  { %v1955_v0 = vcombine.low %v4036_v51, %v4037_v56  ;;  %v4733_v1 = vcombine.high %v4716_v41, %v4716_v41  ;;  %v4766_v34 = vld [vmem:[%s5389_s0 + $0x1] ss:$2 sm:$0xff] }
  0x4b   :  { %v4660_v48 = vcombine.low %v4642_v2, %v4645_v4  ;;  %v4770_v35 = vcombine.high %v4642_v2, %v4645_v4  ;;  %v4777_v19 = vld [vmem:[%s5389_s0 + $0x13] ss:$2 sm:$0xff]  ;;  %v2994_v4 = vcombine.low %v4740_v10, %v4747_v60 }
  0x4c   :  { %5400 = vst [vmem:[#allocation2_spill] sm:$0xff] %v4733_v1  ;;  %v1983_v18 = vrot.slane %v1955_v0, %v4189_v22  ;;  %v4078_v47 = vld [vmem:[%s5389_s0 + $0x6d] ss:$2 sm:$0xff] }
  0x4d   :  { %1404 = vrot.lane.b32.xlu0 %v1347_v16, %s4129_s11  ;;  %1406 = vrot.lane.b32.xlu1 %v1371_v24, %s4129_s11  ;;  %v1865_v16 = vrot.slane %v1821_v59, %v4189_v22  ;;  %v4033_v24 = vld [vmem:[%s5389_s0 + $0x47] ss:$2 sm:$0x1]  ;;  %v2077_v59 = vrot.slane %v2069_v38, %v4189_v22 }
  0x4e   :  { %v1953_v62 = vcombine.low %v4032_v20, %v4033_v24  ;;  %v4782_v20 = vld [vmem:[%s5389_s0 + $0x25] ss:$2 sm:$0xff] }
  0x4f   :  { %v1886_v25 = vcombine.low %v1865_v16, %v1879_v61  ;;  %v1887_v45 = vcombine.high %v1865_v16, %v1879_v61  ;;  %v2084_v16 = vrot.slane %v2070_v52, %v4189_v22  ;;  %v1962_v61 = vrot.slane %v1952_v53, %v4189_v22  ;;  %v4787_v24 = vld [vmem:[%s5389_s0 + $0x37] ss:$2 sm:$0xff] }
  0x50   :  { %v1969_v49 = vrot.slane %v1953_v62, %v4189_v22  ;;  %v2809_v52 = vcombine.low %v4766_v34, %v4777_v19  ;;  %v2811_v53 = vcombine.low %v4782_v20, %v4787_v24 }
  0x51   :  { %2113 = vrot.lane.b32.xlu0 %v4621_v28, %s4127_s13  ;;  %2115 = vrot.lane.b32.xlu1 %v4627_v29, %s4127_s13  ;;  %v1929_v9 = vrot.slane %v1886_v25, %v4189_v22  ;;  %v1943_v15 = vrot.slane %v1887_v45, %v4189_v22  ;;  %v4080_v25 = vld [vmem:[%s5389_s0 + $0x7f] ss:$2 sm:$0xff]  ;;  %v2085_v37 = vcombine.low %v2077_v59, %v2084_v16 }
  0x52   :  { %v1984_v38 = vcombine.low %v1962_v61, %v1969_v49  ;;  %v2823_v61 = vrot.slane %v2809_v52, %v4189_v22  ;;  %v2837_v49 = vrot.slane %v2811_v53, %v4189_v22 }
  0x53   :  { %v4793_v2 = vcombine.low %v1901_v8, %v1929_v9  ;;  %v4811_v51 = vcombine.low %v1915_v30, %v1943_v15  ;;  %v4813_v56 = vcombine.high %v1901_v8, %v1929_v9  ;;  %v2815_v8 = vcombine.low %v4078_v47, %v4080_v25 }
  0x54   :  { %v2092_v59 = vrot.slane %v2085_v37, %v4189_v22  ;;  %v1992_v16 = vrot.slane %v1984_v38, %v4189_v22  ;;  %v4840_v37 = vcombine.high %v1915_v30, %v1943_v15  ;;  %v2874_v31 = vcombine.high %v2823_v61, %v2837_v49 }
  0x55   :  { %2111 = vrot.lane.b32.xlu0 %v4612_v27, %s4127_s13  ;;  %1386 = vrot.lane.b32.xlu1 %v1230_v63, %s4129_s11  ;;  %v4725_v63 = vrot.slane %v2036_v32, %v4189_v22  ;;  %v2996_v32 = vcombine.low %v4752_v36, %v4757_v44  ;;  %5401 = vst [vmem:[#allocation3_spill] sm:$0xff] %v4813_v56 }
  0x56   :  { %5403 = vst [vmem:[#allocation5_spill] sm:$0xff] %v4840_v37  ;;  %v2995_v30 = vcombine.high %v4740_v10, %v4747_v60  ;;  %v2997_v15 = vcombine.high %v4752_v36, %v4757_v44  ;;  %v2816_v60 = vcombine.high %v4078_v47, %v4080_v25 }
  0x57   :  { %v3018_v0 = vrot.slane %v2996_v32, %v4189_v22  ;;  %v4827_v9 = vcombine.high %v4725_v63, %v4725_v63  ;;  %v2865_v32 = vrot.slane %v2815_v8, %v4189_v22 }
  0x58   :  { %v3011_v44 = vrot.slane %v2995_v30, %v4189_v22 }
  0x59   :  { %1388 = vrot.lane.b32.xlu0 %v1279_v7, %s4129_s11  ;;  %2095 = vrot.lane.b32.xlu1 %v4660_v48, %s4127_s13  ;;  %v1954_v7 = vcombine.low %v4034_v12, %v4035_v33  ;;  %v4074_v12 = vld [vmem:[%s5389_s0 + $0x49] ss:$2 sm:$0xff]  ;;  %5402 = vst [vmem:[#allocation4_spill] sm:$0xff] %v4827_v9 }
  0x5a   :  { %v4076_v33 = vld [vmem:[%s5389_s0 + $0x5b] ss:$2 sm:$0xff] }
  0x5b   :  { %v1976_v17 = vrot.slane %v1954_v7, %v4189_v22  ;;  %v2813_v62 = vcombine.low %v4074_v12, %v4076_v33  ;;  %v3004_v7 = vrot.slane %v2994_v4, %v4189_v22  ;;  %v2814_v10 = vcombine.high %v4074_v12, %v4076_v33 }
  0x5d   :  { %2097 = vrot.lane.b32.xlu0 %v4666_v11, %s4127_s13  ;;  %2093 = vrot.lane.b32.xlu1 %v4668_v13, %s4127_s13  ;;  %v1985_v45 = vcombine.low %v1976_v17, %v1983_v18  ;;  %v2851_v17 = vrot.slane %v2813_v62, %v4189_v22  ;;  %v3026_v4 = vcombine.low %v3004_v7, %v3018_v0 }
  0x5e   :  { %v3027_v38 = vcombine.high %v3004_v7, %v3018_v0 }
  0x5f   :  { %v1999_v18 = vrot.slane %v1985_v45, %v4189_v22  ;;  %v3036_v53 = vrot.slane %v3026_v4, %v4189_v22  ;;  %v2878_v62 = vcombine.high %v2851_v17, %v2865_v32  ;;  %v4850_v45 = vrot.slane %v2874_v31, %v4189_v22 }
  0x60   :  { %v2877_v8 = vcombine.low %v2851_v17, %v2865_v32  ;;  %v2810_v31 = vcombine.high %v4766_v34, %v4777_v19  ;;  %v3025_v34 = vrot.slane %v2997_v15, %v4189_v22  ;;  %v4083_v17 = vld [vmem:[%s5389_s0 + $0xa1] ss:$2 sm:$0x1]  ;;  %v4071_v15 = vld [vmem:[%s5389_s0 + $0x35] ss:$2 sm:$0x1] }
  0x61   :  { %2117 = vrot.lane.b32.xlu0 %v4703_v26, %s4127_s13  ;;  %2119 = vrot.lane.b32.xlu1 %v4716_v41, %s4127_s13  ;;  %v2000_v52 = vcombine.low %v1992_v16, %v1999_v18  ;;  %v3058_v7 = vcombine.high %v3036_v53, %v3036_v53  ;;  %v4860_v0 = vrot.slane %v2878_v62, %v4189_v22  ;;  %v4085_v18 = vld [vmem:[%s5389_s0 + $0xb3] ss:$2 sm:$0x1]  ;;  %v4069_v62 = vld [vmem:[%s5389_s0 + $0x23] ss:$2 sm:$0x1] }
  0x62   :  { %v2830_v19 = vrot.slane %v2810_v31, %v4189_v22  ;;  %v3028_v47 = vcombine.low %v3011_v44, %v3025_v34 }
  0x63   :  { %v2941_v16 = vcombine.low %v4850_v45, %v4860_v0 }
  0x65   :  { %2121 = vrot.lane.b32.xlu0 %v4725_v63, %s4127_s13  ;;  %2123 = vrot.lane.b32.xlu1 %v4733_v1, %s4127_s13  ;;  %v2873_v1 = vcombine.low %v2823_v61, %v2837_v49  ;;  %v2915_v61 = vrot.slane %v2877_v8, %v4189_v22  ;;  %v3043_v8 = vrot.slane %v3028_v47, %v4189_v22  ;;  %v4081_v47 = vld [vmem:[%s5389_s0 + $0x8f] ss:$2 sm:$0x1] }
  0x67   :  { %v2887_v36 = vrot.slane %v2873_v1, %v4189_v22  ;;  %v2858_v1 = vrot.slane %v2814_v10, %v4189_v22  ;;  %v4077_v10 = vld [vmem:[%s5389_s0 + $0x6b] ss:$2 sm:$0x1] }
  0x69   :  { %2099 = vrot.lane.b32.xlu0 %v4770_v35, %s4127_s13  ;;  %2101 = vrot.lane.b32.xlu1 %v4793_v2, %s4127_s13  ;;  %v2938_v12 = vcombine.high %v2887_v36, %v2915_v61  ;;  %v2937_v33 = vcombine.low %v2887_v36, %v2915_v61  ;;  %v3029_v61 = vcombine.high %v3011_v44, %v3025_v34 }
  0x6d   :  { %2103 = vrot.lane.b32.xlu0 %v4811_v51, %s4127_s13  ;;  %2105 = vrot.lane.b32.xlu1 %v4813_v56, %s4127_s13  ;;  %v4847_v56 = vrot.slane %v3027_v38, %v4189_v22  ;;  %v4087_v38 = vld [vmem:[%s5389_s0 + $0xc5] ss:$2 sm:$0x1] }
  0x6f   :  { %v3060_v30 = vcombine.high %v4847_v56, %v4847_v56 }
  0x71   :  { %2125 = vrot.lane.b32.xlu0 %v4827_v9, %s4127_s13  ;;  %2127 = vrot.lane.b32.xlu1 %v2092_v59, %s4127_s13  ;;  %v2812_v59 = vcombine.high %v4782_v20, %v4787_v24  ;;  %v2872_v24 = vrot.slane %v2816_v60, %v4189_v22 }
  0x73   :  { %v2844_v20 = vrot.slane %v2812_v59, %v4189_v22  ;;  %v2879_v49 = vcombine.low %v2858_v1, %v2872_v24 }
  0x75   :  { %2107 = vrot.lane.b32.xlu0 %v4840_v37, %s4127_s13  ;;  %2109 = vrot.lane.b32.xlu1 %v2000_v52, %s4127_s13  ;;  %v2875_v25 = vcombine.low %v2830_v19, %v2844_v20  ;;  %v4089_v52 = vld [vmem:[%s5389_s0 + $0xd7] ss:$2 sm:$0x1]  ;;  %v4914_v59 = vrot.slane %v2879_v49, %v4189_v22  ;;  %v2876_v49 = vcombine.high %v2830_v19, %v2844_v20 }
  0x76   :  { %v2880_v37 = vcombine.high %v2858_v1, %v2872_v24  ;;  %v3063_v9 = vcombine.low %v4087_v38, %v4089_v52  ;;  %v3057_v24 = vrot.slane %v3029_v61, %v4189_v22  ;;  %v3059_v38 = vcombine.high %v3043_v8, %v3043_v8 }
  0x77   :  { %v4911_v31 = vrot.slane %v2875_v25, %v4189_v22 }
  0x78   :  { %v2936_v52 = vrot.slane %v2880_v37, %v4189_v22 }
  0x79   :  { %3106 = vrot.lane.b32.xlu0 %v4847_v56, %s4129_s11  ;;  %3108 = vrot.lane.b32.xlu1 %v3058_v7, %s4129_s11  ;;  %v4073_v7 = vld [vmem:[%s5389_s0 + $0x47] ss:$2 sm:$0x1]  ;;  %v4075_v56 = vld [vmem:[%s5389_s0 + $0x59] ss:$2 sm:$0x1]  ;;  %v2939_v34 = vcombine.low %v4911_v31, %v4914_v59 }
  0x7a   :  { %v2946_v44 = vcombine.low %v4071_v15, %v4073_v7 }
  0x7d   :  { %3104 = vrot.lane.b32.xlu0 %v3036_v53, %s4129_s11  ;;  %3088 = vrot.lane.b32.xlu1 %v2941_v16, %s4129_s11  ;;  %v4067_v53 = vld [vmem:[%s5389_s0 + $0x11] ss:$2 sm:$0x1]  ;;  %v2942_v16 = vcombine.high %v4850_v45, %v4860_v0 }
  0x7e   :  { %v2945_v0 = vcombine.low %v4067_v53, %v4069_v62  ;;  %v3077_v53 = vrot.slane %v3063_v9, %v4189_v22  ;;  %v4956_v9 = vld [vmem:[%s5390_s1 + $0x8] sm:$0xff] }
  0x7f   :  { %v389_v4 = vpop.permute.xlu0 %388  ;;  %v387_v32 = vpop.permute.xlu1 %386 }
  0x80   :  { %v413_v45 = vsel %vm404_vm0, %v387_v32, %v389_v4  ;;  %v2908_v32 = vrot.slane %v2876_v49, %v4189_v22  ;;  %v2955_v62 = vrot.slane %v2945_v0, %v4189_v22 }
  0x81   :  { %3090 = vrot.lane.b32.xlu0 %v2938_v12, %s4129_s11  ;;  %3086 = vrot.lane.b32.xlu1 %v2937_v33, %s4129_s11  ;;  %v3062_v12 = vcombine.low %v4083_v17, %v4085_v18  ;;  %v4079_v33 = vld [vmem:[%s5389_s0 + $0x7d] ss:$2 sm:$0x1]  ;;  %v2947_v17 = vcombine.low %v4075_v56, %v4077_v10 }
  0x82   :  { %v2948_v18 = vcombine.low %v4079_v33, %v4081_v47  ;;  %v2943_v61 = vcombine.low %v2908_v32, %v2936_v52  ;;  %v2940_v33 = vcombine.high %v4911_v31, %v4914_v59  ;;  %v3061_v31 = vcombine.high %v3057_v24, %v3057_v24 }
  0x83   :  { %v395_v60 = vpop.permute.xlu1 %394  ;;  %v391_v36 = vpop.permute.xlu0 %390  ;;  %v2969_v15 = vrot.slane %v2947_v17, %v4189_v22 }
  0x84   :  { %v414_v25 = vsel %vm404_vm0, %v389_v4, %v391_v36  ;;  %v3070_v4 = vrot.slane %v3062_v12, %v4189_v22  ;;  %v2976_v7 = vrot.slane %v2948_v18, %v4189_v22 }
  0x85   :  { %3958 = vmatprep.subr.msk.mxu0 %vm433_vm1, %v414_v25  ;;  %3110 = vrot.lane.b32.xlu0 %v3060_v30, %s4129_s11  ;;  %v2962_v30 = vrot.slane %v2946_v44, %v4189_v22  ;;  %v5404_v44 = vmov 0.0  }
  0x86   :  { %3112 = vrot.lane.b32.xlu1 %v3043_v8, %s4129_s11  ;;  %3959 = vmatpush1.msk.msra.mxu0 %vm433_vm1, %v413_v45  ;;  %v3078_v12 = vcombine.low %v3070_v4, %v3077_v53 }
  0x87   :  { %v371_v19 = vpop.permute.xlu1 %370  ;;  %v373_v20 = vpop.permute.xlu0 %372  ;;  %v2977_v47 = vcombine.low %v2955_v62, %v2962_v30 }
  0x88   :  { %v406_v1 = vsel %vm404_vm0, %v371_v19, %v373_v20  ;;  %v3085_v59 = vrot.slane %v3078_v12, %v4189_v22 }
  0x89   :  { %3092 = vrot.lane.b32.xlu0 %v2942_v16, %s4129_s11  ;;  %480 = vmatprep.subr.mxu0 %v406_v1 }
  0x8a   :  { %3094 = vrot.lane.b32.xlu1 %v2939_v34, %s4129_s11  ;;  %v2985_v34 = vrot.slane %v2977_v47, %v4189_v22 }
  0x8b   :  { %v393_v8 = vpop.permute.xlu0 %392  ;;  %v369_v56 = vpop.permute.xlu1 %368 }
  0x8c   :  { %v416_v10 = vsel %vm404_vm0, %v393_v8, %v395_v60  ;;  %v405_v16 = vsel %vm404_vm0, %v369_v56, %v371_v19  ;;  %v415_v37 = vsel %vm404_vm0, %v391_v36, %v393_v8  ;;  %v2978_v36 = vcombine.low %v2969_v15, %v2976_v7  ;;  %v4999_v7 = vld [vmem:[%s5390_s1] sm:$0xff] }
  0x8d   :  { %3114 = vrot.lane.b32.xlu0 %v3057_v24, %s4129_s11  ;;  %3961 = vmatprep.subr.msk.mxu1 %vm433_vm1, %v416_v10  ;;  %v2944_v24 = vcombine.high %v2908_v32, %v2936_v52 }
  0x8e   :  { %3116 = vrot.lane.b32.xlu1 %v3059_v38, %s4129_s11  ;;  %481 = vmatpush1.msra.mxu0 %v405_v16  ;;  %v2992_v17 = vrot.slane %v2978_v36, %v4189_v22 }
  0x8f   :  { %3962 = vmatpush1.msk.msra.mxu1 %vm433_vm1, %v415_v37  ;;  %v397_v25 = vpop.permute.xlu0 %396  ;;  %v399_v49 = vpop.permute.xlu1 %398  ;;  %3960 = vmatmul.mubr.msk.f32.vlgmr.msra.gmra.mxu0 %vm429_vm2, %v4956_v9 }
  0x90   :  { %v417_v45 = vsel %vm404_vm0, %v395_v60, %v397_v25  ;;  %v418_v0 = vsel %vm404_vm0, %v397_v25, %v399_v49  ;;  %656 = vmatprep.mubr.f32.mxu0 %v5404_v44  ;;  %v2993_v38 = vcombine.low %v2985_v34, %v2992_v17 }
  0x91   :  { %3096 = vrot.lane.b32.xlu0 %v2943_v61, %s4129_s11  ;;  %3964 = vmatprep.subr.msk.mxu0 %vm433_vm1, %v418_v0 }
  0x92   :  { %3098 = vrot.lane.b32.xlu1 %v2940_v33, %s4129_s11  ;;  %3965 = vmatpush1.msk.msra.mxu0 %vm433_vm1, %v417_v45 }
  0x93   :  { %v375_v60 = vpop.permute.xlu0 %374  ;;  %v377_v18 = vpop.permute.xlu1 %376 }
  0x94   :  { %v408_v19 = vsel %vm404_vm0, %v375_v60, %v377_v18  ;;  %v407_v1 = vsel %vm404_vm0, %v373_v20, %v375_v60 }
  0x95   :  { %3118 = vrot.lane.b32.xlu0 %v3061_v31, %s4129_s11  ;;  %551 = vmatprep.subr.mxu1 %v408_v19 }
  0x96   :  { %3120 = vrot.lane.b32.xlu1 %v3085_v59, %s4129_s11  ;;  %552 = vmatpush1.msra.mxu1 %v407_v1 }
  0x97   :  { %v379_v4 = vpop.permute.xlu0 %378  ;;  %v381_v53 = vpop.permute.xlu1 %380  ;;  %3963 = vmatmul.mubr.msk.f32.vlgmr.msra.gmra.mxu1 %vm429_vm2, %v4956_v9 }
  0x98   :  { %v409_v62 = vsel %vm404_vm0, %v377_v18, %v379_v4  ;;  %v410_v30 = vsel %vm404_vm0, %v379_v4, %v381_v53  ;;  %727 = vmatprep.mubr.f32.mxu1 %v5404_v44 }
  0x99   :  { %3100 = vrot.lane.b32.xlu0 %v2944_v24, %s4129_s11  ;;  %622 = vmatprep.subr.mxu0 %v410_v30 }
  0x9a   :  { %3102 = vrot.lane.b32.xlu1 %v2993_v38, %s4129_s11  ;;  %623 = vmatpush1.msra.mxu0 %v409_v62 }
  0x9b   :  { %v401_v20 = vpop.permute.xlu0 %400  ;;  %v403_v32 = vpop.permute.xlu1 %402  ;;  %3970 = vmatprep.subr.msk.mxu0 %vm433_vm1, %v4209_v42  ;;  %3966 = vmatmul.mubr.msk.f32.vlgmr.msra.gmra.mxu0 %vm429_vm2, %v4956_v9 }
  0x9c   :  { %v419_v52 = vsel %vm404_vm0, %v399_v49, %v401_v20  ;;  %v420_v15 = vsel %vm404_vm0, %v401_v20, %v403_v32  ;;  %3971 = vmatpush1.msk.msra.mxu0 %vm433_vm1, %v4212_v43  ;;  %825 = vmatprep.mubr.f32.mxu0 %v5404_v44 }
  0x9d   :  { %3967 = vmatprep.subr.msk.mxu1 %vm433_vm1, %v420_v15  ;;  %791 = vmatprep.subr.mxu0 %v4243_v57 }
  0x9e   :  { %3968 = vmatpush1.msk.msra.mxu1 %vm433_vm1, %v419_v52  ;;  %792 = vmatpush1.msra.mxu0 %v4279_v6 }
  0x9f   :  { %v383_v42 = vpop.permute.xlu0 %382  ;;  %v385_v8 = vpop.permute.xlu1 %384  ;;  %3976 = vmatprep.subr.msk.mxu0 %vm433_vm1, %v4302_v21  ;;  %3972 = vmatmul.mubr.msk.f32.vlgmr.msra.gmra.mxu0 %vm429_vm2, %v4999_v7 }
  0xa0   :  { %v411_v43 = vsel %vm404_vm0, %v381_v53, %v383_v42  ;;  %v412_v56 = vsel %vm404_vm0, %v383_v42, %v385_v8  ;;  %3977 = vmatpush1.msk.msra.mxu0 %vm433_vm1, %v4215_v46  ;;  %967 = vmatprep.mubr.f32.mxu0 %v5404_v44 }
  0xa1   :  { %693 = vmatprep.subr.mxu1 %v412_v56  ;;  %933 = vmatprep.subr.mxu0 %v4392_v54 }
  0xa2   :  { %694 = vmatpush1.msra.mxu1 %v411_v43  ;;  %934 = vmatpush1.msra.mxu0 %v4355_v40 }
  0xa3   :  { %v1393_v57 = vpop.permute.xlu0 %1392  ;;  %v1395_v6 = vpop.permute.xlu1 %1394  ;;  %3973 = vmatprep.subr.msk.mxu1 %vm433_vm1, %v4277_v5  ;;  %3978 = vmatmul.mubr.msk.f32.vlgmr.msra.gmra.mxu0 %vm429_vm2, %v4999_v7 }
  0xa4   :  { %v1418_v21 = vsel %vm1408_vm3, %v1393_v57, %v1395_v6  ;;  %3969 = vmatmul.mubr.msk.f32.vlgmr.msra.gmra.mxu1 %vm429_vm2, %v4956_v9  ;;  %1516 = vmatprep.mubr.f32.mxu0 %v5404_v44 }
  0xa5   :  { %4006 = vmatprep.subr.msk.mxu0 %vm433_vm1, %v1418_v21  ;;  %3974 = vmatpush1.msk.msra.mxu1 %vm433_vm1, %v4229_v50 }
  0xa6   :  { %862 = vmatprep.subr.mxu1 %v4353_v39  ;;  %896 = vmatprep.mubr.f32.mxu1 %v5404_v44 }
  0xa7   :  { %v1391_v46 = vpop.permute.xlu0 %1390  ;;  %v1375_v5 = vpop.permute.xlu1 %1374  ;;  %863 = vmatpush1.msra.mxu1 %v4245_v58 }
  0xa8   :  { %v1417_v40 = vsel %vm1408_vm3, %v1391_v46, %v1393_v57  ;;  %3979 = vmatprep.subr.msk.mxu1 %vm433_vm1, %v4412_v3  ;;  %3975 = vmatmul.mubr.msk.f32.vlgmr.msra.gmra.mxu1 %vm429_vm2, %v4999_v7  ;;  %v5048_v3 = vld [vmem:[%s5390_s1 + $0x10] sm:$0xff] }
  0xa9   :  { %4007 = vmatpush1.msk.msra.mxu0 %vm433_vm1, %v1417_v40  ;;  %3980 = vmatpush1.msk.msra.mxu1 %vm433_vm1, %v4306_v23 }
  0xaa   :  { %1004 = vmatprep.subr.mxu1 %v4425_v14  ;;  %1038 = vmatprep.mubr.f32.mxu1 %v5404_v44 }
  0xab   :  { %v1377_v50 = vpop.permute.xlu0 %1376  ;;  %v1373_v39 = vpop.permute.xlu1 %1372  ;;  %1005 = vmatpush1.msra.mxu1 %v4394_v55 }
  0xac   :  { %v1409_v58 = vsel %vm1408_vm3, %v1373_v39, %v1375_v5  ;;  %v1410_v54 = vsel %vm1408_vm3, %v1375_v5, %v1377_v50  ;;  %3981 = vmatmul.mubr.msk.f32.vlgmr.msra.gmra.mxu1 %vm429_vm2, %v4999_v7 }
  0xad   :  { %1482 = vmatprep.subr.mxu0 %v1410_v54  ;;  %1587 = vmatprep.mubr.f32.mxu1 %v5404_v44 }
  0xae   :  { %1483 = vmatpush1.msra.mxu0 %v1409_v58 }
  0xaf   :  { %v1397_v23 = vpop.permute.xlu0 %1396  ;;  %v1399_v14 = vpop.permute.xlu1 %1398  ;;  %4008 = vmatmul.mubr.msk.f32.vlgmr.msra.gmra.mxu0 %vm429_vm2, %v5048_v3 }
  0xb0   :  { %v1419_v55 = vsel %vm1408_vm3, %v1395_v6, %v1397_v23  ;;  %v1420_v10 = vsel %vm1408_vm3, %v1397_v23, %v1399_v14  ;;  %1658 = vmatprep.mubr.f32.mxu0 %v5404_v44 }
  0xb1   :  { %4009 = vmatprep.subr.msk.mxu1 %vm433_vm1, %v1420_v10 }
  0xb2   :  { %4010 = vmatpush1.msk.msra.mxu1 %vm433_vm1, %v1419_v55 }
  0xb3   :  { %v1401_v16 = vpop.permute.xlu0 %1400  ;;  %v1403_v37 = vpop.permute.xlu1 %1402 }
  0xb4   :  { %v1421_v61 = vsel %vm1408_vm3, %v1399_v14, %v1401_v16  ;;  %v1422_v12 = vsel %vm1408_vm3, %v1401_v16, %v1403_v37 }
  0xb5   :  { %4012 = vmatprep.subr.msk.mxu0 %vm433_vm1, %v1422_v12 }
  0xb6   :  { %4013 = vmatpush1.msk.msra.mxu0 %vm433_vm1, %v1421_v61 }
  0xb7   :  { %v1379_v33 = vpop.permute.xlu0 %1378  ;;  %v1381_v47 = vpop.permute.xlu1 %1380 }
  0xb8   :  { %v1411_v36 = vsel %vm1408_vm3, %v1377_v50, %v1379_v33  ;;  %v1412_v25 = vsel %vm1408_vm3, %v1379_v33, %v1381_v47 }
  0xb9   :  { %1553 = vmatprep.subr.mxu1 %v1412_v25 }
  0xba   :  { %1554 = vmatpush1.msra.mxu1 %v1411_v36 }
  0xbb   :  { %v1383_v49 = vpop.permute.xlu0 %1382  ;;  %v1385_v45 = vpop.permute.xlu1 %1384  ;;  %4011 = vmatmul.mubr.msk.f32.vlgmr.msra.gmra.mxu1 %vm429_vm2, %v5048_v3 }
  0xbc   :  { %v1413_v0 = vsel %vm1408_vm3, %v1381_v47, %v1383_v49  ;;  %v1414_v31 = vsel %vm1408_vm3, %v1383_v49, %v1385_v45  ;;  %1729 = vmatprep.mubr.f32.mxu1 %v5404_v44 }
  0xbd   :  { %1624 = vmatprep.subr.mxu0 %v1414_v31 }
  0xbe   :  { %1625 = vmatpush1.msra.mxu0 %v1413_v0 }
  0xbf   :  { %v1405_v59 = vpop.permute.xlu0 %1404  ;;  %v1407_v34 = vpop.permute.xlu1 %1406  ;;  %4014 = vmatmul.mubr.msk.f32.vlgmr.msra.gmra.mxu0 %vm429_vm2, %v5048_v3 }
  0xc0   :  { %v1423_v17 = vsel %vm1408_vm3, %v1403_v37, %v1405_v59  ;;  %v1424_v60 = vsel %vm1408_vm3, %v1405_v59, %v1407_v34  ;;  %2233 = vmatprep.mubr.f32.mxu0 %v5404_v44 }
  0xc1   :  { %4015 = vmatprep.subr.msk.mxu1 %vm433_vm1, %v1424_v60 }
  0xc2   :  { %4016 = vmatpush1.msk.msra.mxu1 %vm433_vm1, %v1423_v17 }
  0xc3   :  { %v2114_v18 = vpop.permute.xlu0 %2113  ;;  %v2116_v19 = vpop.permute.xlu1 %2115 }
  0xc4   :  { %v2138_v1 = vsel %vm404_vm0, %v2114_v18, %v2116_v19 }
  0xc5   :  { %4042 = vmatprep.subr.msk.mxu0 %vm433_vm1, %v2138_v1 }
  0xc7   :  { %v2112_v24 = vpop.permute.xlu0 %2111  ;;  %v1387_v38 = vpop.permute.xlu1 %1386 }
  0xc8   :  { %v2137_v4 = vsel %vm404_vm0, %v2112_v24, %v2114_v18  ;;  %v1415_v20 = vsel %vm1408_vm3, %v1385_v45, %v1387_v38 }
  0xc9   :  { %4043 = vmatpush1.msk.msra.mxu0 %vm433_vm1, %v2137_v4 }
  0xcb   :  { %v1389_v53 = vpop.permute.xlu0 %1388  ;;  %v2096_v62 = vpop.permute.xlu1 %2095 }
  0xcc   :  { %v1416_v30 = vsel %vm1408_vm3, %v1387_v38, %v1389_v53 }
  0xcd   :  { %1695 = vmatprep.subr.mxu1 %v1416_v30 }
  0xce   :  { %1696 = vmatpush1.msra.mxu1 %v1415_v20 }
  0xcf   :  { %v2098_v32 = vpop.permute.xlu0 %2097  ;;  %v2094_v52 = vpop.permute.xlu1 %2093  ;;  %4017 = vmatmul.mubr.msk.f32.vlgmr.msra.gmra.mxu1 %vm429_vm2, %v5048_v3 }
  0xd0   :  { %v2129_v15 = vsel %vm404_vm0, %v2094_v52, %v2096_v62  ;;  %v2130_v42 = vsel %vm404_vm0, %v2096_v62, %v2098_v32  ;;  %2304 = vmatprep.mubr.f32.mxu1 %v5404_v44 }
  0xd1   :  { %2199 = vmatprep.subr.mxu0 %v2130_v42 }
  0xd2   :  { %2200 = vmatpush1.msra.mxu0 %v2129_v15 }
  0xd3   :  { %v2118_v8 = vpop.permute.xlu0 %2117  ;;  %v2120_v43 = vpop.permute.xlu1 %2119  ;;  %4044 = vmatmul.mubr.msk.f32.vlgmr.msra.gmra.mxu0 %vm429_vm2, %v4956_v9 }
  0xd4   :  { %v2139_v56 = vsel %vm404_vm0, %v2116_v19, %v2118_v8  ;;  %v2140_v57 = vsel %vm404_vm0, %v2118_v8, %v2120_v43  ;;  %2375 = vmatprep.mubr.f32.mxu0 %v5404_v44 }
  0xd5   :  { %4045 = vmatprep.subr.msk.mxu1 %vm433_vm1, %v2140_v57 }
  0xd6   :  { %4046 = vmatpush1.msk.msra.mxu1 %vm433_vm1, %v2139_v56 }
  0xd7   :  { %v2122_v6 = vpop.permute.xlu0 %2121  ;;  %v2124_v21 = vpop.permute.xlu1 %2123 }
  0xd8   :  { %v2141_v46 = vsel %vm404_vm0, %v2120_v43, %v2122_v6  ;;  %v2142_v5 = vsel %vm404_vm0, %v2122_v6, %v2124_v21 }
  0xd9   :  { %4048 = vmatprep.subr.msk.mxu0 %vm433_vm1, %v2142_v5 }
  0xda   :  { %4049 = vmatpush1.msk.msra.mxu0 %vm433_vm1, %v2141_v46 }
  0xdb   :  { %v2100_v40 = vpop.permute.xlu0 %2099  ;;  %v2102_v50 = vpop.permute.xlu1 %2101 }
  0xdc   :  { %v2131_v39 = vsel %vm404_vm0, %v2098_v32, %v2100_v40  ;;  %v2132_v58 = vsel %vm404_vm0, %v2100_v40, %v2102_v50 }
  0xdd   :  { %2270 = vmatprep.subr.mxu1 %v2132_v58 }
  0xde   :  { %2271 = vmatpush1.msra.mxu1 %v2131_v39 }
  0xdf   :  { %v2104_v54 = vpop.permute.xlu0 %2103  ;;  %v2106_v23 = vpop.permute.xlu1 %2105  ;;  %4047 = vmatmul.mubr.msk.f32.vlgmr.msra.gmra.mxu1 %vm429_vm2, %v4956_v9 }
  0xe0   :  { %v2133_v14 = vsel %vm404_vm0, %v2102_v50, %v2104_v54  ;;  %v2134_v55 = vsel %vm404_vm0, %v2104_v54, %v2106_v23  ;;  %2446 = vmatprep.mubr.f32.mxu1 %v5404_v44 }
  0xe1   :  { %2341 = vmatprep.subr.mxu0 %v2134_v55 }
  0xe2   :  { %2342 = vmatpush1.msra.mxu0 %v2133_v14 }
  0xe3   :  { %v2126_v10 = vpop.permute.xlu0 %2125  ;;  %v2128_v16 = vpop.permute.xlu1 %2127  ;;  %4054 = vmatprep.subr.msk.mxu0 %vm433_vm1, %v4621_v28  ;;  %4050 = vmatmul.mubr.msk.f32.vlgmr.msra.gmra.mxu0 %vm429_vm2, %v4956_v9 }
  0xe4   :  { %v2143_v37 = vsel %vm404_vm0, %v2124_v21, %v2126_v10  ;;  %v2144_v61 = vsel %vm404_vm0, %v2126_v10, %v2128_v16  ;;  %4055 = vmatpush1.msk.msra.mxu0 %vm433_vm1, %v4612_v27  ;;  %2541 = vmatprep.mubr.f32.mxu0 %v5404_v44 }
  0xe5   :  { %4051 = vmatprep.subr.msk.mxu1 %vm433_vm1, %v2144_v61  ;;  %2507 = vmatprep.subr.mxu0 %v4660_v48 }
  0xe6   :  { %4052 = vmatpush1.msk.msra.mxu1 %vm433_vm1, %v2143_v37  ;;  %2508 = vmatpush1.msra.mxu0 %v4668_v13 }
  0xe7   :  { %v2108_v28 = vpop.permute.xlu0 %2107  ;;  %v2110_v12 = vpop.permute.xlu1 %2109  ;;  %4060 = vmatprep.subr.msk.mxu0 %vm433_vm1, %v4725_v63  ;;  %4056 = vmatmul.mubr.msk.f32.vlgmr.msra.gmra.mxu0 %vm429_vm2, %v4999_v7 }
  0xe8   :  { %v2135_v27 = vsel %vm404_vm0, %v2106_v23, %v2108_v28  ;;  %v2136_v33 = vsel %vm404_vm0, %v2108_v28, %v2110_v12  ;;  %4061 = vmatpush1.msk.msra.mxu0 %vm433_vm1, %v4716_v41  ;;  %2683 = vmatprep.mubr.f32.mxu0 %v5404_v44 }
  0xe9   :  { %2412 = vmatprep.subr.mxu1 %v2136_v33  ;;  %2649 = vmatprep.subr.mxu0 %v4811_v51  ;;  %v5405_v51 = vld [vmem:[#allocation4_spill] sm:$0xff] }
  0xea   :  { %2413 = vmatpush1.msra.mxu1 %v2135_v27  ;;  %2650 = vmatpush1.msra.mxu0 %v4793_v2 }
  0xeb   :  { %v3107_v48 = vpop.permute.xlu0 %3106  ;;  %v3109_v13 = vpop.permute.xlu1 %3108  ;;  %4057 = vmatprep.subr.msk.mxu1 %vm433_vm1, %v4703_v26  ;;  %4062 = vmatmul.mubr.msk.f32.vlgmr.msra.gmra.mxu0 %vm429_vm2, %v4999_v7 }
  0xec   :  { %v3131_v63 = vsel %vm1408_vm3, %v3107_v48, %v3109_v13  ;;  %4053 = vmatmul.mubr.msk.f32.vlgmr.msra.gmra.mxu1 %vm429_vm2, %v4956_v9  ;;  %3226 = vmatprep.mubr.f32.mxu0 %v5404_v44  ;;  %v5406_v9 = vld [vmem:[#allocation2_spill] sm:$0xff] }
  0xed   :  { %4090 = vmatprep.subr.msk.mxu0 %vm433_vm1, %v3131_v63  ;;  %4058 = vmatpush1.msk.msra.mxu1 %vm433_vm1, %v4627_v29  ;;  %v5407_v29 = vld [vmem:[#allocation5_spill] sm:$0xff] }
  0xee   :  { %2578 = vmatprep.subr.mxu1 %v4770_v35  ;;  %2612 = vmatprep.mubr.f32.mxu1 %v5404_v44 }
  0xef   :  { %v3105_v26 = vpop.permute.xlu0 %3104  ;;  %v3089_v41 = vpop.permute.xlu1 %3088  ;;  %2579 = vmatpush1.msra.mxu1 %v4666_v11  ;;  %v5408_v11 = vld [vmem:[#allocation3_spill] sm:$0xff] }
  0xf0   :  { %v3130_v2 = vsel %vm1408_vm3, %v3105_v26, %v3107_v48  ;;  %4063 = vmatprep.subr.msk.mxu1 %vm433_vm1, %v5405_v51  ;;  %4059 = vmatmul.mubr.msk.f32.vlgmr.msra.gmra.mxu1 %vm429_vm2, %v4999_v7 }
  0xf1   :  { %4091 = vmatpush1.msk.msra.mxu0 %vm433_vm1, %v3130_v2  ;;  %4064 = vmatpush1.msk.msra.mxu1 %vm433_vm1, %v5406_v9 }
  0xf2   :  { %2720 = vmatprep.subr.mxu1 %v5407_v29  ;;  %2754 = vmatprep.mubr.f32.mxu1 %v5404_v44 }
  0xf3   :  { %v3091_v35 = vpop.permute.xlu0 %3090  ;;  %v3087_v47 = vpop.permute.xlu1 %3086  ;;  %2721 = vmatpush1.msra.mxu1 %v5408_v11 }
  0xf4   :  { %v3122_v36 = vsel %vm1408_vm3, %v3087_v47, %v3089_v41  ;;  %v3123_v25 = vsel %vm1408_vm3, %v3089_v41, %v3091_v35  ;;  %4065 = vmatmul.mubr.msk.f32.vlgmr.msra.gmra.mxu1 %vm429_vm2, %v4999_v7 }
  0xf5   :  { %3192 = vmatprep.subr.mxu0 %v3123_v25  ;;  %3297 = vmatprep.mubr.f32.mxu1 %v5404_v44 }
  0xf6   :  { %3193 = vmatpush1.msra.mxu0 %v3122_v36 }
  0xf7   :  { %v3111_v49 = vpop.permute.xlu0 %3110  ;;  %4092 = vmatmul.mubr.msk.f32.vlgmr.msra.gmra.mxu0 %vm429_vm2, %v5048_v3 }
  0xf8   :  { %v3132_v45 = vsel %vm1408_vm3, %v3109_v13, %v3111_v49  ;;  %v3113_v0 = vpop.permute.xlu1 %3112  ;;  %3368 = vmatprep.mubr.f32.mxu0 %v5404_v44 }
  0xf9   :  { %v3133_v31 = vsel %vm1408_vm3, %v3111_v49, %v3113_v0 }
  0xfa   :  { %4093 = vmatprep.subr.msk.mxu1 %vm433_vm1, %v3133_v31 }
  0xfb   :  { %4094 = vmatpush1.msk.msra.mxu1 %vm433_vm1, %v3132_v45  ;;  %v3093_v7 = vpop.permute.xlu0 %3092 }
  0xfc   :  { %v3124_v59 = vsel %vm1408_vm3, %v3091_v35, %v3093_v7  ;;  %v3095_v34 = vpop.permute.xlu1 %3094 }
  0xfd   :  { %v3125_v17 = vsel %vm1408_vm3, %v3093_v7, %v3095_v34 }
  0xfe   :  { %3263 = vmatprep.subr.mxu1 %v3125_v17 }
  0xff   :  { %3264 = vmatpush1.msra.mxu1 %v3124_v59  ;;  %v3115_v60 = vpop.permute.xlu0 %3114 }
 0x100   :  { %v3134_v18 = vsel %vm1408_vm3, %v3113_v0, %v3115_v60  ;;  %4095 = vmatmul.mubr.msk.f32.vlgmr.msra.gmra.mxu1 %vm429_vm2, %v5048_v3  ;;  %v3117_v19 = vpop.permute.xlu1 %3116 }
 0x101   :  { %v3135_v1 = vsel %vm1408_vm3, %v3115_v60, %v3117_v19  ;;  %3439 = vmatprep.mubr.f32.mxu1 %v5404_v44 }
 0x102   :  { %4096 = vmatprep.subr.msk.mxu0 %vm433_vm1, %v3135_v1 }
 0x103   :  { %4097 = vmatpush1.msk.msra.mxu0 %vm433_vm1, %v3134_v18  ;;  %v3097_v24 = vpop.permute.xlu0 %3096 }
 0x104   :  { %v3126_v38 = vsel %vm1408_vm3, %v3095_v34, %v3097_v24  ;;  %v3099_v4 = vpop.permute.xlu1 %3098 }
 0x105   :  { %v3127_v53 = vsel %vm1408_vm3, %v3097_v24, %v3099_v4 }
 0x106   :  { %3334 = vmatprep.subr.mxu0 %v3127_v53 }
 0x107   :  { %3335 = vmatpush1.msra.mxu0 %v3126_v38  ;;  %v3119_v62 = vpop.permute.xlu0 %3118 }
 0x108   :  { %v3136_v30 = vsel %vm1408_vm3, %v3117_v19, %v3119_v62  ;;  %4098 = vmatmul.mubr.msk.f32.vlgmr.msra.gmra.mxu0 %vm429_vm2, %v5048_v3  ;;  %v3121_v20 = vpop.permute.xlu1 %3120 }
 0x109   :  { %v3137_v44 = vsel %vm1408_vm3, %v3119_v62, %v3121_v20 }
 0x10a   :  { %4099 = vmatprep.subr.msk.mxu1 %vm433_vm1, %v3137_v44 }
 0x10b   :  { %4100 = vmatpush1.msk.msra.mxu1 %vm433_vm1, %v3136_v30  ;;  %v3101_v32 = vpop.permute.xlu0 %3100 }
 0x10c   :  { %v3128_v52 = vsel %vm1408_vm3, %v3099_v4, %v3101_v32  ;;  %v3103_v15 = vpop.permute.xlu1 %3102 }
 0x10d   :  { %v3129_v42 = vsel %vm1408_vm3, %v3101_v32, %v3103_v15 }
 0x10e   :  { %3405 = vmatprep.subr.mxu1 %v3129_v42 }
 0x10f   :  { %3406 = vmatpush1.msra.mxu1 %v3128_v52 }
 0x110   :  { %4101 = vmatmul.mubr.msk.f32.vlgmr.msra.gmra.mxu1 %vm429_vm2, %v5048_v3 }
 0x14f   :  { %v516_v8 = vpop.f32.mrf.mxu0 }
 0x151   :  { %v518_v43 = vpop.f32.mrf.mxu0 }
 0x157   :  { %v587_v57 = vpop.f32.mrf.mxu1 }
 0x159   :  { %v589_v21 = vpop.f32.mrf.mxu1 }
 0x15b   :  { %v658_v56 = vpop.f32.mrf.mxu0 }
 0x15d   :  { %v660_v6 = vpop.f32.mrf.mxu0 }
 0x15f   :  { %v827_v46 = vpop.f32.mrf.mxu0 }
 0x160   :  { %v828_v10 = vadd.f32 %v827_v46, %v516_v8 }
 0x161   :  { %v829_v50 = vpop.f32.mrf.mxu0 }
 0x162   :  { %v830_v16 = vadd.f32 %v829_v50, %v518_v43 }
 0x163   :  { %v969_v58 = vpop.f32.mrf.mxu0 }
 0x164   :  { %v729_v5 = vpop.f32.mrf.mxu1  ;;  %v970_v9 = vadd.f32 %v969_v58, %v658_v56 }
 0x165   :  { %v971_v23 = vpop.f32.mrf.mxu0 }
 0x166   :  { %v731_v40 = vpop.f32.mrf.mxu1  ;;  %v972_v25 = vadd.f32 %v971_v23, %v660_v6 }
 0x168   :  { %v898_v39 = vpop.f32.mrf.mxu1 }
 0x169   :  { %v899_v61 = vadd.f32 %v898_v39, %v587_v57 }
 0x16a   :  { %v900_v54 = vpop.f32.mrf.mxu1 }
 0x16b   :  { %v901_v13 = vadd.f32 %v900_v54, %v589_v21 }
 0x16c   :  { %v1040_v14 = vpop.f32.mrf.mxu1 }
 0x16d   :  { %v1041_v17 = vadd.f32 %v1040_v14, %v729_v5 }
 0x16e   :  { %v1042_v37 = vpop.f32.mrf.mxu1 }
 0x16f   :  { %v1518_v55 = vpop.f32.mrf.mxu0  ;;  %v1043_v19 = vadd.f32 %v1042_v37, %v731_v40 }
 0x170   :  { %v5187_v28 = vadd.f32 %v1518_v55, %v828_v10 }
 0x171   :  { %v1520_v3 = vpop.f32.mrf.mxu0 }
 0x172   :  { %v5189_v12 = vadd.f32 %v1520_v3, %v830_v16  ;;  %v3464_v33 = vmul.f32 %v5187_v28, %v5187_v28 }
 0x174   :  { %v3465_v48 = vmul.f32 %v5189_v12, %v5189_v12  ;;  %v3454_v63 = vadd.f32 %v5189_v12, %v5187_v28 }
 0x176   :  { %v3472_v2 = vadd.f32 %v3465_v48, %v3464_v33 }
 0x17b   :  { %v1589_v27 = vpop.f32.mrf.mxu1 }
 0x17c   :  { %v5197_v26 = vadd.f32 %v1589_v27, %v899_v61 }
 0x17d   :  { %v1591_v41 = vpop.f32.mrf.mxu1 }
 0x17e   :  { %v3466_v51 = vmul.f32 %v5197_v26, %v5197_v26  ;;  %v3455_v29 = vadd.f32 %v3454_v63, %v5197_v26  ;;  %v5202_v35 = vadd.f32 %v1591_v41, %v901_v13 }
 0x17f   :  { %v1660_v47 = vpop.f32.mrf.mxu0 }
 0x180   :  { %v3473_v11 = vadd.f32 %v3472_v2, %v3466_v51  ;;  %v3467_v36 = vmul.f32 %v5202_v35, %v5202_v35  ;;  %v3456_v49 = vadd.f32 %v3455_v29, %v5202_v35  ;;  %v5207_v45 = vadd.f32 %v1660_v47, %v970_v9 }
 0x181   :  { %v1662_v0 = vpop.f32.mrf.mxu0 }
 0x182   :  { %v3474_v31 = vadd.f32 %v3473_v11, %v3467_v36  ;;  %v3468_v7 = vmul.f32 %v5207_v45, %v5207_v45  ;;  %v3457_v59 = vadd.f32 %v3456_v49, %v5207_v45  ;;  %v5212_v34 = vadd.f32 %v1662_v0, %v972_v25 }
 0x184   :  { %v3475_v60 = vadd.f32 %v3474_v31, %v3468_v7  ;;  %v3469_v18 = vmul.f32 %v5212_v34, %v5212_v34  ;;  %v3458_v1 = vadd.f32 %v3457_v59, %v5212_v34 }
 0x186   :  { %v3476_v4 = vadd.f32 %v3475_v60, %v3469_v18 }
 0x18f   :  { %v1731_v24 = vpop.f32.mrf.mxu1 }
 0x190   :  { %v5217_v38 = vadd.f32 %v1731_v24, %v1041_v17 }
 0x191   :  { %v1733_v53 = vpop.f32.mrf.mxu1 }
 0x192   :  { %v3470_v62 = vmul.f32 %v5217_v38, %v5217_v38  ;;  %v5221_v30 = vadd.f32 %v1733_v53, %v1043_v19  ;;  %v3459_v20 = vadd.f32 %v3458_v1, %v5217_v38 }
 0x193   :  { %v2235_v42 = vpop.f32.mrf.mxu0 }
 0x194   :  { %v3460_v44 = vadd.f32 %v3459_v20, %v5221_v30  ;;  %v3471_v32 = vmul.f32 %v5221_v30, %v5221_v30  ;;  %v3477_v52 = vadd.f32 %v3476_v4, %v3470_v62 }
 0x195   :  { %v2237_v8 = vpop.f32.mrf.mxu0 }
 0x196   :  { %3461 = vadd.xlane.f32.xlu0 %v3460_v44  ;;  %v3478_v15 = vadd.f32 %v3477_v52, %v3471_v32 }
 0x19a   :  { %3479 = vadd.xlane.f32.xlu0 %v3478_v15 }
 0x19f   :  { %v2306_v56 = vpop.f32.mrf.mxu1 }
 0x1a1   :  { %v2308_v21 = vpop.f32.mrf.mxu1 }
 0x1a3   :  { %v2377_v43 = vpop.f32.mrf.mxu0 }
 0x1a5   :  { %v2379_v57 = vpop.f32.mrf.mxu0 }
 0x1a7   :  { %v2543_v6 = vpop.f32.mrf.mxu0 }
 0x1a8   :  { %v2544_v37 = vadd.f32 %v2543_v6, %v2235_v42 }
 0x1a9   :  { %v2545_v46 = vpop.f32.mrf.mxu0 }
 0x1aa   :  { %v2546_v10 = vadd.f32 %v2545_v46, %v2237_v8  ;;  %v4130_v46 = vmov 0  }
 0x1ab   :  { %v2685_v50 = vpop.f32.mrf.mxu0  ;;  %4122 = vset.pattern.permute.xlu1 %v4130_v46  ;;  %4123 = vset.pattern.permute.xlu0 %v4130_v46 }
 0x1ac   :  { %v2448_v5 = vpop.f32.mrf.mxu1  ;;  %v2686_v47 = vadd.f32 %v2685_v50, %v2377_v43 }
 0x1ad   :  { %v2687_v58 = vpop.f32.mrf.mxu0 }
 0x1ae   :  { %v2450_v40 = vpop.f32.mrf.mxu1  ;;  %v2688_v49 = vadd.f32 %v2687_v58, %v2379_v57 }
 0x1b0   :  { %v2614_v39 = vpop.f32.mrf.mxu1 }
 0x1b1   :  { %v2615_v3 = vadd.f32 %v2614_v39, %v2306_v56 }
 0x1b2   :  { %v2616_v54 = vpop.f32.mrf.mxu1 }
 0x1b3   :  { %v2617_v63 = vadd.f32 %v2616_v54, %v2308_v21 }
 0x1b4   :  { %v2756_v14 = vpop.f32.mrf.mxu1 }
 0x1b5   :  { %v2757_v24 = vadd.f32 %v2756_v14, %v2448_v5 }
 0x1b6   :  { %v2758_v16 = vpop.f32.mrf.mxu1 }
 0x1b7   :  { %v3228_v23 = vpop.f32.mrf.mxu0  ;;  %v2759_v20 = vadd.f32 %v2758_v16, %v2450_v40 }
 0x1b8   :  { %v5229_v33 = vadd.f32 %v3228_v23, %v2544_v37  ;;  %v3514_v37 = vld [vmem:[%s5391_s2] sm:$0xff] }
 0x1b9   :  { %v3230_v55 = vpop.f32.mrf.mxu0 }
 0x1ba   :  { %v5227_v61 = vadd.f32 %v3230_v55, %v2546_v10  ;;  %v3492_v2 = vmul.f32 %v5229_v33, %v5229_v33 }
 0x1bc   :  { %v3493_v41 = vmul.f32 %v5227_v61, %v5227_v61  ;;  %v3482_v51 = vadd.f32 %v5227_v61, %v5229_v33 }
 0x1be   :  { %v3500_v11 = vadd.f32 %v3493_v41, %v3492_v2 }
 0x1c0   :  { %v3299_v27 = vpop.f32.mrf.mxu1 }
 0x1c1   :  { %v5231_v48 = vadd.f32 %v3299_v27, %v2615_v3 }
 0x1c2   :  { %v3301_v13 = vpop.f32.mrf.mxu1 }
 0x1c3   :  { %v3494_v9 = vmul.f32 %v5231_v48, %v5231_v48  ;;  %v5241_v29 = vadd.f32 %v3301_v13, %v2617_v63  ;;  %v3483_v36 = vadd.f32 %v3482_v51, %v5231_v48  ;;  %v3518_v13 = vld [vmem:[%s5392_s3] sm:$0xff] }
 0x1c5   :  { %v3501_v0 = vadd.f32 %v3500_v11, %v3494_v9  ;;  %v3495_v31 = vmul.f32 %v5241_v29, %v5241_v29  ;;  %v3484_v17 = vadd.f32 %v3483_v36, %v5241_v29 }
 0x1c7   :  { %v3502_v19 = vadd.f32 %v3501_v0, %v3495_v31 }
 0x1c8   :  { %v3370_v25 = vpop.f32.mrf.mxu0 }
 0x1c9   :  { %v5246_v7 = vadd.f32 %v3370_v25, %v2686_v47 }
 0x1ca   :  { %v3372_v59 = vpop.f32.mrf.mxu0 }
 0x1cb   :  { %v3496_v60 = vmul.f32 %v5246_v7, %v5246_v7  ;;  %v3451_v18 = vadd.f32 %v3372_v59, %v2688_v49  ;;  %v3485_v1 = vadd.f32 %v3484_v17, %v5246_v7 }
 0x1cd   :  { %v3503_v4 = vadd.f32 %v3502_v19, %v3496_v60  ;;  %v3497_v53 = vmul.f32 %v3451_v18, %v3451_v18  ;;  %v3486_v44 = vadd.f32 %v3485_v1, %v3451_v18 }
 0x1cf   :  { %v3504_v43 = vadd.f32 %v3503_v4, %v3497_v53 }
 0x1d0   :  { %v3441_v62 = vpop.f32.mrf.mxu1 }
 0x1d1   :  { %v3452_v32 = vadd.f32 %v3441_v62, %v2757_v24 }
 0x1d2   :  { %v3443_v52 = vpop.f32.mrf.mxu1 }
 0x1d3   :  { %v3498_v15 = vmul.f32 %v3452_v32, %v3452_v32  ;;  %v3453_v42 = vadd.f32 %v3443_v52, %v2759_v20  ;;  %v3487_v8 = vadd.f32 %v3486_v44, %v3452_v32 }
 0x1d5   :  { %v3488_v56 = vadd.f32 %v3487_v8, %v3453_v42  ;;  %v3499_v57 = vmul.f32 %v3453_v42, %v3453_v42  ;;  %v3505_v6 = vadd.f32 %v3504_v43, %v3498_v15 }
 0x1d7   :  { %3489 = vadd.xlane.f32.xlu1 %v3488_v56  ;;  %v3506_v21 = vadd.f32 %v3505_v6, %v3499_v57 }
 0x1d9   :  { %3507 = vadd.xlane.f32.xlu0 %v3506_v21 }
 0x21f   :  { %v3462_v5 = vpop.xlane.xlu0 %3461 }
 0x223   :  { %v3480_v50 = vpop.xlane.xlu0 %3479 }
 0x260   :  { %v3490_v39 = vpop.xlane.xlu1 %3489 }
 0x261   :  { %v3491_v40 = vadd.f32 %v3490_v39, %v3462_v5 }
 0x262   :  { %v3508_v58 = vpop.xlane.xlu0 %3507 }
 0x263   :  { %v3510_v54 = vmul.f32 0.00048828125, %v3491_v40  ;;  %v3509_v23 = vadd.f32 %v3508_v58, %v3480_v50 }
 0x265   :  { %v3512_v14 = vmul.f32 %v3510_v54, %v3510_v54  ;;  %v3511_v55 = vmul.f32 0.00048828125, %v3509_v23 }
 0x267   :  { %v3513_v10 = vsub.f32 %v3511_v55, %v3512_v14 }
 0x269   :  { %v3515_v16 = vadd.f32 1e-05, %v3513_v10 }
 0x26b   :  { %4124 = vrsqrt.f32 %v3515_v16 }
 0x278   :  { %v4125_v3 = vpop.eup %4124 }
 0x279   :  { %v3517_v27 = vmul.f32 %v4125_v3, %v3514_v37 }
 0x27b   :  { %3523 = vperm.xlu1 %4122, %v3517_v27   ;;  %v3519_v63 = vmul.f32 %v3517_v27, %v3510_v54 }
 0x27d   :  { %v3520_v41 = vsub.f32 %v3518_v13, %v3519_v63 }
 0x27f   :  { %3536 = vperm.xlu0 %4123, %v3520_v41  }
 0x2f6   :  { %v3524_v2 = vpop.permute.xlu1 %3523 }
 0x2f7   :  { %v3526_v51 = vmul.f32 %v3524_v2, %v5187_v28  ;;  %v3527_v9 = vmul.f32 %v3524_v2, %v5189_v12  ;;  %v3528_v47 = vmul.f32 %v3524_v2, %v5197_v26  ;;  %v3529_v11 = vmul.f32 %v3524_v2, %v5202_v35 }
 0x2f8   :  { %v3530_v36 = vmul.f32 %v3524_v2, %v5207_v45  ;;  %v3531_v25 = vmul.f32 %v3524_v2, %v5212_v34  ;;  %v3532_v49 = vmul.f32 %v3524_v2, %v5217_v38  ;;  %v3533_v0 = vmul.f32 %v3524_v2, %v5221_v30 }
 0x2f9   :  { %v3730_v31 = vmul.f32 %v3524_v2, %v5229_v33  ;;  %v3731_v59 = vmul.f32 %v3524_v2, %v5227_v61  ;;  %v3732_v28 = vmul.f32 %v3524_v2, %v5231_v48  ;;  %v3733_v12 = vmul.f32 %v3524_v2, %v5241_v29 }
 0x2fa   :  { %v5271_v26 = vmul.f32 %v3524_v2, %v5246_v7  ;;  %v5273_v35 = vmul.f32 %v3524_v2, %v3451_v18  ;;  %v5275_v45 = vmul.f32 %v3524_v2, %v3452_v32  ;;  %v5277_v34 = vmul.f32 %v3524_v2, %v3453_v42  ;;  %v5279_v38 = vpop.permute.xlu0 %3536 }
 0x2fb   :  { %v3539_v30 = vadd.f32 %v5279_v38, %v3526_v51  ;;  %v3540_v33 = vadd.f32 %v5279_v38, %v3527_v9  ;;  %v3541_v61 = vadd.f32 %v5279_v38, %v3528_v47  ;;  %v3542_v48 = vadd.f32 %v5279_v38, %v3529_v11 }
 0x2fc   :  { %v3543_v29 = vadd.f32 %v5279_v38, %v3530_v36  ;;  %v3544_v7 = vadd.f32 %v5279_v38, %v3531_v25  ;;  %v3545_v17 = vadd.f32 %v5279_v38, %v3532_v49  ;;  %v3546_v60 = vadd.f32 %v5279_v38, %v3533_v0 }
 0x2fd   :  { %v3547_v18 = vmul.f32 0.2, %v3539_v30  ;;  %v3548_v19 = vmul.f32 0.2, %v3540_v33  ;;  %v3549_v1 = vmul.f32 0.2, %v3541_v61  ;;  %v5290_v24 = vadd.f32 %v3730_v31, %v5279_v38 }
 0x2fe   :  { %v3550_v4 = vmul.f32 0.2, %v3542_v48  ;;  %v3551_v53 = vmul.f32 0.2, %v3543_v29  ;;  %v3552_v62 = vmul.f32 0.2, %v3544_v7  ;;  %v5293_v20 = vadd.f32 %v3731_v59, %v5279_v38 }
 0x2ff   :  { %v3553_v44 = vmul.f32 0.2, %v3545_v17  ;;  %v3554_v32 = vmul.f32 0.2, %v3546_v60  ;;  %v3555_v52 = vmax.f32 %v3539_v30, %v3547_v18  ;;  %v3556_v15 = vmax.f32 %v3540_v33, %v3548_v19 }
 0x300   :  { %v3557_v42 = vmax.f32 %v3541_v61, %v3549_v1  ;;  %v3558_v8 = vmax.f32 %v3542_v48, %v3550_v4  ;;  %v3559_v43 = vmax.f32 %v3543_v29, %v3551_v53  ;;  %v3560_v56 = vmax.f32 %v3544_v7, %v3552_v62 }
 0x301   :  { %v3561_v57 = vmax.f32 %v3545_v17, %v3553_v44  ;;  %v3562_v6 = vmax.f32 %v3546_v60, %v3554_v32  ;;  %v3571_v21 = vcombine.low %v3555_v52, %v3556_v15  ;;  %v3572_v46 = vcombine.high %v3555_v52, %v3556_v15 }
 0x302   :  { %v3573_v5 = vcombine.low %v3557_v42, %v3558_v8  ;;  %v3574_v50 = vcombine.high %v3557_v42, %v3558_v8  ;;  %v3575_v39 = vcombine.low %v3559_v43, %v3560_v56  ;;  %v3576_v40 = vcombine.high %v3559_v43, %v3560_v56 }
 0x303   :  { %v3577_v58 = vcombine.low %v3561_v57, %v3562_v6  ;;  %v3578_v54 = vcombine.high %v3561_v57, %v3562_v6  ;;  %v3585_v23 = vrot.slane %v3571_v21, %v4189_v22  ;;  %v3592_v14 = vrot.slane %v3572_v46, %v4189_v22 }
 0x304   :  { %v3599_v55 = vrot.slane %v3573_v5, %v4189_v22  ;;  %v3606_v10 = vrot.slane %v3574_v50, %v4189_v22  ;;  %v3613_v16 = vrot.slane %v3575_v39, %v4189_v22  ;;  %v3620_v37 = vrot.slane %v3576_v40, %v4189_v22 }
 0x305   :  { %v3627_v3 = vrot.slane %v3577_v58, %v4189_v22  ;;  %v3634_v27 = vrot.slane %v3578_v54, %v4189_v22  ;;  %v3740_v13 = vadd.f32 %v3732_v28, %v5279_v38  ;;  %v3741_v63 = vadd.f32 %v3733_v12, %v5279_v38 }
 0x306   :  { %v3635_v41 = vcombine.low %v3585_v23, %v3599_v55  ;;  %v3636_v2 = vcombine.high %v3585_v23, %v3599_v55  ;;  %v3637_v51 = vcombine.low %v3592_v14, %v3606_v10  ;;  %v3638_v9 = vcombine.high %v3592_v14, %v3606_v10 }
 0x307   :  { %v3639_v47 = vcombine.low %v3613_v16, %v3627_v3  ;;  %v3640_v11 = vcombine.high %v3613_v16, %v3627_v3  ;;  %v3641_v36 = vcombine.low %v3620_v37, %v3634_v27  ;;  %v3642_v25 = vcombine.high %v3620_v37, %v3634_v27 }
 0x308   :  { %v3649_v49 = vrot.slane %v3635_v41, %v4189_v22  ;;  %v3656_v0 = vrot.slane %v3637_v51, %v4189_v22  ;;  %v3663_v31 = vrot.slane %v3636_v2, %v4189_v22  ;;  %v3670_v59 = vrot.slane %v3638_v9, %v4189_v22 }
 0x309   :  { %v3677_v28 = vrot.slane %v3639_v47, %v4189_v22  ;;  %v3684_v12 = vrot.slane %v3641_v36, %v4189_v22  ;;  %v3691_v30 = vrot.slane %v3640_v11, %v4189_v22  ;;  %v3698_v33 = vrot.slane %v3642_v25, %v4189_v22 }
 0x30a   :  { %v3742_v61 = vadd.f32 %v5271_v26, %v5279_v38  ;;  %v3743_v48 = vadd.f32 %v5273_v35, %v5279_v38  ;;  %v3744_v29 = vadd.f32 %v5275_v45, %v5279_v38  ;;  %v3745_v7 = vadd.f32 %v5277_v34, %v5279_v38 }
 0x30b   :  { %v3699_v17 = vcombine.low %v3649_v49, %v3677_v28  ;;  %v3700_v60 = vcombine.high %v3649_v49, %v3677_v28  ;;  %v3701_v18 = vcombine.low %v3656_v0, %v3684_v12  ;;  %v3702_v19 = vcombine.high %v3656_v0, %v3684_v12 }
 0x30c   :  { %v3703_v1 = vcombine.low %v3663_v31, %v3691_v30  ;;  %v3704_v4 = vcombine.high %v3663_v31, %v3691_v30  ;;  %v3705_v53 = vcombine.low %v3670_v59, %v3698_v33  ;;  %v3706_v62 = vcombine.high %v3670_v59, %v3698_v33 }
 0x30d   :  { %3715 = vst [vmem:[%s5393_s4] ss:$2 sm:$0xff] %v3699_v17  ;;  %4103 = vst [vmem:[%s5393_s4 + $0x20] ss:$2 sm:$0xff] %v3700_v60  ;;  %v3746_v26 = vmul.f32 0.2, %v5290_v24 }
 0x30e   :  { %4105 = vst [vmem:[%s5393_s4 + $0x40] ss:$2 sm:$0xff] %v3701_v18  ;;  %4107 = vst [vmem:[%s5393_s4 + $0x60] ss:$2 sm:$0xff] %v3702_v19  ;;  %v3747_v35 = vmul.f32 0.2, %v5293_v20 }
 0x30f   :  { %v3748_v45 = vmul.f32 0.2, %v3740_v13  ;;  %4102 = vst [vmem:[%s5393_s4 + $0x10] ss:$2 sm:$0xff] %v3703_v1  ;;  %4104 = vst [vmem:[%s5393_s4 + $0x30] ss:$2 sm:$0xff] %v3704_v4  ;;  %v3754_v15 = vmax.f32 %v5290_v24, %v3746_v26 }
 0x310   :  { %4106 = vst [vmem:[%s5393_s4 + $0x50] ss:$2 sm:$0xff] %v3705_v53  ;;  %4108 = vst [vmem:[%s5393_s4 + $0x70] ss:$2 sm:$0xff] %v3706_v62  ;;  %v3749_v34 = vmul.f32 0.2, %v3741_v63  ;;  %v3755_v42 = vmax.f32 %v5293_v20, %v3747_v35 }
 0x311   :  { %v3750_v38 = vmul.f32 0.2, %v3742_v61  ;;  %v3751_v44 = vmul.f32 0.2, %v3743_v48  ;;  %v3752_v32 = vmul.f32 0.2, %v3744_v29  ;;  %v3756_v8 = vmax.f32 %v3740_v13, %v3748_v45 }
 0x312   :  { %v3753_v52 = vmul.f32 0.2, %v3745_v7  ;;  %v3757_v43 = vmax.f32 %v3741_v63, %v3749_v34  ;;  %v3770_v46 = vcombine.low %v3754_v15, %v3755_v42  ;;  %v3771_v5 = vcombine.high %v3754_v15, %v3755_v42 }
 0x313   :  { %v3758_v56 = vmax.f32 %v3742_v61, %v3750_v38  ;;  %v3759_v57 = vmax.f32 %v3743_v48, %v3751_v44  ;;  %v3760_v6 = vmax.f32 %v3744_v29, %v3752_v32 }
 0x314   :  { %v3761_v21 = vmax.f32 %v3745_v7, %v3753_v52  ;;  %v3772_v50 = vcombine.low %v3756_v8, %v3757_v43  ;;  %v3773_v39 = vcombine.high %v3756_v8, %v3757_v43  ;;  %v3784_v14 = vrot.slane %v3770_v46, %v4189_v22 }
 0x315   :  { %v3774_v40 = vcombine.low %v3758_v56, %v3759_v57  ;;  %v3775_v58 = vcombine.high %v3758_v56, %v3759_v57  ;;  %v3791_v24 = vrot.slane %v3771_v5, %v4189_v22 }
 0x316   :  { %v3776_v54 = vcombine.low %v3760_v6, %v3761_v21  ;;  %v3777_v23 = vcombine.high %v3760_v6, %v3761_v21  ;;  %v3798_v20 = vrot.slane %v3772_v50, %v4189_v22  ;;  %v3805_v55 = vrot.slane %v3773_v39, %v4189_v22 }
 0x317   :  { %v3812_v10 = vrot.slane %v3774_v40, %v4189_v22  ;;  %v3819_v16 = vrot.slane %v3775_v58, %v4189_v22 }
 0x318   :  { %v3826_v37 = vrot.slane %v3776_v54, %v4189_v22  ;;  %v3833_v3 = vrot.slane %v3777_v23, %v4189_v22  ;;  %v3834_v27 = vcombine.low %v3784_v14, %v3798_v20  ;;  %v3835_v13 = vcombine.high %v3784_v14, %v3798_v20 }
 0x319   :  { %v3836_v63 = vcombine.low %v3791_v24, %v3805_v55  ;;  %v3837_v41 = vcombine.high %v3791_v24, %v3805_v55 }
 0x31a   :  { %v3838_v2 = vcombine.low %v3812_v10, %v3826_v37  ;;  %v3839_v51 = vcombine.high %v3812_v10, %v3826_v37  ;;  %v3840_v9 = vcombine.low %v3819_v16, %v3833_v3  ;;  %v3841_v47 = vcombine.high %v3819_v16, %v3833_v3 }
 0x31b   :  { %v3848_v11 = vrot.slane %v3834_v27, %v4189_v22  ;;  %v3855_v36 = vrot.slane %v3836_v63, %v4189_v22  ;;  %v3862_v25 = vrot.slane %v3835_v13, %v4189_v22  ;;  %v3869_v49 = vrot.slane %v3837_v41, %v4189_v22 }
 0x31c   :  { %v3876_v0 = vrot.slane %v3838_v2, %v4189_v22  ;;  %v3883_v31 = vrot.slane %v3840_v9, %v4189_v22  ;;  %v3890_v59 = vrot.slane %v3839_v51, %v4189_v22  ;;  %v3897_v28 = vrot.slane %v3841_v47, %v4189_v22 }
 0x31e   :  { %v3898_v12 = vcombine.low %v3848_v11, %v3876_v0  ;;  %v3899_v30 = vcombine.high %v3848_v11, %v3876_v0  ;;  %v3900_v33 = vcombine.low %v3855_v36, %v3883_v31  ;;  %v3901_v61 = vcombine.high %v3855_v36, %v3883_v31 }
 0x31f   :  { %v3902_v48 = vcombine.low %v3862_v25, %v3890_v59  ;;  %v3903_v29 = vcombine.high %v3862_v25, %v3890_v59  ;;  %v3904_v7 = vcombine.low %v3869_v49, %v3897_v28  ;;  %v3905_v17 = vcombine.high %v3869_v49, %v3897_v28 }
 0x320   :  { %4109 = vst [vmem:[%s5393_s4 + $0x1] ss:$2 sm:$0xff] %v3898_v12  ;;  %4111 = vst [vmem:[%s5393_s4 + $0x21] ss:$2 sm:$0xff] %v3899_v30 }
 0x321   :  { %4113 = vst [vmem:[%s5393_s4 + $0x41] ss:$2 sm:$0xff] %v3900_v33  ;;  %4115 = vst [vmem:[%s5393_s4 + $0x61] ss:$2 sm:$0xff] %v3901_v61 }
 0x322   :  { %4110 = vst [vmem:[%s5393_s4 + $0x11] ss:$2 sm:$0xff] %v3902_v48  ;;  %4112 = vst [vmem:[%s5393_s4 + $0x31] ss:$2 sm:$0xff] %v3903_v29 }
 0x323   :  { %4114 = vst [vmem:[%s5393_s4 + $0x51] ss:$2 sm:$0xff] %v3904_v7  ;;  %4116 = vst [vmem:[%s5393_s4 + $0x71] ss:$2 sm:$0xff] %v3905_v17 }

// kernel: decoder_forward.4
= control target key start
LH: loop header
LB: loop body
LE: loop exit
PB: predicated region body
PF: predicated region fallthrough
CT: control target
= control target key end

     0   :  { %v174_v0 = vlaneseq  ;;  %v5630_v4 = vmov 1966171168   ;;  %s5631_s11 = smov 96   ;;  %s5633_s7 = smov 64   ;;  %vm772_vm0 = vcmask 785408   ;;  %vm821_vm1 = vcmask 195584   ;;  %s8070_s0 = inlined_call_operand.vmem [shape: f32[24,2,1088], index: 0, kind: input, shape index: {}]   ;;  %s8071_s1 = inlined_call_operand.vmem [shape: f32[3,8,24], index: 1, kind: input, shape index: {}]   ;;  %s8072_s2 = inlined_call_operand.vmem [shape: f32[8,1], index: 2, kind: input, shape index: {}]   ;;  %s8073_s3 = inlined_call_operand.vmem [shape: f32[8,1], index: 3, kind: input, shape index: {}]   ;;  %s8074_s4 = inlined_call_operand.vmem [shape: f32[8,2,1024], index: 4, kind: output, shape index: {}]  }
   0x1   :  { %v5663_v1 = vld [vmem:[%s8070_s0 + $0x120] ss:$2 sm:$0xff]  ;;  %v172_v5 = vunpack.c.l.s4 %v5630_v4  ;;  %v5711_v17 = vld [vmem:[%s8070_s0 + $0x90] ss:$2 sm:$0xff]  ;;  %vm2127_vm2 = vcmask 523264  }
   0x2   :  { %v5668_v2 = vld [vmem:[%s8070_s0 + $0x132] ss:$2 sm:$0xff]  ;;  %v175_v12 = vshrl.u32 %v174_v0, 7  ;;  %v5716_v18 = vld [vmem:[%s8070_s0 + $0xa2] ss:$2 sm:$0xff] }
   0x3   :  { %v5673_v3 = vld [vmem:[%s8070_s0 + $0x144] ss:$2 sm:$0xff]  ;;  %v173_v11 = vunpack.c.0.s8 %v172_v5  ;;  %v533_v13 = vcombine.low %v5663_v1, %v5668_v2  ;;  %v5721_v19 = vld [vmem:[%s8070_s0 + $0xb4] ss:$2 sm:$0xff]  ;;  %v534_v21 = vcombine.high %v5663_v1, %v5668_v2  ;;  %v348_v26 = vcombine.low %v5711_v17, %v5716_v18 }
   0x4   :  { %v5678_v6 = vld [vmem:[%s8070_s0 + $0x156] ss:$2 sm:$0xff]  ;;  %v5732_v23 = vld [vmem:[%s8070_s0 + $0xc6] ss:$2 sm:$0xff] }
   0x5   :  { %v5683_v7 = vld [vmem:[%s8070_s0 + $0x168] ss:$2 sm:$0xff]  ;;  %v535_v14 = vcombine.low %v5673_v3, %v5678_v6  ;;  %v5723_v20 = vsub.s32 %v173_v11, %v175_v12  ;;  %v536_v22 = vcombine.high %v5673_v3, %v5678_v6  ;;  %v5737_v24 = vld [vmem:[%s8070_s0 + $0xd8] ss:$2 sm:$0xff]  ;;  %v350_v31 = vcombine.low %v5721_v19, %v5732_v23 }
   0x6   :  { %v5688_v8 = vld [vmem:[%s8070_s0 + $0x17a] ss:$2 sm:$0xff]  ;;  %v5742_v25 = vld [vmem:[%s8070_s0 + $0xea] ss:$2 sm:$0xff] }
   0x7   :  { %v5693_v9 = vld [vmem:[%s8070_s0 + $0x18c] ss:$2 sm:$0xff]  ;;  %v537_v15 = vcombine.low %v5683_v7, %v5688_v8  ;;  %v538_v27 = vcombine.high %v5683_v7, %v5688_v8  ;;  %v5753_v29 = vld [vmem:[%s8070_s0 + $0xfc] ss:$2 sm:$0xff]  ;;  %v352_v32 = vcombine.low %v5737_v24, %v5742_v25  ;;  %v547_v33 = vrot.slane %v533_v13, %v5723_v20 }
   0x8   :  { %v5698_v10 = vld [vmem:[%s8070_s0 + $0x19e] ss:$2 sm:$0xff]  ;;  %v5758_v30 = vld [vmem:[%s8070_s0 + $0x10e] ss:$2 sm:$0xff]  ;;  %v561_v34 = vrot.slane %v535_v14, %v5723_v20  ;;  %v362_v40 = vrot.slane %v348_v26, %v5723_v20  ;;  %v376_v41 = vrot.slane %v350_v31, %v5723_v20  ;;  %v349_v8 = vcombine.high %v5711_v17, %v5716_v18 }
   0x9   :  { %v539_v16 = vcombine.low %v5693_v9, %v5698_v10  ;;  %v540_v28 = vcombine.high %v5693_v9, %v5698_v10  ;;  %v575_v35 = vrot.slane %v537_v15, %v5723_v20  ;;  %v5771_v37 = vld [vmem:[%s8070_s0] ss:$2 sm:$0xff]  ;;  %v354_v39 = vcombine.low %v5753_v29, %v5758_v30 }
   0xa   :  { %v5776_v38 = vld [vmem:[%s8070_s0 + $0x12] ss:$2 sm:$0xff]  ;;  %v390_v42 = vrot.slane %v352_v32, %v5723_v20  ;;  %v598_v43 = vcombine.high %v547_v33, %v561_v34  ;;  %v597_v45 = vcombine.low %v547_v33, %v561_v34  ;;  %v413_v48 = vcombine.high %v362_v40, %v376_v41 }
   0xb   :  { %v589_v36 = vrot.slane %v539_v16, %v5723_v20  ;;  %v404_v47 = vrot.slane %v354_v39, %v5723_v20  ;;  %v412_v49 = vcombine.low %v362_v40, %v376_v41  ;;  %v5787_v50 = vld [vmem:[%s8070_s0 + $0x24] ss:$2 sm:$0xff]  ;;  %v163_v53 = vcombine.low %v5771_v37, %v5776_v38 }
   0xc   :  { %v5792_v51 = vld [vmem:[%s8070_s0 + $0x36] ss:$2 sm:$0xff]  ;;  %v625_v54 = vrot.slane %v598_v43, %v5723_v20  ;;  %v611_v56 = vrot.slane %v597_v45, %v5723_v20  ;;  %v5821_v62 = vrot.slane %v413_v48, %v5723_v20  ;;  %v351_v26 = vcombine.high %v5721_v19, %v5732_v23 }
   0xd   :  { %v602_v44 = vcombine.high %v575_v35, %v589_v36  ;;  %v601_v46 = vcombine.low %v575_v35, %v589_v36  ;;  %v5797_v52 = vld [vmem:[%s8070_s0 + $0x48] ss:$2 sm:$0xff]  ;;  %v417_v61 = vcombine.high %v390_v42, %v404_v47  ;;  %v416_v63 = vcombine.low %v390_v42, %v404_v47 }
   0xe   :  { %v5808_v58 = vld [vmem:[%s8070_s0 + $0x5a] ss:$2 sm:$0xff]  ;;  %v426_v0 = vrot.slane %v412_v49, %v5723_v20  ;;  %v165_v7 = vcombine.low %v5787_v50, %v5792_v51  ;;  %v177_v14 = vrot.slane %v163_v53, %v5723_v20  ;;  %v554_v34 = vrot.slane %v534_v21, %v5723_v20 }
   0xf   :  { %v653_v55 = vrot.slane %v602_v44, %v5723_v20  ;;  %v639_v57 = vrot.slane %v601_v46, %v5723_v20  ;;  %v5813_v59 = vld [vmem:[%s8070_s0 + $0x6c] ss:$2 sm:$0xff]  ;;  %v468_v9 = vrot.slane %v417_v61, %v5723_v20  ;;  %v454_v10 = vrot.slane %v416_v63, %v5723_v20 }
  0x10   :  { %v5818_v60 = vld [vmem:[%s8070_s0 + $0x7e] ss:$2 sm:$0xff]  ;;  %v167_v11 = vcombine.low %v5797_v52, %v5808_v58  ;;  %v191_v15 = vrot.slane %v165_v7, %v5723_v20  ;;  %v568_v36 = vrot.slane %v536_v22, %v5723_v20  ;;  %v582_v39 = vrot.slane %v538_v27, %v5723_v20  ;;  %v5428_v63 = vld [vmem:[%s8070_s0 + $0x130] ss:$2 sm:$0x1] }
  0x11   :  { %v5824_v4 = vcombine.low %v625_v54, %v653_v55  ;;  %v5826_v5 = vcombine.low %v611_v56, %v639_v57  ;;  %v169_v12 = vcombine.low %v5813_v59, %v5818_v60  ;;  %v5842_v13 = vcombine.high %v611_v56, %v639_v57  ;;  %v5430_v7 = vld [vmem:[%s8070_s0 + $0x154] ss:$2 sm:$0x1] }
  0x12   :  { %v5847_v16 = vcombine.low %v5821_v62, %v468_v9  ;;  %v5849_v17 = vcombine.high %v426_v0, %v454_v10  ;;  %v205_v18 = vrot.slane %v167_v11, %v5723_v20  ;;  %v228_v32 = vcombine.high %v177_v14, %v191_v15 }
  0x13   :  { %756 = vrot.lane.b32.xlu0 %v5824_v4, %s5631_s11  ;;  %754 = vrot.lane.b32.xlu1 %v5826_v5, %s5631_s11  ;;  %8118 = vst [vmem:[#allocation2_spill] sm:$0xff] %v5842_v13  ;;  %v219_v31 = vrot.slane %v169_v12, %v5723_v20  ;;  %v227_v33 = vcombine.low %v177_v14, %v191_v15  ;;  %v5434_v12 = vld [vmem:[%s8070_s0 + $0x19c] ss:$2 sm:$0x1] }
  0x14   :  { %8119 = vst [vmem:[#allocation3_spill] sm:$0xff] %v5849_v17  ;;  %v5859_v35 = vcombine.low %v426_v0, %v454_v10  ;;  %v596_v19 = vrot.slane %v540_v28, %v5723_v20  ;;  %v5872_v1 = vrot.slane %v228_v32, %v5723_v20  ;;  %v599_v40 = vcombine.low %v554_v34, %v568_v36  ;;  %v5429_v0 = vld [vmem:[%s8070_s0 + $0x142] ss:$2 sm:$0x1] }
  0x15   :  { %v232_v23 = vcombine.high %v205_v18, %v219_v31  ;;  %v231_v2 = vcombine.low %v205_v18, %v219_v31  ;;  %v241_v21 = vrot.slane %v227_v33, %v5723_v20  ;;  %v353_v6 = vcombine.high %v5737_v24, %v5742_v25  ;;  %v5433_v10 = vld [vmem:[%s8070_s0 + $0x18a] ss:$2 sm:$0x1]  ;;  %v5435_v14 = vld [vmem:[%s8070_s0 + $0x1ae] ss:$2 sm:$0x1] }
  0x16   :  { %v603_v3 = vcombine.low %v582_v39, %v596_v19  ;;  %v355_v28 = vcombine.high %v5753_v29, %v5758_v30  ;;  %v618_v41 = vrot.slane %v599_v40, %v5723_v20  ;;  %v5883_v42 = vrot.slane %v349_v8, %v5723_v20  ;;  %v5431_v8 = vld [vmem:[%s8070_s0 + $0x166] ss:$2 sm:$0x1]  ;;  %v5422_v40 = vld [vmem:[%s8070_s0 + $0xc4] ss:$2 sm:$0x1] }
  0x17   :  { %758 = vrot.lane.b32.xlu0 %v5842_v13, %s5631_s11  ;;  %738 = vrot.lane.b32.xlu1 %v5847_v16, %s5631_s11  ;;  %v283_v22 = vrot.slane %v232_v23, %v5723_v20  ;;  %v269_v27 = vrot.slane %v231_v2, %v5723_v20  ;;  %v383_v29 = vrot.slane %v351_v26, %v5723_v20  ;;  %v5420_v2 = vld [vmem:[%s8070_s0 + $0xa0] ss:$2 sm:$0x1] }
  0x18   :  { %v646_v43 = vrot.slane %v603_v3, %v5723_v20  ;;  %v397_v30 = vrot.slane %v353_v6, %v5723_v20  ;;  %v600_v44 = vcombine.high %v554_v34, %v568_v36  ;;  %v604_v45 = vcombine.high %v582_v39, %v596_v19  ;;  %v5423_v6 = vld [vmem:[%s8070_s0 + $0xd6] ss:$2 sm:$0x1] }
  0x19   :  { %v5890_v24 = vcombine.low %v5872_v1, %v283_v22  ;;  %v5892_v25 = vcombine.high %v241_v21, %v269_v27  ;;  %v411_v46 = vrot.slane %v355_v28, %v5723_v20  ;;  %v5898_v47 = vcombine.high %v625_v54, %v653_v55 }
  0x1a   :  { %v414_v48 = vcombine.low %v5883_v42, %v383_v29  ;;  %v164_v49 = vcombine.high %v5771_v37, %v5776_v38  ;;  %v166_v53 = vcombine.high %v5787_v50, %v5792_v51  ;;  %v5909_v56 = vcombine.low %v618_v41, %v646_v43 }
  0x1b   :  { %740 = vrot.lane.b32.xlu0 %v5849_v17, %s5631_s11  ;;  %736 = vrot.lane.b32.xlu1 %v5859_v35, %s5631_s11  ;;  %8120 = vst [vmem:[#allocation4_spill] sm:$0xff] %v5892_v25  ;;  %8121 = vst [vmem:[#allocation5_spill] sm:$0xff] %v5898_v47  ;;  %v418_v57 = vcombine.low %v397_v30, %v411_v46  ;;  %v168_v54 = vcombine.high %v5797_v52, %v5808_v58  ;;  %v6247_v17 = vld [vmem:[%s8070_s0 + $0x7e] ss:$2 sm:$0xff] }
  0x1c   :  { %8122 = vst [vmem:[#allocation6_spill] sm:$0xff] %v5909_v56  ;;  %v170_v55 = vcombine.high %v5813_v59, %v5818_v60  ;;  %v5916_v37 = vcombine.high %v5821_v62, %v468_v9  ;;  %v5919_v38 = vrot.slane %v600_v44, %v5723_v20  ;;  %v5922_v50 = vrot.slane %v604_v45, %v5723_v20  ;;  %v5432_v9 = vld [vmem:[%s8070_s0 + $0x178] ss:$2 sm:$0x1] }
  0x1d   :  { %v5925_v51 = vrot.slane %v414_v48, %v5723_v20  ;;  %v5928_v61 = vrot.slane %v418_v57, %v5723_v20  ;;  %v184_v52 = vrot.slane %v164_v49, %v5723_v20  ;;  %v198_v58 = vrot.slane %v166_v53, %v5723_v20  ;;  %v5427_v45 = vld [vmem:[%s8070_s0 + $0x11e] ss:$2 sm:$0x1] }
  0x1e   :  { %8123 = vst [vmem:[#allocation7_spill] sm:$0xff] %v5916_v37  ;;  %v5936_v59 = vcombine.low %v241_v21, %v269_v27  ;;  %v212_v60 = vrot.slane %v168_v54, %v5723_v20  ;;  %v226_v62 = vrot.slane %v170_v55, %v5723_v20  ;;  %v5960_v11 = vcombine.low %v5919_v38, %v5922_v50  ;;  %v5421_v21 = vld [vmem:[%s8070_s0 + $0xb2] ss:$2 sm:$0x1] }
  0x1f   :  { %720 = vrot.lane.b32.xlu0 %v5890_v24, %s5631_s11  ;;  %722 = vrot.lane.b32.xlu1 %v5892_v25, %s5631_s11  ;;  %v5970_v15 = vcombine.low %v5925_v51, %v5928_v61  ;;  %v415_v18 = vcombine.high %v5883_v42, %v383_v29  ;;  %v419_v26 = vcombine.high %v397_v30, %v411_v46  ;;  %v5424_v27 = vld [vmem:[%s8070_s0 + $0xe8] ss:$2 sm:$0x1]  ;;  %v6036_v54 = vld [vmem:[%s8070_s0 + $0x132] ss:$2 sm:$0xff] }
  0x20   :  { %v229_v31 = vcombine.low %v184_v52, %v198_v58  ;;  %v233_v32 = vcombine.low %v212_v60, %v226_v62  ;;  %v230_v33 = vcombine.high %v184_v52, %v198_v58  ;;  %v234_v34 = vcombine.high %v212_v60, %v226_v62  ;;  %v6027_v46 = vld [vmem:[%s8070_s0 + $0x120] ss:$2 sm:$0xff] }
  0x21   :  { %8124 = vst [vmem:[#allocation8_spill] sm:$0xff] %v5970_v15  ;;  %v669_v36 = vcombine.low %v5428_v63, %v5429_v0  ;;  %v670_v39 = vcombine.low %v5430_v7, %v5431_v8  ;;  %v671_v19 = vcombine.low %v5432_v9, %v5433_v10  ;;  %v672_v23 = vcombine.low %v5434_v12, %v5435_v14  ;;  %v6041_v55 = vld [vmem:[%s8070_s0 + $0x144] ss:$2 sm:$0xff]  ;;  %v5413_v12 = vld [vmem:[%s8070_s0 + $0x22] ss:$2 sm:$0x1] }
  0x22   :  { %v5987_v3 = vcombine.high %v5872_v1, %v283_v22  ;;  %v5995_v28 = vcombine.high %v618_v41, %v646_v43  ;;  %v5998_v42 = vrot.slane %v415_v18, %v5723_v20  ;;  %v6001_v29 = vrot.slane %v419_v26, %v5723_v20  ;;  %v5425_v1 = vld [vmem:[%s8070_s0 + $0xfa] ss:$2 sm:$0x1]  ;;  %v5426_v22 = vld [vmem:[%s8070_s0 + $0x10c] ss:$2 sm:$0x1] }
  0x23   :  { %760 = vrot.lane.b32.xlu0 %v5898_v47, %s5631_s11  ;;  %762 = vrot.lane.b32.xlu1 %v5909_v56, %s5631_s11  ;;  %v248_v30 = vrot.slane %v229_v31, %v5723_v20  ;;  %v276_v41 = vrot.slane %v233_v32, %v5723_v20  ;;  %v6016_v43 = vrot.slane %v230_v33, %v5723_v20  ;;  %v6046_v52 = vld [vmem:[%s8070_s0 + $0x156] ss:$2 sm:$0xff]  ;;  %v8075_v58 = vmov 0.0   ;;  %v5412_v10 = vld [vmem:[%s8070_s0 + $0x10] ss:$2 sm:$0x1] }
  0x24   :  { %8125 = vst [vmem:[#allocation9_spill] sm:$0xff] %v5987_v3  ;;  %8126 = vst [vmem:[#allocation10_spill] sm:$0xff] %v5995_v28  ;;  %v6019_v44 = vrot.slane %v234_v34, %v5723_v20  ;;  %v679_v48 = vrot.slane %v669_v36, %v5723_v20  ;;  %v686_v49 = vrot.slane %v670_v39, %v5723_v20  ;;  %889 = vmatprep.mubr.f32.mxu0 %v8075_v58  ;;  %v6052_v0 = vld [vmem:[%s8070_s0 + $0x168] ss:$2 sm:$0xff] }
  0x25   :  { %v693_v53 = vrot.slane %v671_v19, %v5723_v20  ;;  %v700_v57 = vrot.slane %v672_v23, %v5723_v20  ;;  %v484_v60 = vcombine.low %v5420_v2, %v5421_v21  ;;  %v485_v62 = vcombine.low %v5422_v40, %v5423_v6  ;;  %v6057_v7 = vld [vmem:[%s8070_s0 + $0x17a] ss:$2 sm:$0xff]  ;;  %960 = vmatprep.mubr.f32.mxu1 %v8075_v58  ;;  %v5414_v18 = vld [vmem:[%s8070_s0 + $0x34] ss:$2 sm:$0x1] }
  0x26   :  { %v486_v63 = vcombine.low %v5424_v27, %v5425_v1  ;;  %v6062_v8 = vld [vmem:[%s8070_s0 + $0x18c] ss:$2 sm:$0xff]  ;;  %v487_v14 = vcombine.low %v5426_v22, %v5427_v45  ;;  %v5415_v26 = vld [vmem:[%s8070_s0 + $0x46] ss:$2 sm:$0x1]  ;;  %v6088_v31 = vcombine.low %v5998_v42, %v6001_v29  ;;  %v6090_v32 = vcombine.low %v248_v30, %v276_v41 }
  0x27   :  { %742 = vrot.lane.b32.xlu1 %v5916_v37, %s5631_s11  ;;  %718 = vrot.lane.b32.xlu0 %v5936_v59, %s5631_s11  ;;  %v6067_v9 = vld [vmem:[%s8070_s0 + $0x19e] ss:$2 sm:$0xff]  ;;  %v6094_v33 = vcombine.high %v5925_v51, %v5928_v61  ;;  %v5416_v34 = vld [vmem:[%s8070_s0 + $0x58] ss:$2 sm:$0x1]  ;;  %v6104_v39 = vcombine.low %v6016_v43, %v6019_v44  ;;  %v701_v19 = vcombine.low %v679_v48, %v686_v49 }
  0x28   :  { %8127 = vst [vmem:[#allocation11_spill] sm:$0xff] %v6088_v31  ;;  %8128 = vst [vmem:[#allocation12_spill] sm:$0xff] %v6090_v32  ;;  %v5417_v36 = vld [vmem:[%s8070_s0 + $0x6a] ss:$2 sm:$0x1]  ;;  %v702_v23 = vcombine.low %v693_v53, %v700_v57  ;;  %v1888_v2 = vcombine.low %v6027_v46, %v6036_v54  ;;  %v494_v21 = vrot.slane %v484_v60, %v5723_v20 }
  0x29   :  { %8129 = vst [vmem:[#allocation13_spill] sm:$0xff] %v6094_v33  ;;  %8130 = vst [vmem:[#allocation14_spill] sm:$0xff] %v6104_v39  ;;  %v5418_v51 = vld [vmem:[%s8070_s0 + $0x7c] ss:$2 sm:$0x1]  ;;  %v501_v40 = vrot.slane %v485_v62, %v5723_v20  ;;  %v508_v6 = vrot.slane %v486_v63, %v5723_v20  ;;  %v1890_v27 = vcombine.low %v6041_v55, %v6046_v52 }
  0x2a   :  { %v5419_v61 = vld [vmem:[%s8070_s0 + $0x8e] ss:$2 sm:$0x1]  ;;  %v515_v1 = vrot.slane %v487_v14, %v5723_v20  ;;  %v1892_v22 = vcombine.low %v6052_v0, %v6057_v7  ;;  %v1894_v45 = vcombine.low %v6062_v8, %v6067_v9  ;;  %v299_v48 = vcombine.low %v5412_v10, %v5413_v12  ;;  %v6131_v60 = vld [vmem:[%s8070_s0 + $0x90] ss:$2 sm:$0xff] }
  0x2b   :  { %764 = vrot.lane.b32.xlu1 %v5960_v11, %s5631_s11  ;;  %744 = vrot.lane.b32.xlu0 %v5970_v15, %s5631_s11  ;;  %v300_v49 = vcombine.low %v5414_v18, %v5415_v26  ;;  %v301_v53 = vcombine.low %v5416_v34, %v5417_v36  ;;  %v302_v57 = vcombine.low %v5418_v51, %v5419_v61  ;;  %v6136_v62 = vld [vmem:[%s8070_s0 + $0xa2] ss:$2 sm:$0xff] }
  0x2c   :  { %v6140_v63 = vcombine.high %v5919_v38, %v5922_v50  ;;  %v6142_v10 = vcombine.high %v248_v30, %v276_v41  ;;  %v709_v12 = vrot.slane %v701_v19, %v5723_v20  ;;  %v6148_v14 = vld [vmem:[%s8070_s0 + $0xb4] ss:$2 sm:$0xff]  ;;  %v716_v38 = vrot.slane %v702_v23, %v5723_v20  ;;  %v6219_v58 = vld [vmem:[%s8070_s0 + $0x24] ss:$2 sm:$0xff] }
  0x2d   :  { %v6153_v18 = vld [vmem:[%s8070_s0 + $0xc6] ss:$2 sm:$0xff]  ;;  %v516_v50 = vcombine.low %v494_v21, %v501_v40  ;;  %v6162_v30 = vrot.slane %v1888_v2, %v5723_v20  ;;  %v1916_v41 = vrot.slane %v1890_v27, %v5723_v20  ;;  %v517_v23 = vcombine.low %v508_v6, %v515_v1 }
  0x2e   :  { %8131 = vst [vmem:[#allocation15_spill] sm:$0xff] %v6140_v63  ;;  %8132 = vst [vmem:[#allocation16_spill] sm:$0xff] %v6142_v10  ;;  %v6158_v26 = vld [vmem:[%s8070_s0 + $0xd8] ss:$2 sm:$0xff]  ;;  %v1930_v2 = vrot.slane %v1892_v22, %v5723_v20  ;;  %v1944_v51 = vrot.slane %v1894_v45, %v5723_v20  ;;  %v309_v61 = vrot.slane %v299_v48, %v5723_v20 }
  0x2f   :  { %724 = vrot.lane.b32.xlu1 %v5987_v3, %s5631_s11  ;;  %766 = vrot.lane.b32.xlu0 %v5995_v28, %s5631_s11  ;;  %v6168_v34 = vld [vmem:[%s8070_s0 + $0xea] ss:$2 sm:$0xff]  ;;  %v316_v21 = vrot.slane %v300_v49, %v5723_v20  ;;  %v323_v40 = vrot.slane %v301_v53, %v5723_v20  ;;  %v330_v27 = vrot.slane %v302_v57, %v5723_v20  ;;  %v6237_v25 = vld [vmem:[%s8070_s0 + $0x5a] ss:$2 sm:$0xff] }
  0x30   :  { %v6173_v36 = vld [vmem:[%s8070_s0 + $0xfc] ss:$2 sm:$0xff]  ;;  %v1703_v6 = vcombine.low %v6131_v60, %v6136_v62  ;;  %v1705_v1 = vcombine.low %v6148_v14, %v6153_v18  ;;  %v1707_v22 = vcombine.low %v6158_v26, %v6168_v34  ;;  %v6210_v53 = vcombine.high %v5998_v42, %v6001_v29  ;;  %v6242_v3 = vld [vmem:[%s8070_s0 + $0x6c] ss:$2 sm:$0xff] }
  0x31   :  { %v6178_v19 = vld [vmem:[%s8070_s0 + $0x10e] ss:$2 sm:$0xff]  ;;  %v6214_v57 = vcombine.high %v6016_v43, %v6019_v44  ;;  %v524_v42 = vrot.slane %v516_v50, %v5723_v20  ;;  %v531_v29 = vrot.slane %v517_v23, %v5723_v20  ;;  %v1953_v43 = vcombine.high %v6162_v30, %v1916_v41 }
  0x32   :  { %v1709_v45 = vcombine.low %v6173_v36, %v6178_v19  ;;  %v6201_v48 = vld [vmem:[%s8070_s0] ss:$2 sm:$0xff]  ;;  %8133 = vst [vmem:[#allocation17_spill] sm:$0xff] %v6210_v53  ;;  %v1957_v44 = vcombine.high %v1930_v2, %v1944_v51  ;;  %v717_v50 = vcombine.low %v709_v12, %v716_v38  ;;  %v331_v23 = vcombine.low %v309_v61, %v316_v21 }
  0x33   :  { %746 = vrot.lane.b32.xlu1 %v6088_v31, %s5631_s11  ;;  %726 = vrot.lane.b32.xlu0 %v6090_v32, %s5631_s11  ;;  %v6206_v49 = vld [vmem:[%s8070_s0 + $0x12] ss:$2 sm:$0xff]  ;;  %8134 = vst [vmem:[#allocation18_spill] sm:$0xff] %v6214_v57  ;;  %v332_v37 = vcombine.low %v323_v40, %v330_v27  ;;  %v1717_v13 = vrot.slane %v1703_v6, %v5723_v20 }
  0x34   :  { %v6229_v28 = vld [vmem:[%s8070_s0 + $0x48] ss:$2 sm:$0xff]  ;;  %v1731_v47 = vrot.slane %v1705_v1, %v5723_v20  ;;  %v1745_v32 = vrot.slane %v1707_v22, %v5723_v20  ;;  %v1518_v15 = vcombine.low %v6201_v48, %v6206_v49  ;;  %v1524_v12 = vcombine.low %v6242_v3, %v6247_v17 }
  0x35   :  { %v532_v38 = vcombine.low %v524_v42, %v531_v29  ;;  %v6266_v61 = vrot.slane %v1953_v43, %v5723_v20  ;;  %v6269_v21 = vrot.slane %v1957_v44, %v5723_v20  ;;  %v1952_v40 = vcombine.low %v6162_v30, %v1916_v41 }
  0x36   :  { %v339_v27 = vrot.slane %v331_v23, %v5723_v20  ;;  %v346_v6 = vrot.slane %v332_v37, %v5723_v20  ;;  %v1956_v1 = vcombine.low %v1930_v2, %v1944_v51  ;;  %v1767_v22 = vcombine.low %v1717_v13, %v1731_v47 }
  0x37   :  { %728 = vrot.lane.b32.xlu1 %v6104_v39, %s5631_s11  ;;  %748 = vrot.lane.b32.xlu0 %v6094_v33, %s5631_s11  ;;  %v6224_v33 = vld [vmem:[%s8070_s0 + $0x36] ss:$2 sm:$0xff]  ;;  %v1759_v39 = vrot.slane %v1709_v45, %v5723_v20  ;;  %v1768_v42 = vcombine.high %v1717_v13, %v1731_v47  ;;  %v1532_v43 = vrot.slane %v1518_v15, %v5723_v20 }
  0x38   :  { %v1574_v41 = vrot.slane %v1524_v12, %v5723_v20  ;;  %v2020_v37 = vcombine.low %v6266_v61, %v6269_v21  ;;  %v347_v13 = vcombine.low %v339_v27, %v346_v6  ;;  %v1994_v47 = vrot.slane %v1956_v1, %v5723_v20 }
  0x39   :  { %v1771_v45 = vcombine.low %v1745_v32, %v1759_v39  ;;  %v1772_v29 = vcombine.high %v1745_v32, %v1759_v39  ;;  %v1781_v15 = vrot.slane %v1767_v22, %v5723_v20  ;;  %v6291_v39 = vrot.slane %v1768_v42, %v5723_v20 }
  0x3a   :  { %v1889_v51 = vcombine.high %v6027_v46, %v6036_v54  ;;  %v1893_v23 = vcombine.high %v6052_v0, %v6057_v7  ;;  %v1895_v12 = vcombine.high %v6062_v8, %v6067_v9  ;;  %v1704_v6 = vcombine.high %v6131_v60, %v6136_v62 }
  0x3b   :  { %768 = vrot.lane.b32.xlu1 %v6140_v63, %s5631_s11  ;;  %730 = vrot.lane.b32.xlu0 %v6142_v10, %s5631_s11  ;;  %v1520_v63 = vcombine.low %v6219_v58, %v6224_v33  ;;  %v1522_v10 = vcombine.low %v6229_v28, %v6237_v25  ;;  %v1809_v32 = vrot.slane %v1771_v45, %v5723_v20 }
  0x3c   :  { %v1909_v7 = vrot.slane %v1889_v51, %v5723_v20  ;;  %v1937_v9 = vrot.slane %v1893_v23, %v5723_v20  ;;  %v1706_v1 = vcombine.high %v6148_v14, %v6153_v18  ;;  %v1708_v22 = vcombine.high %v6158_v26, %v6168_v34  ;;  %v5479_v51 = vld [vmem:[%s8070_s0 + $0x142] ss:$2 sm:$0x1] }
  0x3d   :  { %v1546_v44 = vrot.slane %v1520_v63, %v5723_v20  ;;  %v1560_v30 = vrot.slane %v1522_v10, %v5723_v20  ;;  %v6294_v63 = vrot.slane %v1772_v29, %v5723_v20  ;;  %v1832_v27 = vcombine.high %v1781_v15, %v1809_v32 }
  0x3e   :  { %v1710_v45 = vcombine.high %v6173_v36, %v6178_v19  ;;  %v1831_v42 = vcombine.low %v1781_v15, %v1809_v32  ;;  %v6338_v14 = vrot.slane %v1706_v1, %v5723_v20  ;;  %v6341_v18 = vrot.slane %v1708_v22, %v5723_v20  ;;  %v5461_v22 = vld [vmem:[%s8070_s0 + $0xa0] ss:$2 sm:$0x1] }
  0x3f   :  { %750 = vrot.lane.b32.xlu1 %v6210_v53, %s5631_s11  ;;  %770 = vrot.lane.b32.xlu0 %v717_v50, %s5631_s11  ;;  %v1966_v53 = vrot.slane %v1952_v40, %v5723_v20  ;;  %v1583_v10 = vcombine.high %v1532_v43, %v1546_v44  ;;  %v1587_v2 = vcombine.high %v1560_v30, %v1574_v41 }
  0x40   :  { %v1891_v50 = vcombine.high %v6041_v55, %v6046_v52  ;;  %v1835_v46 = vcombine.low %v6291_v39, %v6294_v63  ;;  %v1582_v54 = vcombine.low %v1532_v43, %v1546_v44  ;;  %v1586_v0 = vcombine.low %v1560_v30, %v1574_v41 }
  0x41   :  { %v2017_v40 = vcombine.high %v1966_v53, %v1994_v47  ;;  %v6309_v55 = vrot.slane %v1583_v10, %v5723_v20  ;;  %v6312_v52 = vrot.slane %v1587_v2, %v5723_v20  ;;  %v6333_v30 = vrot.slane %v1704_v6, %v5723_v20  ;;  %v5477_v2 = vld [vmem:[%s8070_s0 + $0x130] ss:$2 sm:$0x1] }
  0x42   :  { %v1923_v8 = vrot.slane %v1891_v50, %v5723_v20  ;;  %v1596_v29 = vrot.slane %v1582_v54, %v5723_v20  ;;  %v1624_v43 = vrot.slane %v1586_v0, %v5723_v20  ;;  %v6344_v26 = vrot.slane %v1710_v45, %v5723_v20  ;;  %v5463_v45 = vld [vmem:[%s8070_s0 + $0xb2] ss:$2 sm:$0x1] }
  0x43   :  { %732 = vrot.lane.b32.xlu1 %v6214_v57, %s5631_s11  ;;  %752 = vrot.lane.b32.xlu0 %v532_v38, %s5631_s11  ;;  %v2016_v38 = vcombine.low %v1966_v53, %v1994_v47  ;;  %v1951_v53 = vrot.slane %v1895_v12, %v5723_v20  ;;  %v1650_v60 = vcombine.low %v6309_v55, %v6312_v52  ;;  %v5481_v12 = vld [vmem:[%s8070_s0 + $0x154] ss:$2 sm:$0x1] }
  0x44   :  { %v1954_v62 = vcombine.low %v1909_v7, %v1923_v8  ;;  %v1519_v34 = vcombine.high %v6201_v48, %v6206_v49  ;;  %v1521_v36 = vcombine.high %v6219_v58, %v6224_v33  ;;  %v1523_v19 = vcombine.high %v6229_v28, %v6237_v25 }
  0x45   :  { %v1958_v44 = vcombine.low %v1937_v9, %v1951_v53  ;;  %v1525_v41 = vcombine.high %v6242_v3, %v6247_v17  ;;  %v1769_v25 = vcombine.low %v6333_v30, %v6338_v14  ;;  %v1773_v17 = vcombine.low %v6341_v18, %v6344_v26 }
  0x46   :  { %v6357_v47 = vrot.slane %v1954_v62, %v5723_v20  ;;  %v6369_v3 = vrot.slane %v1519_v34, %v5723_v20  ;;  %v6372_v28 = vrot.slane %v1521_v36, %v5723_v20  ;;  %v6375_v58 = vrot.slane %v1523_v19, %v5723_v20  ;;  %v5467_v62 = vld [vmem:[%s8070_s0 + $0xd6] ss:$2 sm:$0x1]  ;;  %v5475_v34 = vld [vmem:[%s8070_s0 + $0x11e] ss:$2 sm:$0x1] }
  0x47   :  { %2111 = vrot.lane.b32.xlu1 %v2020_v37, %s5633_s7  ;;  %734 = vrot.lane.b32.xlu0 %v347_v13, %s5631_s11  ;;  %v2021_v37 = vcombine.high %v6266_v61, %v6269_v21  ;;  %v1647_v13 = vcombine.high %v1596_v29, %v1624_v43  ;;  %v6362_v48 = vrot.slane %v1958_v44, %v5723_v20  ;;  %v5469_v44 = vld [vmem:[%s8070_s0 + $0xe8] ss:$2 sm:$0x1] }
  0x48   :  { %v6378_v33 = vrot.slane %v1525_v41, %v5723_v20  ;;  %v1646_v49 = vcombine.low %v1596_v29, %v1624_v43  ;;  %v1955_v61 = vcombine.high %v1909_v7, %v1923_v8  ;;  %v1959_v21 = vcombine.high %v1937_v9, %v1951_v53  ;;  %v5491_v7 = vld [vmem:[%s8070_s0 + $0x1ae] ss:$2 sm:$0x1] }
  0x49   :  { %v2018_v15 = vcombine.low %v6357_v47, %v6362_v48  ;;  %v6385_v32 = vrot.slane %v1769_v25, %v5723_v20  ;;  %v6388_v10 = vrot.slane %v1773_v17, %v5723_v20  ;;  %v1584_v50 = vcombine.low %v6369_v3, %v6372_v28  ;;  %v6498_v25 = vld [vmem:[%s8070_s0 + $0x145] ss:$2 sm:$0xff] }
  0x4a   :  { %v1588_v23 = vcombine.low %v6375_v58, %v6378_v33  ;;  %v6419_v0 = vrot.slane %v1955_v61, %v5723_v20  ;;  %v1770_v8 = vcombine.high %v6333_v30, %v6338_v14  ;;  %v1774_v6 = vcombine.high %v6341_v18, %v6344_v26  ;;  %v5471_v30 = vld [vmem:[%s8070_s0 + $0xfa] ss:$2 sm:$0x1]  ;;  %v5473_v26 = vld [vmem:[%s8070_s0 + $0x10c] ss:$2 sm:$0x1] }
  0x4b   :  { %2109 = vrot.lane.b32.xlu1 %v2016_v38, %s5633_s7  ;;  %2113 = vrot.lane.b32.xlu0 %v2017_v40, %s5633_s7  ;;  %v5483_v38 = vld [vmem:[%s8070_s0 + $0x166] ss:$2 sm:$0x1]  ;;  %v1836_v40 = vcombine.high %v6291_v39, %v6294_v63  ;;  %v1833_v54 = vcombine.low %v6385_v32, %v6388_v10  ;;  %v6422_v39 = vrot.slane %v1959_v21, %v5723_v20  ;;  %v5489_v63 = vld [vmem:[%s8070_s0 + $0x19c] ss:$2 sm:$0x1] }
  0x4c   :  { %v6433_v9 = vrot.slane %v1584_v50, %v5723_v20  ;;  %v6436_v53 = vrot.slane %v1588_v23, %v5723_v20  ;;  %v2024_v1 = vcombine.low %v5477_v2, %v5479_v51  ;;  %v2027_v43 = vcombine.low %v5489_v63, %v5491_v7  ;;  %v6503_v17 = vld [vmem:[%s8070_s0 + $0x157] ss:$2 sm:$0xff] }
  0x4d   :  { %v2019_v14 = vcombine.high %v6357_v47, %v6362_v48  ;;  %v2022_v18 = vcombine.low %v6419_v0, %v6422_v39  ;;  %v1651_v36 = vcombine.high %v6309_v55, %v6312_v52  ;;  %v6473_v19 = vrot.slane %v1770_v8, %v5723_v20  ;;  %v6516_v61 = vld [vmem:[%s8070_s0 + $0x17b] ss:$2 sm:$0xff] }
  0x4e   :  { %v1585_v41 = vcombine.high %v6369_v3, %v6372_v28  ;;  %v1648_v47 = vcombine.low %v6433_v9, %v6436_v53  ;;  %v6490_v55 = vrot.slane %v1774_v6, %v5723_v20  ;;  %v1589_v52 = vcombine.high %v6375_v58, %v6378_v33  ;;  %v6508_v3 = vld [vmem:[%s8070_s0 + $0x169] ss:$2 sm:$0xff] }
  0x4f   :  { %2095 = vrot.lane.b32.xlu1 %v1832_v27, %s5633_s7  ;;  %2093 = vrot.lane.b32.xlu0 %v1835_v46, %s5633_s7  ;;  %v5485_v27 = vld [vmem:[%s8070_s0 + $0x178] ss:$2 sm:$0x1]  ;;  %v5487_v46 = vld [vmem:[%s8070_s0 + $0x18a] ss:$2 sm:$0x1]  ;;  %v2034_v48 = vrot.slane %v2024_v1, %v5723_v20  ;;  %v2055_v33 = vrot.slane %v2027_v43, %v5723_v20  ;;  %v1841_v51 = vcombine.low %v5469_v44, %v5471_v30 }
  0x50   :  { %v2026_v29 = vcombine.low %v5485_v27, %v5487_v46  ;;  %v6521_v21 = vld [vmem:[%s8070_s0 + $0x18d] ss:$2 sm:$0xff]  ;;  %v1842_v50 = vcombine.low %v5473_v26, %v5475_v34  ;;  %v1834_v23 = vcombine.high %v6385_v32, %v6388_v10  ;;  %v6540_v27 = vrot.slane %v1589_v52, %v5723_v20  ;;  %v6589_v30 = vld [vmem:[%s8070_s0 + $0xfd] ss:$2 sm:$0xff] }
  0x51   :  { %v2989_v46 = vcombine.low %v6508_v3, %v6516_v61  ;;  %v1837_v32 = vcombine.low %v6473_v19, %v6490_v55  ;;  %v1863_v6 = vrot.slane %v1841_v51, %v5723_v20  ;;  %v6584_v44 = vld [vmem:[%s8070_s0 + $0xeb] ss:$2 sm:$0xff]  ;;  %v5445_v34 = vld [vmem:[%s8070_s0 + $0x10] ss:$2 sm:$0x1]  ;;  %v1649_v52 = vcombine.high %v6433_v9, %v6436_v53 }
  0x52   :  { %v2048_v58 = vrot.slane %v2026_v29, %v5723_v20  ;;  %v1870_v1 = vrot.slane %v1842_v50, %v5723_v20  ;;  %v6572_v29 = vld [vmem:[%s8070_s0 + $0xc7] ss:$2 sm:$0xff] }
  0x53   :  { %2075 = vrot.lane.b32.xlu1 %v1650_v60, %s5633_s7  ;;  %2091 = vrot.lane.b32.xlu0 %v1831_v42, %s5633_s7  ;;  %v2025_v42 = vcombine.low %v5481_v12, %v5483_v38  ;;  %v5465_v60 = vld [vmem:[%s8070_s0 + $0xc4] ss:$2 sm:$0x1]  ;;  %v2987_v38 = vcombine.low %v6498_v25, %v6503_v17 }
  0x54   :  { %v1840_v2 = vcombine.low %v5465_v60, %v5467_v62  ;;  %v2057_v63 = vcombine.low %v2048_v58, %v2055_v33  ;;  %v6579_v62 = vld [vmem:[%s8070_s0 + $0xd9] ss:$2 sm:$0xff]  ;;  %v2023_v58 = vcombine.high %v6419_v0, %v6422_v39  ;;  %v5453_v33 = vld [vmem:[%s8070_s0 + $0x58] ss:$2 sm:$0x1] }
  0x55   :  { %v2041_v28 = vrot.slane %v2025_v42, %v5723_v20  ;;  %v6567_v42 = vld [vmem:[%s8070_s0 + $0xb5] ss:$2 sm:$0xff]  ;;  %v3013_v60 = vrot.slane %v2987_v38, %v5723_v20  ;;  %v5457_v0 = vld [vmem:[%s8070_s0 + $0x7c] ss:$2 sm:$0x1] }
  0x56   :  { %v1856_v8 = vrot.slane %v1840_v2, %v5723_v20  ;;  %v2071_v9 = vrot.slane %v2057_v63, %v5723_v20  ;;  %v1872_v2 = vcombine.low %v1863_v6, %v1870_v1  ;;  %v5459_v39 = vld [vmem:[%s8070_s0 + $0x8e] ss:$2 sm:$0x1] }
  0x57   :  { %2115 = vrot.lane.b32.xlu1 %v2021_v37, %s5633_s7  ;;  %2077 = vrot.lane.b32.xlu0 %v1647_v13, %s5633_s7  ;;  %v6480_v37 = vld [vmem:[%s8070_s0 + $0x121] ss:$2 sm:$0xff]  ;;  %v2056_v10 = vcombine.low %v2034_v48, %v2041_v28 }
  0x58   :  { %v6485_v13 = vld [vmem:[%s8070_s0 + $0x133] ss:$2 sm:$0xff] }
  0x59   :  { %v2985_v12 = vcombine.low %v6480_v37, %v6485_v13  ;;  %v2064_v28 = vrot.slane %v2056_v10, %v5723_v20 }
  0x5b   :  { %2073 = vrot.lane.b32.xlu1 %v1646_v49, %s5633_s7  ;;  %2117 = vrot.lane.b32.xlu0 %v2018_v15, %s5633_s7  ;;  %v1839_v49 = vcombine.low %v5461_v22, %v5463_v45  ;;  %v6526_v15 = vld [vmem:[%s8070_s0 + $0x19f] ss:$2 sm:$0xff]  ;;  %v2999_v43 = vrot.slane %v2985_v12, %v5723_v20  ;;  %v2072_v6 = vcombine.low %v2064_v28, %v2071_v9 }
  0x5c   :  { %v6557_v22 = vld [vmem:[%s8070_s0 + $0x91] ss:$2 sm:$0xff]  ;;  %v6663_v9 = vld [vmem:[%s8070_s0 + $0x1] ss:$2 sm:$0xff] }
  0x5d   :  { %v1849_v7 = vrot.slane %v1839_v49, %v5723_v20  ;;  %v6562_v45 = vld [vmem:[%s8070_s0 + $0xa3] ss:$2 sm:$0xff]  ;;  %v5455_v49 = vld [vmem:[%s8070_s0 + $0x6a] ss:$2 sm:$0x1]  ;;  %v3049_v51 = vcombine.low %v2999_v43, %v3013_v60  ;;  %v3050_v50 = vcombine.high %v2999_v43, %v3013_v60  ;;  %v1886_v43 = vrot.slane %v1872_v2, %v5723_v20 }
  0x5e   :  { %v2800_v12 = vcombine.low %v6557_v22, %v6562_v45  ;;  %v6673_v2 = vld [vmem:[%s8070_s0 + $0x25] ss:$2 sm:$0xff] }
  0x5f   :  { %2099 = vrot.lane.b32.xlu1 %v1833_v54, %s5633_s7  ;;  %2097 = vrot.lane.b32.xlu0 %v1836_v40, %s5633_s7  ;;  %v6537_v40 = vrot.slane %v1585_v41, %v5723_v20  ;;  %v2991_v54 = vcombine.low %v6521_v21, %v6526_v15  ;;  %v5449_v41 = vld [vmem:[%s8070_s0 + $0x34] ss:$2 sm:$0x1]  ;;  %v1871_v53 = vcombine.low %v1849_v7, %v1856_v8 }
  0x60   :  { %v1656_v7 = vcombine.low %v5453_v33, %v5455_v49  ;;  %v1657_v8 = vcombine.low %v5457_v0, %v5459_v39  ;;  %v3063_v60 = vrot.slane %v3049_v51, %v5723_v20  ;;  %v1838_v39 = vcombine.high %v6473_v19, %v6490_v55  ;;  %v6682_v51 = vld [vmem:[%s8070_s0 + $0x37] ss:$2 sm:$0xff] }
  0x61   :  { %v3041_v26 = vrot.slane %v2991_v54, %v5723_v20  ;;  %v1652_v48 = vcombine.low %v6537_v40, %v6540_v27  ;;  %v2804_v54 = vcombine.low %v6579_v62, %v6584_v44  ;;  %v1879_v1 = vrot.slane %v1871_v53, %v5723_v20  ;;  %v6668_v53 = vld [vmem:[%s8070_s0 + $0x13] ss:$2 sm:$0xff] }
  0x62   :  { %v1678_v33 = vrot.slane %v1656_v7, %v5723_v20  ;;  %v1685_v49 = vrot.slane %v1657_v8, %v5723_v20  ;;  %v6697_v19 = vld [vmem:[%s8070_s0 + $0x6d] ss:$2 sm:$0xff]  ;;  %v2617_v7 = vcombine.low %v6673_v2, %v6682_v51 }
  0x63   :  { %2121 = vrot.lane.b32.xlu1 %v2019_v14, %s5633_s7  ;;  %2119 = vrot.lane.b32.xlu0 %v2022_v18, %s5633_s7  ;;  %v6594_v14 = vld [vmem:[%s8070_s0 + $0x10f] ss:$2 sm:$0xff]  ;;  %v3027_v18 = vrot.slane %v2989_v46, %v5723_v20  ;;  %v1887_v0 = vcombine.low %v1879_v1, %v1886_v43  ;;  %v6702_v55 = vld [vmem:[%s8070_s0 + $0x7f] ss:$2 sm:$0xff] }
  0x65   :  { %v3053_v38 = vcombine.low %v3027_v18, %v3041_v26  ;;  %v3054_v46 = vcombine.high %v3027_v18, %v3041_v26  ;;  %v6646_v18 = vrot.slane %v3050_v50, %v5723_v20  ;;  %v2814_v26 = vrot.slane %v2800_v12, %v5723_v20  ;;  %v6687_v50 = vld [vmem:[%s8070_s0 + $0x49] ss:$2 sm:$0xff] }
  0x67   :  { %2081 = vrot.lane.b32.xlu1 %v1648_v47, %s5633_s7  ;;  %2079 = vrot.lane.b32.xlu0 %v1651_v36, %s5633_s7  ;;  %v5447_v36 = vld [vmem:[%s8070_s0 + $0x22] ss:$2 sm:$0x1]  ;;  %v5451_v47 = vld [vmem:[%s8070_s0 + $0x46] ss:$2 sm:$0x1] }
  0x68   :  { %v1654_v10 = vcombine.low %v5445_v34, %v5447_v36  ;;  %v1655_v63 = vcombine.low %v5449_v41, %v5451_v47  ;;  %v3091_v36 = vrot.slane %v3053_v38, %v5723_v20  ;;  %v6652_v41 = vrot.slane %v3054_v46, %v5723_v20 }
  0x69   :  { %v2842_v47 = vrot.slane %v2804_v54, %v5723_v20  ;;  %v1653_v46 = vcombine.high %v6537_v40, %v6540_v27 }
  0x6a   :  { %v1671_v28 = vrot.slane %v1655_v63, %v5723_v20  ;;  %v6708_v38 = vcombine.low %v6646_v18, %v6652_v41  ;;  %v2615_v63 = vcombine.low %v6663_v9, %v6668_v53  ;;  %v6722_v40 = vcombine.low %v3063_v60, %v3091_v36 }
  0x6b   :  { %2103 = vrot.lane.b32.xlu1 %v1834_v23, %s5633_s7  ;;  %2101 = vrot.lane.b32.xlu0 %v1837_v32, %s5633_s7  ;;  %v2802_v23 = vcombine.low %v6567_v42, %v6572_v29  ;;  %v2806_v32 = vcombine.low %v6589_v30, %v6594_v14 }
  0x6c   :  { %8136 = vst [vmem:[#allocation20_spill] sm:$0xff] %v6708_v38  ;;  %8137 = vst [vmem:[#allocation21_spill] sm:$0xff] %v6722_v40 }
  0x6d   :  { %v2828_v34 = vrot.slane %v2802_v23, %v5723_v20  ;;  %v6692_v23 = vld [vmem:[%s8070_s0 + $0x5b] ss:$2 sm:$0xff] }
  0x6e   :  { %v2619_v8 = vcombine.low %v6687_v50, %v6692_v23 }
  0x6f   :  { %2085 = vrot.lane.b32.xlu1 %v1649_v52, %s5633_s7  ;;  %2083 = vrot.lane.b32.xlu0 %v1652_v48, %s5633_s7  ;;  %v2856_v52 = vrot.slane %v2806_v32, %v5723_v20  ;;  %v1664_v48 = vrot.slane %v1654_v10, %v5723_v20  ;;  %v2865_v12 = vcombine.high %v2814_v26, %v2828_v34 }
  0x70   :  { %v1687_v10 = vcombine.low %v1678_v33, %v1685_v49  ;;  %v2864_v1 = vcombine.low %v2814_v26, %v2828_v34  ;;  %v2990_v33 = vcombine.high %v6508_v3, %v6516_v61  ;;  %v2992_v49 = vcombine.high %v6521_v21, %v6526_v15 }
  0x71   :  { %v2869_v54 = vcombine.high %v2842_v47, %v2856_v52  ;;  %v1686_v32 = vcombine.low %v1664_v48, %v1671_v28  ;;  %v6725_v27 = vrot.slane %v2865_v12, %v5723_v20  ;;  %v2868_v43 = vcombine.low %v2842_v47, %v2856_v52 }
  0x72   :  { %v2986_v48 = vcombine.high %v6480_v37, %v6485_v13  ;;  %v2988_v28 = vcombine.high %v6498_v25, %v6503_v17  ;;  %v2629_v26 = vrot.slane %v2615_v63, %v5723_v20  ;;  %v2643_v37 = vrot.slane %v2617_v7, %v5723_v20 }
  0x73   :  { %2125 = vrot.lane.b32.xlu1 %v2072_v6, %s5633_s7  ;;  %2123 = vrot.lane.b32.xlu0 %v2023_v58, %s5633_s7  ;;  %v6704_v58 = vcombine.high %v3063_v60, %v3091_v36  ;;  %v2621_v6 = vcombine.low %v6697_v19, %v6702_v55  ;;  %v2920_v60 = vrot.slane %v2869_v54, %v5723_v20 }
  0x74   :  { %v1694_v36 = vrot.slane %v1686_v32, %v5723_v20  ;;  %v2657_v13 = vrot.slane %v2619_v8, %v5723_v20  ;;  %v2878_v17 = vrot.slane %v2864_v1, %v5723_v20  ;;  %v2906_v3 = vrot.slane %v2868_v43, %v5723_v20 }
  0x75   :  { %8135 = vst [vmem:[#allocation19_spill] sm:$0xff] %v6704_v58  ;;  %v2671_v25 = vrot.slane %v2621_v6, %v5723_v20  ;;  %v3006_v61 = vrot.slane %v2986_v48, %v5723_v20  ;;  %v3020_v21 = vrot.slane %v2988_v28, %v5723_v20  ;;  %v3034_v15 = vrot.slane %v2990_v33, %v5723_v20 }
  0x76   :  { %v3048_v34 = vrot.slane %v2992_v49, %v5723_v20  ;;  %v6753_v47 = vcombine.low %v6725_v27, %v2920_v60  ;;  %v6758_v54 = vcombine.low %v2878_v17, %v2906_v3  ;;  %v2680_v32 = vcombine.high %v2629_v26, %v2643_v37 }
  0x77   :  { %2107 = vrot.lane.b32.xlu1 %v1887_v0, %s5633_s7  ;;  %2105 = vrot.lane.b32.xlu0 %v1838_v39, %s5633_s7  ;;  %v1701_v0 = vrot.slane %v1687_v10, %v5723_v20  ;;  %v2679_v39 = vcombine.low %v2629_v26, %v2643_v37  ;;  %v2683_v12 = vcombine.low %v2657_v13, %v2671_v25 }
  0x78   :  { %8138 = vst [vmem:[#allocation22_spill] sm:$0xff] %v6753_v47  ;;  %8139 = vst [vmem:[#allocation23_spill] sm:$0xff] %v6758_v54  ;;  %v2684_v10 = vcombine.high %v2657_v13, %v2671_v25  ;;  %v3051_v63 = vcombine.low %v3006_v61, %v3020_v21  ;;  %v3055_v7 = vcombine.low %v3034_v15, %v3048_v34 }
  0x79   :  { %v1702_v52 = vcombine.low %v1694_v36, %v1701_v0  ;;  %v3052_v8 = vcombine.high %v3006_v61, %v3020_v21  ;;  %v3056_v6 = vcombine.high %v3034_v15, %v3048_v34  ;;  %v2801_v1 = vcombine.high %v6557_v22, %v6562_v45 }
  0x7a   :  { %v2805_v43 = vcombine.high %v6579_v62, %v6584_v44  ;;  %v2807_v48 = vcombine.high %v6589_v30, %v6594_v14  ;;  %v6771_v28 = vcombine.high %v2878_v17, %v2906_v3  ;;  %v2693_v33 = vrot.slane %v2679_v39, %v5723_v20 }
  0x7b   :  { %3210 = vrot.lane.b32.xlu1 %v6704_v58, %s5631_s11  ;;  %3208 = vrot.lane.b32.xlu0 %v6708_v38, %s5631_s11  ;;  %v2721_v22 = vrot.slane %v2683_v12, %v5723_v20  ;;  %v2707_v45 = vrot.slane %v2680_v32, %v5723_v20  ;;  %v3070_v44 = vrot.slane %v3051_v63, %v5723_v20  ;;  %v5542_v63 = vld [vmem:[%s8070_s0 + $0x18b] ss:$2 sm:$0x1] }
  0x7c   :  { %8140 = vst [vmem:[#allocation24_spill] sm:$0xff] %v6771_v28  ;;  %v3098_v30 = vrot.slane %v3055_v7, %v5723_v20  ;;  %v6780_v14 = vrot.slane %v3052_v8, %v5723_v20  ;;  %v6783_v49 = vrot.slane %v3056_v6, %v5723_v20  ;;  %v2821_v36 = vrot.slane %v2801_v1, %v5723_v20  ;;  %v5543_v1 = vld [vmem:[%s8070_s0 + $0x19d] ss:$2 sm:$0x1] }
  0x7d   :  { %v6788_v26 = vrot.slane %v2805_v43, %v5723_v20  ;;  %v6791_v37 = vrot.slane %v2807_v48, %v5723_v20  ;;  %v6797_v13 = vcombine.high %v2693_v33, %v2721_v22  ;;  %v6801_v25 = vcombine.high %v6646_v18, %v6652_v41 }
  0x7e   :  { %v2616_v17 = vcombine.high %v6663_v9, %v6668_v53  ;;  %v2618_v61 = vcombine.high %v6673_v2, %v6682_v51  ;;  %v2620_v21 = vcombine.high %v6687_v50, %v6692_v23  ;;  %v2622_v15 = vcombine.high %v6697_v19, %v6702_v55  ;;  %v5537_v53 = vld [vmem:[%s8070_s0 + $0x131] ss:$2 sm:$0x1]  ;;  %v5538_v2 = vld [vmem:[%s8070_s0 + $0x143] ss:$2 sm:$0x1] }
  0x7f   :  { %2087 = vrot.lane.b32.xlu1 %v1653_v46, %s5633_s7  ;;  %3206 = vrot.lane.b32.xlu0 %v6722_v40, %s5631_s11  ;;  %v2803_v46 = vcombine.high %v6567_v42, %v6572_v29  ;;  %v2735_v42 = vrot.slane %v2684_v10, %v5723_v20  ;;  %8141 = vst [vmem:[#allocation25_spill] sm:$0xff] %v6797_v13  ;;  %8142 = vst [vmem:[#allocation26_spill] sm:$0xff] %v6801_v25  ;;  %v5539_v55 = vld [vmem:[%s8070_s0 + $0x155] ss:$2 sm:$0x1]  ;;  %v8157_v40 = vmov 0.0  }
  0x80   :  { %v6815_v39 = vcombine.low %v3070_v44, %v3098_v30  ;;  %v6818_v18 = vcombine.high %v6725_v27, %v2920_v60  ;;  %v6820_v41 = vcombine.low %v2693_v33, %v2721_v22  ;;  %v6824_v9 = vcombine.low %v6780_v14, %v6783_v49  ;;  %v5540_v27 = vld [vmem:[%s8070_s0 + $0x167] ss:$2 sm:$0x1]  ;;  %v5541_v10 = vld [vmem:[%s8070_s0 + $0x179] ss:$2 sm:$0x1] }
  0x81   :  { %v2835_v0 = vrot.slane %v2803_v46, %v5723_v20  ;;  %v6805_v3 = vcombine.low %v2707_v45, %v2735_v42  ;;  %v2870_v23 = vcombine.low %v6788_v26, %v6791_v37  ;;  %v2871_v12 = vcombine.high %v6788_v26, %v6791_v37  ;;  %v5544_v46 = vld [vmem:[%s8070_s0 + $0x1af] ss:$2 sm:$0x1] }
  0x82   :  { %8144 = vst [vmem:[#allocation28_spill] sm:$0xff] %v6815_v39  ;;  %8145 = vst [vmem:[#allocation29_spill] sm:$0xff] %v6818_v18  ;;  %v6848_v32 = vrot.slane %v2616_v17, %v5723_v20  ;;  %v2650_v7 = vrot.slane %v2618_v61, %v5723_v20  ;;  %v2664_v8 = vrot.slane %v2620_v21, %v5723_v20 }
  0x83   :  { %3190 = vrot.lane.b32.xlu1 %v6753_v47, %s5631_s11  ;;  %2089 = vrot.lane.b32.xlu0 %v1702_v52, %s5633_s7  ;;  %8143 = vst [vmem:[#allocation27_spill] sm:$0xff] %v6805_v3  ;;  %8146 = vst [vmem:[#allocation30_spill] sm:$0xff] %v6820_v41  ;;  %v2866_v50 = vcombine.low %v2821_v36, %v2835_v0  ;;  %v2867_v19 = vcombine.high %v2821_v36, %v2835_v0  ;;  %v5529_v36 = vld [vmem:[%s8070_s0 + $0xa1] ss:$2 sm:$0x1] }
  0x84   :  { %8147 = vst [vmem:[#allocation31_spill] sm:$0xff] %v6824_v9  ;;  %v2678_v6 = vrot.slane %v2622_v15, %v5723_v20  ;;  %v6869_v33 = vcombine.high %v2707_v45, %v2735_v42  ;;  %v6871_v22 = vcombine.high %v3070_v44, %v3098_v30  ;;  %v5530_v0 = vld [vmem:[%s8070_s0 + $0xb3] ss:$2 sm:$0x1]  ;;  %v3123_v42 = vcombine.low %v5541_v10, %v5542_v63 }
  0x85   :  { %v757_v29 = vpop.permute.xlu0 %756  ;;  %v755_v62 = vpop.permute.xlu1 %754  ;;  %v2885_v45 = vrot.slane %v2866_v50, %v5723_v20  ;;  %v5531_v44 = vld [vmem:[%s8070_s0 + $0xc5] ss:$2 sm:$0x1]  ;;  %v5532_v30 = vld [vmem:[%s8070_s0 + $0xd7] ss:$2 sm:$0x1]  ;;  %v2913_v17 = vrot.slane %v2870_v23, %v5723_v20  ;;  %v6893_v61 = vrot.slane %v2867_v19, %v5723_v20  ;;  %v3124_v21 = vcombine.low %v5543_v1, %v5544_v46 }
  0x86   :  { %v789_v60 = vsel %vm772_vm0, %v755_v62, %v757_v29  ;;  %8148 = vst [vmem:[#allocation32_spill] sm:$0xff] %v6869_v33  ;;  %8149 = vst [vmem:[#allocation33_spill] sm:$0xff] %v6871_v22  ;;  %v3122_v62 = vcombine.low %v5539_v55, %v5540_v27  ;;  %v5533_v15 = vld [vmem:[%s8070_s0 + $0xe9] ss:$2 sm:$0x1]  ;;  %v2682_v27 = vcombine.high %v6848_v32, %v2650_v7 }
  0x87   :  { %3188 = vrot.lane.b32.xlu1 %v6758_v54, %s5631_s11  ;;  %3192 = vrot.lane.b32.xlu0 %v6771_v28, %s5631_s11  ;;  %v5535_v50 = vld [vmem:[%s8070_s0 + $0x10d] ss:$2 sm:$0x1]  ;;  %v5536_v23 = vld [vmem:[%s8070_s0 + $0x11f] ss:$2 sm:$0x1]  ;;  %v6928_v1 = vrot.slane %v3123_v42, %v5723_v20  ;;  %v2936_v46 = vcombine.low %v5529_v36, %v5530_v0  ;;  %v6942_v36 = vcombine.high %v2885_v45, %v2913_v17 }
  0x88   :  { %v6922_v10 = vrot.slane %v3122_v62, %v5723_v20  ;;  %v6947_v0 = vld [vmem:[%s8070_s0 + $0x121] ss:$2 sm:$0xff] }
  0x89   :  { %v6813_v34 = vpop.permute.xlu0 %758  ;;  %v739_v52 = vpop.permute.xlu1 %738  ;;  %8152 = vst [vmem:[#allocation36_spill] sm:$0xff] %v6942_v36  ;;  %v7102_v54 = vld [vmem:[%s8070_s0 + $0xc7] ss:$2 sm:$0xff] }
  0x8a   :  { %v790_v51 = vsel %vm772_vm0, %v757_v29, %v6813_v34  ;;  %v3121_v29 = vcombine.low %v5537_v53, %v5538_v2  ;;  %v6904_v53 = vrot.slane %v2871_v12, %v5723_v20  ;;  %v2681_v2 = vcombine.low %v6848_v32, %v2650_v7 }
  0x8b   :  { %851 = vmatprep.subr.mxu0 %v790_v51  ;;  %3174 = vrot.lane.b32.xlu1 %v6797_v13, %s5631_s11  ;;  %v2685_v51 = vcombine.low %v2664_v8, %v2678_v6  ;;  %v3152_v32 = vrot.slane %v3124_v21, %v5723_v20  ;;  %v6968_v21 = vld [vmem:[%s8070_s0 + $0x145] ss:$2 sm:$0xff] }
  0x8c   :  { %3172 = vrot.lane.b32.xlu0 %v6805_v3, %s5631_s11  ;;  %852 = vmatpush1.msra.mxu0 %v789_v60  ;;  %v2686_v60 = vcombine.high %v2664_v8, %v2678_v6  ;;  %v6919_v12 = vrot.slane %v3121_v29, %v5723_v20  ;;  %v2939_v8 = vcombine.low %v5535_v50, %v5536_v23  ;;  %v7097_v3 = vld [vmem:[%s8070_s0 + $0xb5] ss:$2 sm:$0xff] }
  0x8d   :  { %v6867_v43 = vpop.permute.xlu0 %740  ;;  %v737_v48 = vpop.permute.xlu1 %736  ;;  %v6935_v6 = vcombine.low %v2885_v45, %v2913_v17  ;;  %v6939_v29 = vcombine.low %v6893_v61, %v6904_v53  ;;  %v2700_v62 = vrot.slane %v2681_v2, %v5723_v20  ;;  %v6985_v50 = vrot.slane %v2936_v46, %v5723_v20 }
  0x8e   :  { %v782_v26 = vsel %vm772_vm0, %v739_v52, %v6867_v43  ;;  %v781_v37 = vsel %vm772_vm0, %v737_v48, %v739_v52  ;;  %v5534_v52 = vld [vmem:[%s8070_s0 + $0xfb] ss:$2 sm:$0x1]  ;;  %v2937_v48 = vcombine.low %v5531_v44, %v5532_v30  ;;  %v2728_v44 = vrot.slane %v2685_v51, %v5723_v20 }
  0x8f   :  { %853 = vmatprep.subr.mxu0 %v782_v26  ;;  %3214 = vrot.lane.b32.xlu1 %v6815_v39, %s5631_s11  ;;  %v2938_v7 = vcombine.low %v5533_v15, %v5534_v52  ;;  %8150 = vst [vmem:[#allocation34_spill] sm:$0xff] %v6935_v6  ;;  %8151 = vst [vmem:[#allocation35_spill] sm:$0xff] %v6939_v29  ;;  %v6952_v26 = vld [vmem:[%s8070_s0 + $0x133] ss:$2 sm:$0xff]  ;;  %v6958_v30 = vrot.slane %v2682_v27, %v5723_v20 }
  0x90   :  { %3212 = vrot.lane.b32.xlu0 %v6801_v25, %s5631_s11  ;;  %854 = vmatpush1.msra.mxu0 %v781_v37  ;;  %v6961_v45 = vrot.slane %v2686_v60, %v5723_v20  ;;  %v3153_v17 = vcombine.low %v6919_v12, %v6922_v10  ;;  %v6973_v15 = vld [vmem:[%s8070_s0 + $0x157] ss:$2 sm:$0xff]  ;;  %v6988_v23 = vrot.slane %v2937_v48, %v5723_v20  ;;  %v7010_v12 = vld [vmem:[%s8071_s1 + $0x8] sm:$0xff]  ;;  %v7020_v48 = vld [vmem:[%s8070_s0 + $0x11] ss:$2 sm:$0x1] }
  0x91   :  { %v6913_v19 = vpop.permute.xlu0 %720  ;;  %v6915_v55 = vpop.permute.xlu1 %722  ;;  %v6978_v52 = vld [vmem:[%s8070_s0 + $0x169] ss:$2 sm:$0xff]  ;;  %v3154_v10 = vcombine.low %v6928_v1, %v3152_v32  ;;  %v2967_v46 = vrot.slane %v2939_v8, %v5723_v20  ;;  %v7031_v1 = vcombine.high %v6780_v14, %v6783_v49  ;;  %v4330_v32 = vcombine.low %v6947_v0, %v6952_v26 }
  0x92   :  { %v774_v63 = vsel %vm772_vm0, %v6913_v19, %v6915_v55  ;;  %v6993_v27 = vld [vmem:[%s8070_s0 + $0x17b] ss:$2 sm:$0xff]  ;;  %v5523_v8 = vld [vmem:[%s8070_s0 + $0x35] ss:$2 sm:$0x1]  ;;  %v7049_v28 = vcombine.low %v2700_v62, %v2728_v44  ;;  %v7055_v58 = vcombine.high %v6893_v61, %v6904_v53  ;;  %v7072_v61 = vrot.slane %v3153_v17, %v5723_v20 }
  0x93   :  { %3194 = vrot.lane.b32.xlu1 %v6818_v18, %s5631_s11  ;;  %855 = vmatprep.subr.mxu0 %v774_v63  ;;  %v6998_v60 = vld [vmem:[%s8070_s0 + $0x18d] ss:$2 sm:$0xff]  ;;  %v7014_v63 = vrot.slane %v2938_v7, %v5723_v20  ;;  %8153 = vst [vmem:[#allocation37_spill] sm:$0xff] %v7031_v1  ;;  %v4332_v7 = vcombine.low %v6968_v21, %v6973_v15  ;;  %v5526_v14 = vld [vmem:[%s8070_s0 + $0x6b] ss:$2 sm:$0x1] }
  0x94   :  { %3170 = vrot.lane.b32.xlu0 %v6820_v41, %s5631_s11  ;;  %8154 = vst [vmem:[#allocation38_spill] sm:$0xff] %v7049_v28  ;;  %v7051_v18 = vcombine.high %v2700_v62, %v2728_v44  ;;  %v4334_v25 = vcombine.low %v6978_v52, %v6993_v27  ;;  %v5528_v39 = vld [vmem:[%s8070_s0 + $0x8f] ss:$2 sm:$0x1]  ;;  %v7069_v62 = vcombine.low %v6958_v30, %v6961_v45  ;;  %v7079_v44 = vld [vmem:[%s8070_s0 + $0x91] ss:$2 sm:$0xff] }
  0x95   :  { %v761_v37 = vpop.permute.xlu0 %760  ;;  %v6954_v42 = vpop.permute.xlu1 %762  ;;  %v7084_v41 = vld [vmem:[%s8070_s0 + $0xa3] ss:$2 sm:$0xff]  ;;  %v2969_v17 = vcombine.low %v7014_v63, %v2967_v46  ;;  %v4147_v56 = vcombine.low %v7097_v3, %v7102_v54 }
  0x96   :  { %v792_v2 = vsel %vm772_vm0, %v761_v37, %v6954_v42  ;;  %v791_v51 = vsel %vm772_vm0, %v6813_v34, %v761_v37  ;;  %v7003_v34 = vld [vmem:[%s8070_s0 + $0x19f] ss:$2 sm:$0xff]  ;;  %8155 = vst [vmem:[#allocation39_spill] sm:$0xff] %v7051_v18  ;;  %8156 = vst [vmem:[#allocation40_spill] sm:$0xff] %v7069_v62  ;;  %v4145_v31 = vcombine.low %v7079_v44, %v7084_v41 }
  0x97   :  { %3216 = vrot.lane.b32.xlu1 %v6824_v9, %s5631_s11  ;;  %922 = vmatprep.subr.mxu1 %v792_v2  ;;  %v7025_v37 = vld [vmem:[%s8070_s0 + $0x23] ss:$2 sm:$0x1]  ;;  %v5524_v2 = vld [vmem:[%s8070_s0 + $0x47] ss:$2 sm:$0x1]  ;;  %v4336_v53 = vcombine.low %v6998_v60, %v7003_v34 }
  0x98   :  { %3196 = vrot.lane.b32.xlu0 %v6935_v6, %s5631_s11  ;;  %923 = vmatpush1.msra.mxu1 %v791_v51  ;;  %v5525_v51 = vld [vmem:[%s8070_s0 + $0x59] ss:$2 sm:$0x1]  ;;  %v5527_v6 = vld [vmem:[%s8070_s0 + $0x7d] ss:$2 sm:$0x1] }
  0x99   :  { %v743_v49 = vpop.permute.xlu1 %742  ;;  %v719_v13 = vpop.permute.xlu0 %718  ;;  %v7124_v63 = vld [vmem:[%s8070_s0 + $0xeb] ss:$2 sm:$0xff]  ;;  %v2754_v47 = vcombine.low %v5527_v6, %v5528_v39  ;;  %v7145_v57 = vrot.slane %v4336_v53, %v5723_v20 }
  0x9a   :  { %v773_v9 = vsel %vm772_vm0, %v719_v13, %v6913_v19  ;;  %v7089_v13 = vrot.slane %v3154_v10, %v5723_v20  ;;  %v2968_v19 = vcombine.low %v6985_v50, %v6988_v23  ;;  %v7114_v50 = vrot.slane %v4330_v32, %v5723_v20  ;;  %v7129_v46 = vld [vmem:[%s8070_s0 + $0xfd] ss:$2 sm:$0xff] }
  0x9b   :  { %3176 = vrot.lane.b32.xlu1 %v6869_v33, %s5631_s11  ;;  %856 = vmatpush1.msra.mxu0 %v773_v9  ;;  %v7107_v9 = vld [vmem:[%s8070_s0 + $0xd9] ss:$2 sm:$0xff]  ;;  %v7117_v23 = vrot.slane %v4332_v7, %v5723_v20  ;;  %v2751_v10 = vcombine.low %v7020_v48, %v7025_v37  ;;  %v7139_v48 = vrot.slane %v4334_v25, %v5723_v20 }
  0x9c   :  { %3218 = vrot.lane.b32.xlu0 %v6871_v22, %s5631_s11  ;;  %5437 = vmatmul.mubr.msk.f32.vlgmr.msra.gmra.mxu0 %vm821_vm1, %v7010_v12  ;;  %v7134_v32 = vld [vmem:[%s8070_s0 + $0x10f] ss:$2 sm:$0xff]  ;;  %v2752_v37 = vcombine.low %v5523_v8, %v5524_v2  ;;  %v2753_v33 = vcombine.low %v5525_v51, %v5526_v14  ;;  %v783_v25 = vsel %vm772_vm0, %v6867_v43, %v743_v49 }
  0x9d   :  { %v765_v7 = vpop.permute.xlu1 %764  ;;  %v7136_v22 = vpop.permute.xlu0 %744  ;;  %1031 = vmatprep.mubr.f32.mxu0 %v8157_v40  ;;  %v4149_v39 = vcombine.low %v7107_v9, %v7124_v63  ;;  %v4151_v6 = vcombine.low %v7129_v46, %v7134_v32  ;;  %v7162_v8 = vrot.slane %v2968_v19, %v5723_v20  ;;  %v7165_v2 = vrot.slane %v2969_v17, %v5723_v20 }
  0x9e   :  { %v784_v38 = vsel %vm772_vm0, %v743_v49, %v7136_v22  ;;  %v2761_v14 = vrot.slane %v2751_v10, %v5723_v20  ;;  %v2768_v49 = vrot.slane %v2752_v37, %v5723_v20  ;;  %v2775_v53 = vrot.slane %v2753_v33, %v5723_v20  ;;  %v7250_v37 = vld [vmem:[%s8070_s0 + $0x7f] ss:$2 sm:$0xff] }
  0x9f   :  { %3198 = vrot.lane.b32.xlu1 %v6939_v29, %s5631_s11  ;;  %924 = vmatprep.subr.mxu1 %v784_v38  ;;  %v4395_v38 = vcombine.high %v7114_v50, %v7117_v23  ;;  %v4399_v17 = vcombine.high %v7139_v48, %v7145_v57  ;;  %v4173_v29 = vrot.slane %v4147_v56, %v5723_v20 }
  0xa0   :  { %3178 = vrot.lane.b32.xlu0 %v7049_v28, %s5631_s11  ;;  %925 = vmatpush1.msra.mxu1 %v783_v25  ;;  %v2782_v25 = vrot.slane %v2754_v47, %v5723_v20  ;;  %v4159_v28 = vrot.slane %v4145_v31, %v5723_v20  ;;  %v793_v10 = vsel %vm772_vm0, %v6954_v42, %v765_v7  ;;  %v7200_v42 = vld [vmem:[%s8070_s0 + $0x1] ss:$2 sm:$0xff] }
  0xa1   :  { %v725_v43 = vpop.permute.xlu1 %724  ;;  %v7169_v51 = vpop.permute.xlu0 %766  ;;  %v4187_v33 = vrot.slane %v4149_v39, %v5723_v20  ;;  %v4201_v47 = vrot.slane %v4151_v6, %v5723_v20  ;;  %v3169_v31 = vcombine.low %v7072_v61, %v7089_v13  ;;  %v7193_v56 = vcombine.high %v6958_v30, %v6961_v45  ;;  %v7209_v30 = vld [vmem:[%s8070_s0 + $0x13] ss:$2 sm:$0xff]  ;;  %8159 = vst [vmem:[#allocation42_spill] sm:$0xff] %v7250_v37 }
  0xa2   :  { %v794_v19 = vsel %vm772_vm0, %v765_v7, %v7169_v51  ;;  %v2783_v6 = vcombine.low %v2761_v14, %v2768_v49  ;;  %v4398_v61 = vcombine.low %v7139_v48, %v7145_v57  ;;  %v7214_v45 = vld [vmem:[%s8070_s0 + $0x25] ss:$2 sm:$0xff]  ;;  %v7226_v57 = vrot.slane %v4399_v17, %v5723_v20 }
  0xa3   :  { %3180 = vrot.lane.b32.xlu1 %v7069_v62, %s5631_s11  ;;  %993 = vmatprep.subr.mxu0 %v794_v19  ;;  %v2784_v19 = vcombine.low %v2775_v53, %v2782_v25  ;;  %v7219_v13 = vld [vmem:[%s8070_s0 + $0x37] ss:$2 sm:$0xff]  ;;  %v4209_v48 = vcombine.low %v4159_v28, %v4173_v29  ;;  %v775_v49 = vsel %vm772_vm0, %v6915_v55, %v725_v43 }
  0xa4   :  { %3200 = vrot.lane.b32.xlu0 %v6942_v36, %s5631_s11  ;;  %994 = vmatpush1.msra.mxu0 %v793_v10  ;;  %v4394_v10 = vcombine.low %v7114_v50, %v7117_v23  ;;  %v7223_v23 = vrot.slane %v4395_v38, %v5723_v20  ;;  %v7231_v14 = vld [vmem:[%s8070_s0 + $0x49] ss:$2 sm:$0xff]  ;;  %v4213_v53 = vcombine.low %v4187_v33, %v4201_v47 }
  0xa5   :  { %v747_v7 = vpop.permute.xlu1 %746  ;;  %v727_v39 = vpop.permute.xlu0 %726  ;;  %v4210_v25 = vcombine.high %v4159_v28, %v4173_v29  ;;  %v7240_v38 = vld [vmem:[%s8070_s0 + $0x5b] ss:$2 sm:$0xff]  ;;  %v4214_v28 = vcombine.high %v4187_v33, %v4201_v47  ;;  %v3960_v55 = vcombine.low %v7200_v42, %v7209_v30  ;;  %v3962_v29 = vcombine.low %v7214_v45, %v7219_v13 }
  0xa6   :  { %v776_v50 = vsel %vm772_vm0, %v725_v43, %v727_v39  ;;  %v7245_v17 = vld [vmem:[%s8070_s0 + $0x6d] ss:$2 sm:$0xff]  ;;  %v2791_v36 = vrot.slane %v2783_v6, %v5723_v20  ;;  %v7268_v33 = vrot.slane %v4398_v61, %v5723_v20  ;;  %v3964_v6 = vcombine.low %v7231_v14, %v7240_v38 }
  0xa7   :  { %3220 = vrot.lane.b32.xlu1 %v7031_v1, %s5631_s11  ;;  %926 = vmatprep.subr.mxu1 %v776_v50  ;;  %8158 = vst [vmem:[#allocation41_spill] sm:$0xff] %v7245_v17  ;;  %v2798_v1 = vrot.slane %v2784_v19, %v5723_v20  ;;  %v3966_v19 = vcombine.low %v7245_v17, %v7250_v37 }
  0xa8   :  { %3182 = vrot.lane.b32.xlu0 %v7051_v18, %s5631_s11  ;;  %927 = vmatpush1.msra.mxu1 %v775_v49  ;;  %v7265_v18 = vrot.slane %v4394_v10, %v5723_v20  ;;  %v7273_v49 = vrot.slane %v4209_v48, %v5723_v20  ;;  %v785_v10 = vsel %vm772_vm0, %v7136_v22, %v747_v7 }
  0xa9   :  { %v729_v43 = vpop.permute.xlu1 %728  ;;  %v7258_v50 = vpop.permute.xlu0 %748  ;;  %5438 = vmatmul.mubr.msk.f32.vlgmr.msra.gmra.mxu1 %vm821_vm1, %v7010_v12  ;;  %v7285_v61 = vrot.slane %v4213_v53, %v5723_v20  ;;  %v7288_v48 = vrot.slane %v4210_v25, %v5723_v20  ;;  %v7292_v62 = vrot.slane %v4214_v28, %v5723_v20  ;;  %v3974_v17 = vrot.slane %v3960_v55, %v5723_v20 }
  0xaa   :  { %v786_v47 = vsel %vm772_vm0, %v747_v7, %v7258_v50  ;;  %1102 = vmatprep.mubr.f32.mxu1 %v8157_v40  ;;  %v3988_v22 = vrot.slane %v3962_v29, %v5723_v20  ;;  %v4462_v53 = vcombine.low %v7223_v23, %v7226_v57  ;;  %v7305_v28 = vrot.slane %v3964_v6, %v5723_v20 }
  0xab   :  { %3202 = vrot.lane.b32.xlu1 %v7055_v58, %s5631_s11  ;;  %995 = vmatprep.subr.mxu0 %v786_v47  ;;  %v2799_v47 = vcombine.low %v2791_v36, %v2798_v1  ;;  %v7308_v55 = vrot.slane %v3966_v19, %v5723_v20  ;;  %v777_v29 = vsel %vm772_vm0, %v727_v39, %v729_v43 }
  0xac   :  { %3222 = vrot.lane.b32.xlu0 %v3169_v31, %s5631_s11  ;;  %996 = vmatpush1.msra.mxu0 %v785_v10  ;;  %v4458_v31 = vcombine.low %v7265_v18, %v7268_v33  ;;  %v4459_v36 = vcombine.high %v7265_v18, %v7268_v33  ;;  %v4463_v1 = vcombine.high %v7223_v23, %v7226_v57 }
  0xad   :  { %v769_v7 = vpop.permute.xlu1 %768  ;;  %v7296_v37 = vpop.permute.xlu0 %730  ;;  %v8160_v6 = vcombine.low %v7162_v8, %v7165_v2  ;;  %v4274_v19 = vcombine.high %v7273_v49, %v7285_v61  ;;  %v4277_v39 = vcombine.low %v7288_v48, %v7292_v62  ;;  %v4024_v18 = vcombine.low %v3974_v17, %v3988_v22 }
  0xae   :  { %v778_v25 = vsel %vm772_vm0, %v729_v43, %v7296_v37  ;;  %v4025_v43 = vcombine.high %v3974_v17, %v3988_v22  ;;  %v4331_v8 = vcombine.high %v6947_v0, %v6952_v26  ;;  %v4333_v2 = vcombine.high %v6968_v21, %v6973_v15 }
  0xaf   :  { %3184 = vrot.lane.b32.xlu1 %v7193_v56, %s5631_s11  ;;  %997 = vmatprep.subr.mxu0 %v778_v25  ;;  %v795_v17 = vsel %vm772_vm0, %v7169_v51, %v769_v7  ;;  %v4337_v0 = vcombine.high %v6998_v60, %v7003_v34  ;;  %v4273_v26 = vcombine.low %v7273_v49, %v7285_v61 }
  0xb0   :  { %3204 = vrot.lane.b32.xlu0 %v8160_v6, %s5631_s11  ;;  %998 = vmatpush1.msra.mxu0 %v777_v29  ;;  %v4029_v29 = vcombine.high %v7305_v28, %v7308_v55  ;;  %v4148_v21 = vcombine.high %v7097_v3, %v7102_v54  ;;  %v4150_v15 = vcombine.high %v7107_v9, %v7124_v63  ;;  %v7379_v63 = vld [vmem:[%s8071_s1] sm:$0xff] }
  0xb1   :  { %v751_v10 = vpop.permute.xlu1 %750  ;;  %v771_v25 = vpop.permute.xlu0 %770  ;;  %1162 = vmatprep.subr.mxu0 %v5824_v4  ;;  %5439 = vmatmul.mubr.msk.f32.vlgmr.msra.gmra.mxu0 %vm821_vm1, %v7010_v12  ;;  %v4335_v4 = vcombine.high %v6978_v52, %v6993_v27  ;;  %v7355_v60 = vrot.slane %v4025_v43, %v5723_v20  ;;  %v7360_v34 = vrot.slane %v4024_v18, %v5723_v20  ;;  %v8163_v43 = vld [vmem:[#allocation6_spill] sm:$0xff]  ;;  %v8165_v18 = vld [vmem:[#allocation8_spill] sm:$0xff] }
  0xb2   :  { %v796_v33 = vsel %vm772_vm0, %v769_v7, %v771_v25  ;;  %1163 = vmatpush1.msra.mxu0 %v5826_v5  ;;  %1200 = vmatprep.mubr.f32.mxu0 %v8157_v40  ;;  %v4146_v5 = vcombine.high %v7079_v44, %v7084_v41  ;;  %v4028_v41 = vcombine.low %v7305_v28, %v7308_v55  ;;  %v8161_v55 = vld [vmem:[#allocation42_spill] sm:$0xff] }
  0xb3   :  { %4553 = vrot.lane.b32.xlu1 %v4462_v53, %s5633_s7  ;;  %1064 = vmatprep.subr.mxu1 %v796_v33  ;;  %v4152_v44 = vcombine.high %v7129_v46, %v7134_v32  ;;  %v7367_v3 = vrot.slane %v4029_v29, %v5723_v20  ;;  %v7373_v9 = vrot.slane %v4333_v2, %v5723_v20 }
  0xb4   :  { %3186 = vrot.lane.b32.xlu0 %v2799_v47, %s5631_s11  ;;  %1065 = vmatpush1.msra.mxu1 %v795_v17  ;;  %v7385_v46 = vrot.slane %v4337_v0, %v5723_v20  ;;  %v7388_v32 = vrot.slane %v4146_v5, %v5723_v20  ;;  %v787_v51 = vsel %vm772_vm0, %v7258_v50, %v751_v10  ;;  %v8167_v5 = vld [vmem:[#allocation12_spill] sm:$0xff] }
  0xb5   :  { %v733_v52 = vpop.permute.xlu1 %732  ;;  %1164 = vmatprep.subr.mxu0 %v5847_v16  ;;  %v753_v27 = vpop.permute.xlu0 %752  ;;  %v7370_v16 = vrot.slane %v4331_v8, %v5723_v20  ;;  %v7395_v22 = vrot.slane %v4148_v21, %v5723_v20  ;;  %v7398_v7 = vrot.slane %v4150_v15, %v5723_v20  ;;  %v3961_v50 = vcombine.high %v7200_v42, %v7209_v30 }
  0xb6   :  { %1165 = vmatpush1.msra.mxu0 %v5859_v35  ;;  %v788_v54 = vsel %vm772_vm0, %v751_v10, %v753_v27  ;;  %v7382_v35 = vrot.slane %v4335_v4, %v5723_v20  ;;  %v4092_v42 = vcombine.low %v7355_v60, %v7367_v3  ;;  %v8166_v4 = vld [vmem:[#allocation14_spill] sm:$0xff]  ;;  %v4093_v23 = vcombine.high %v7355_v60, %v7367_v3 }
  0xb7   :  { %4551 = vrot.lane.b32.xlu1 %v4458_v31, %s5633_s7  ;;  %1066 = vmatprep.subr.mxu1 %v788_v54  ;;  %v7402_v31 = vrot.slane %v4152_v44, %v5723_v20  ;;  %v7441_v25 = vrot.slane %v3961_v50, %v5723_v20  ;;  %v8168_v44 = vld [vmem:[#allocation5_spill] sm:$0xff]  ;;  %v7492_v54 = vld [vmem:[%s8070_s0 + $0x131] ss:$2 sm:$0x1]  ;;  %v4278_v50 = vcombine.high %v7288_v48, %v7292_v62 }
  0xb8   :  { %4555 = vrot.lane.b32.xlu0 %v4459_v36, %s5633_s7  ;;  %1166 = vmatprep.subr.mxu0 %v5890_v24  ;;  %v3963_v24 = vcombine.high %v7214_v45, %v7219_v13  ;;  %v8162_v36 = vld [vmem:[#allocation41_spill] sm:$0xff]  ;;  %v4400_v30 = vcombine.low %v7382_v35, %v7385_v46  ;;  %v779_v45 = vsel %vm772_vm0, %v7296_v37, %v733_v52 }
  0xb9   :  { %1067 = vmatpush1.msra.mxu1 %v787_v51  ;;  %1167 = vmatpush1.msra.mxu0 %v5936_v59  ;;  %v2112_v53 = vpop.permute.xlu1 %2111  ;;  %v735_v47 = vpop.permute.xlu0 %734  ;;  %v3965_v59 = vcombine.high %v7231_v14, %v7240_v38  ;;  %v3967_v6 = vcombine.high %v8162_v36, %v8161_v55  ;;  %v7431_v13 = vrot.slane %v4028_v41, %v5723_v20  ;;  %v8164_v38 = vld [vmem:[#allocation11_spill] sm:$0xff]  ;;  %v5588_v51 = vld [vmem:[%s8070_s0 + $0x143] ss:$2 sm:$0x1] }
  0xba   :  { %1304 = vmatprep.subr.mxu0 %v5960_v11  ;;  %5441 = vmatmul.mubr.msk.f32.vlgmr.msra.gmra.mxu0 %vm821_vm1, %v7379_v63  ;;  %v780_v28 = vsel %vm772_vm0, %v733_v52, %v735_v47  ;;  %v4396_v11 = vcombine.low %v7370_v16, %v7373_v9  ;;  %v4211_v14 = vcombine.low %v7388_v32, %v7395_v22  ;;  %v5594_v48 = vld [vmem:[%s8070_s0 + $0x179] ss:$2 sm:$0x1] }
  0xbb   :  { %1305 = vmatpush1.msra.mxu0 %v8163_v43  ;;  %4537 = vrot.lane.b32.xlu1 %v4274_v19, %s5633_s7  ;;  %v4215_v37 = vcombine.low %v7398_v7, %v7402_v31  ;;  %v7451_v2 = vrot.slane %v3965_v59, %v5723_v20  ;;  %v7454_v33 = vrot.slane %v3967_v6, %v5723_v20  ;;  %v5598_v6 = vld [vmem:[%s8070_s0 + $0x19d] ss:$2 sm:$0x1]  ;;  %v5600_v43 = vld [vmem:[%s8070_s0 + $0x1af] ss:$2 sm:$0x1] }
  0xbc   :  { %4535 = vrot.lane.b32.xlu0 %v4277_v39, %s5633_s7  ;;  %1068 = vmatprep.subr.mxu1 %v780_v28  ;;  %v7444_v39 = vrot.slane %v3963_v24, %v5723_v20  ;;  %v7460_v17 = vrot.slane %v4396_v11, %v5723_v20  ;;  %v7463_v0 = vrot.slane %v4400_v30, %v5723_v20  ;;  %v5590_v24 = vld [vmem:[%s8070_s0 + $0x155] ss:$2 sm:$0x1]  ;;  %v5592_v28 = vld [vmem:[%s8070_s0 + $0x167] ss:$2 sm:$0x1] }
  0xbd   :  { %1306 = vmatprep.subr.mxu0 %v8164_v38  ;;  %1069 = vmatpush1.msra.mxu1 %v779_v45  ;;  %v2110_v19 = vpop.permute.xlu1 %2109  ;;  %v7436_v10 = vpop.permute.xlu0 %2113  ;;  %v4089_v21 = vcombine.high %v7360_v34, %v7431_v13  ;;  %v7477_v27 = vrot.slane %v4211_v14, %v5723_v20  ;;  %v7480_v41 = vrot.slane %v4215_v37, %v5723_v20  ;;  %v5572_v14 = vld [vmem:[%s8070_s0 + $0xb3] ss:$2 sm:$0x1]  ;;  %v8172_v38 = vld [vmem:[#allocation9_spill] sm:$0xff] }
  0xbe   :  { %1307 = vmatpush1.msra.mxu0 %v8165_v18  ;;  %1342 = vmatprep.mubr.f32.mxu0 %v8157_v40  ;;  %v2145_v8 = vsel %vm2127_vm2, %v2112_v53, %v7436_v10  ;;  %v2144_v29 = vsel %vm2127_vm2, %v2110_v19, %v2112_v53  ;;  %v4026_v61 = vcombine.low %v7441_v25, %v7444_v39 }
  0xbf   :  { %1308 = vmatprep.subr.mxu0 %v8166_v4  ;;  %4517 = vrot.lane.b32.xlu1 %v4092_v42, %s5633_s7  ;;  %v4088_v53 = vcombine.low %v7360_v34, %v7431_v13  ;;  %v4460_v47 = vcombine.low %v7460_v17, %v7463_v0  ;;  %v4461_v57 = vcombine.high %v7460_v17, %v7463_v0  ;;  %v8169_v34 = vld [vmem:[#allocation2_spill] sm:$0xff]  ;;  %v8170_v42 = vld [vmem:[#allocation7_spill] sm:$0xff]  ;;  %v8173_v4 = vld [vmem:[#allocation4_spill] sm:$0xff] }
  0xc0   :  { %1309 = vmatpush1.msra.mxu0 %v8167_v5  ;;  %4533 = vrot.lane.b32.xlu0 %v4273_v26, %s5633_s7  ;;  %v4030_v26 = vcombine.low %v7451_v2, %v7454_v33  ;;  %v4397_v62 = vcombine.high %v7370_v16, %v7373_v9  ;;  %v4275_v36 = vcombine.low %v7477_v27, %v7480_v41  ;;  %v7561_v13 = vld [vmem:[%s8070_s0 + $0xa1] ss:$2 sm:$0x1] }
  0xc1   :  { %2205 = vmatprep.subr.mxu0 %v2145_v8  ;;  %5443 = vmatmul.mubr.msk.f32.vlgmr.msra.gmra.mxu0 %vm821_vm1, %v7379_v63  ;;  %v7474_v15 = vpop.permute.xlu1 %2095  ;;  %v2094_v52 = vpop.permute.xlu0 %2093  ;;  %v4401_v16 = vcombine.high %v7382_v35, %v7385_v46  ;;  %v4212_v9 = vcombine.high %v7388_v32, %v7395_v22  ;;  %v7547_v30 = vrot.slane %v4026_v61, %v5723_v20  ;;  %v8171_v46 = vld [vmem:[#allocation3_spill] sm:$0xff]  ;;  %v5574_v8 = vld [vmem:[%s8070_s0 + $0xc5] ss:$2 sm:$0x1] }
  0xc2   :  { %2206 = vmatpush1.msra.mxu0 %v2144_v29  ;;  %1233 = vmatprep.subr.mxu1 %v8168_v44  ;;  %v2137_v49 = vsel %vm2127_vm2, %v2094_v52, %v7474_v15  ;;  %v7550_v35 = vrot.slane %v4030_v26, %v5723_v20  ;;  %v4276_v32 = vcombine.high %v7477_v27, %v7480_v41  ;;  %v5576_v29 = vld [vmem:[%s8070_s0 + $0xd7] ss:$2 sm:$0x1]  ;;  %v5578_v61 = vld [vmem:[%s8070_s0 + $0xe9] ss:$2 sm:$0x1] }
  0xc3   :  { %4557 = vrot.lane.b32.xlu1 %v4463_v1, %s5633_s7  ;;  %2207 = vmatprep.subr.mxu0 %v2137_v49  ;;  %v5596_v1 = vld [vmem:[%s8070_s0 + $0x18b] ss:$2 sm:$0x1]  ;;  %v4466_v22 = vcombine.low %v7492_v54, %v5588_v51  ;;  %v4467_v45 = vcombine.low %v5590_v24, %v5592_v28  ;;  %v7569_v19 = vrot.slane %v4397_v62, %v5723_v20  ;;  %v5580_v26 = vld [vmem:[%s8070_s0 + $0xfb] ss:$2 sm:$0x1] }
  0xc4   :  { %4519 = vrot.lane.b32.xlu0 %v4089_v21, %s5633_s7  ;;  %5440 = vmatmul.mubr.msk.f32.vlgmr.msra.gmra.mxu1 %vm821_vm1, %v7010_v12  ;;  %v4468_v37 = vcombine.low %v5594_v48, %v5596_v1  ;;  %v4469_v18 = vcombine.low %v5598_v6, %v5600_v43  ;;  %v4216_v44 = vcombine.high %v7398_v7, %v7402_v31  ;;  %v8174_v54 = vld [vmem:[#allocation15_spill] sm:$0xff]  ;;  %v8175_v24 = vld [vmem:[#allocation10_spill] sm:$0xff]  ;;  %v8176_v1 = vld [vmem:[#allocation17_spill] sm:$0xff] }
  0xc5   :  { %1234 = vmatpush1.msra.mxu1 %v8169_v34  ;;  %v7529_v59 = vpop.permute.xlu1 %2075  ;;  %v2092_v55 = vpop.permute.xlu0 %2091  ;;  %1271 = vmatprep.mubr.f32.mxu1 %v8157_v40  ;;  %v7586_v49 = vrot.slane %v4212_v9, %v5723_v20  ;;  %v4090_v31 = vcombine.low %v7547_v30, %v7550_v35  ;;  %v4027_v51 = vcombine.high %v7441_v25, %v7444_v39  ;;  %v8177_v9 = vld [vmem:[#allocation13_spill] sm:$0xff]  ;;  %v7627_v43 = vld [vmem:[%s8071_s1 + $0x10] sm:$0xff] }
  0xc6   :  { %1235 = vmatprep.subr.mxu1 %v8170_v42  ;;  %v2136_v11 = vsel %vm2127_vm2, %v2092_v55, %v2094_v52  ;;  %2243 = vmatprep.mubr.f32.mxu0 %v8157_v40  ;;  %v7581_v52 = vrot.slane %v4401_v16, %v5723_v20  ;;  %v7613_v28 = vrot.slane %v4466_v22, %v5723_v20  ;;  %v5556_v22 = vld [vmem:[%s8070_s0 + $0x23] ss:$2 sm:$0x1] }
  0xc7   :  { %1236 = vmatpush1.msra.mxu1 %v8171_v46  ;;  %4515 = vrot.lane.b32.xlu1 %v4088_v53, %s5633_s7  ;;  %v5582_v53 = vld [vmem:[%s8070_s0 + $0x10d] ss:$2 sm:$0x1]  ;;  %v7616_v62 = vrot.slane %v4467_v45, %v5723_v20  ;;  %v4281_v48 = vcombine.low %v7561_v13, %v5572_v14  ;;  %v4490_v34 = vrot.slane %v4468_v37, %v5723_v20  ;;  %v5554_v46 = vld [vmem:[%s8070_s0 + $0x11] ss:$2 sm:$0x1] }
  0xc8   :  { %4559 = vrot.lane.b32.xlu0 %v4460_v47, %s5633_s7  ;;  %1237 = vmatprep.subr.mxu1 %v8172_v38  ;;  %v5584_v47 = vld [vmem:[%s8070_s0 + $0x11f] ss:$2 sm:$0x1]  ;;  %v4497_v55 = vrot.slane %v4469_v18, %v5723_v20  ;;  %v4282_v16 = vcombine.low %v5574_v8, %v5576_v29  ;;  %v4283_v42 = vcombine.low %v5578_v61, %v5580_v26  ;;  %v8178_v13 = vld [vmem:[#allocation18_spill] sm:$0xff]  ;;  %v8179_v37 = vld [vmem:[#allocation16_spill] sm:$0xff] }
  0xc9   :  { %2208 = vmatpush1.msra.mxu0 %v2136_v11  ;;  %1238 = vmatpush1.msra.mxu1 %v8173_v4  ;;  %v2116_v5 = vpop.permute.xlu1 %2115  ;;  %v7578_v21 = vpop.permute.xlu0 %2077  ;;  %v4284_v11 = vcombine.low %v5582_v53, %v5584_v47  ;;  %v5560_v38 = vld [vmem:[%s8070_s0 + $0x47] ss:$2 sm:$0x1]  ;;  %v4091_v18 = vcombine.high %v7547_v30, %v7550_v35  ;;  %v4498_v8 = vcombine.low %v7613_v28, %v7616_v62  ;;  %v5562_v29 = vld [vmem:[%s8070_s0 + $0x59] ss:$2 sm:$0x1] }
  0xca   :  { %1375 = vmatprep.subr.mxu1 %v8174_v54  ;;  %5442 = vmatmul.mubr.msk.f32.vlgmr.msra.gmra.mxu1 %vm821_vm1, %v7379_v63  ;;  %v2129_v7 = vsel %vm2127_vm2, %v7529_v59, %v7578_v21  ;;  %v5564_v4 = vld [vmem:[%s8070_s0 + $0x6b] ss:$2 sm:$0x1]  ;;  %v4291_v30 = vrot.slane %v4281_v48, %v5723_v20  ;;  %v4298_v35 = vrot.slane %v4282_v16, %v5723_v20  ;;  %v5566_v61 = vld [vmem:[%s8070_s0 + $0x7d] ss:$2 sm:$0x1] }
  0xcb   :  { %1376 = vmatpush1.msra.mxu1 %v8175_v24  ;;  %4541 = vrot.lane.b32.xlu1 %v4275_v36, %s5633_s7  ;;  %v5568_v26 = vld [vmem:[%s8070_s0 + $0x8f] ss:$2 sm:$0x1]  ;;  %v2146_v54 = vsel %vm2127_vm2, %v7436_v10, %v2116_v5  ;;  %v4096_v10 = vcombine.low %v5554_v46, %v5556_v22  ;;  %v4098_v47 = vcombine.low %v5562_v29, %v5564_v4 }
  0xcc   :  { %4539 = vrot.lane.b32.xlu0 %v4278_v50, %s5633_s7  ;;  %1377 = vmatprep.subr.mxu1 %v8176_v1  ;;  %v4031_v50 = vcombine.high %v7451_v2, %v7454_v33  ;;  %v4464_v2 = vcombine.low %v7569_v19, %v7581_v52  ;;  %v5558_v33 = vld [vmem:[%s8070_s0 + $0x35] ss:$2 sm:$0x1]  ;;  %v4099_v24 = vcombine.low %v5566_v61, %v5568_v26 }
  0xcd   :  { %2209 = vmatprep.subr.mxu0 %v2129_v7  ;;  %1378 = vmatpush1.msra.mxu1 %v8177_v9  ;;  %v2074_v36 = vpop.permute.xlu1 %2073  ;;  %v2118_v6 = vpop.permute.xlu0 %2117  ;;  %v4312_v7 = vrot.slane %v4284_v11, %v5723_v20  ;;  %v7699_v28 = vrot.slane %v4027_v51, %v5723_v20  ;;  %v4313_v1 = vcombine.low %v4291_v30, %v4298_v35 }
  0xce   :  { %v2128_v45 = vsel %vm2127_vm2, %v2074_v36, %v7529_v59  ;;  %1379 = vmatprep.subr.mxu1 %v8178_v13  ;;  %1413 = vmatprep.mubr.f32.mxu1 %v8157_v40  ;;  %v2147_v14 = vsel %vm2127_vm2, %v2116_v5, %v2118_v6  ;;  %v7653_v59 = vrot.slane %v4216_v44, %v5723_v20 }
  0xcf   :  { %1380 = vmatpush1.msra.mxu1 %v8179_v37  ;;  %4523 = vrot.lane.b32.xlu1 %v4090_v31, %s5633_s7  ;;  %v4499_v44 = vcombine.low %v4490_v34, %v4497_v55  ;;  %v4097_v5 = vcombine.low %v5558_v33, %v5560_v38  ;;  %v7702_v62 = vrot.slane %v4031_v50, %v5723_v20 }
  0xd0   :  { %4521 = vrot.lane.b32.xlu0 %v4093_v23, %s5633_s7  ;;  %2210 = vmatpush1.msra.mxu0 %v2128_v45  ;;  %v4305_v23 = vrot.slane %v4283_v42, %v5723_v20  ;;  %v4106_v51 = vrot.slane %v4096_v10, %v5723_v20  ;;  %v4120_v16 = vrot.slane %v4098_v47, %v5723_v20 }
  0xd1   :  { %2276 = vmatprep.subr.mxu1 %v2147_v14  ;;  %5444 = vmatmul.mubr.msk.f32.vlgmr.msra.gmra.mxu1 %vm821_vm1, %v7379_v63  ;;  %v2100_v60 = vpop.permute.xlu1 %2099  ;;  %v2098_v3 = vpop.permute.xlu0 %2097  ;;  %v4513_v48 = vrot.slane %v4499_v44, %v5723_v20  ;;  %v4113_v55 = vrot.slane %v4097_v5, %v5723_v20  ;;  %v4127_v9 = vrot.slane %v4099_v24, %v5723_v20 }
  0xd2   :  { %2277 = vmatpush1.msra.mxu1 %v2146_v54  ;;  %v2138_v31 = vsel %vm2127_vm2, %v7474_v15, %v2098_v3  ;;  %v2139_v53 = vsel %vm2127_vm2, %v2098_v3, %v2100_v60  ;;  %5493 = vmatmul.mubr.msk.f32.vlgmr.msra.gmra.mxu0 %vm821_vm1, %v7627_v43  ;;  %v4279_v15 = vcombine.low %v7586_v49, %v7653_v59 }
  0xd3   :  { %4563 = vrot.lane.b32.xlu1 %v4461_v57, %s5633_s7  ;;  %2278 = vmatprep.subr.mxu1 %v2139_v53  ;;  %v4506_v57 = vrot.slane %v4498_v8, %v5723_v20  ;;  %v4314_v39 = vcombine.low %v4305_v23, %v4312_v7  ;;  %v4094_v36 = vcombine.low %v7699_v28, %v7702_v62 }
  0xd4   :  { %4561 = vrot.lane.b32.xlu0 %v4464_v2, %s5633_s7  ;;  %2279 = vmatpush1.msra.mxu1 %v2138_v31  ;;  %v4128_v46 = vcombine.low %v4106_v51, %v4113_v55  ;;  %v4129_v22 = vcombine.low %v4120_v16, %v4127_v9  ;;  %v4465_v45 = vcombine.high %v7569_v19, %v7581_v52 }
  0xd5   :  { %v2122_v17 = vpop.permute.xlu1 %2121  ;;  %v2120_v0 = vpop.permute.xlu0 %2119  ;;  %2314 = vmatprep.mubr.f32.mxu1 %v8157_v40  ;;  %2385 = vmatprep.mubr.f32.mxu0 %v8157_v40  ;;  %v4514_v41 = vcombine.low %v4506_v57, %v4513_v48  ;;  %v4328_v11 = vrot.slane %v4314_v39, %v5723_v20  ;;  %v4280_v19 = vcombine.high %v7586_v49, %v7653_v59 }
  0xd6   :  { %v2148_v34 = vsel %vm2127_vm2, %v2118_v6, %v2120_v0  ;;  %v2149_v25 = vsel %vm2127_vm2, %v2120_v0, %v2122_v17  ;;  %v4136_v38 = vrot.slane %v4128_v46, %v5723_v20  ;;  %v4143_v37 = vrot.slane %v4129_v22, %v5723_v20 }
  0xd7   :  { %4545 = vrot.lane.b32.xlu1 %v4276_v32, %s5633_s7  ;;  %2347 = vmatprep.subr.mxu0 %v2149_v25  ;;  %v4321_v32 = vrot.slane %v4313_v1, %v5723_v20  ;;  %v4095_v44 = vcombine.high %v7699_v28, %v7702_v62 }
  0xd8   :  { %4543 = vrot.lane.b32.xlu0 %v4279_v15, %s5633_s7  ;;  %2348 = vmatpush1.msra.mxu0 %v2148_v34  ;;  %v4144_v4 = vcombine.low %v4136_v38, %v4143_v37 }
  0xd9   :  { %v2082_v6 = vpop.permute.xlu1 %2081  ;;  %v2080_v50 = vpop.permute.xlu0 %2079  ;;  %v4329_v33 = vcombine.low %v4321_v32, %v4328_v11 }
  0xda   :  { %v2130_v42 = vsel %vm2127_vm2, %v7578_v21, %v2080_v50  ;;  %v2131_v27 = vsel %vm2127_vm2, %v2080_v50, %v2082_v6 }
  0xdb   :  { %4527 = vrot.lane.b32.xlu1 %v4091_v18, %s5633_s7  ;;  %2280 = vmatprep.subr.mxu1 %v2131_v27 }
  0xdc   :  { %4525 = vrot.lane.b32.xlu0 %v4094_v36, %s5633_s7  ;;  %2281 = vmatpush1.msra.mxu1 %v2130_v42 }
  0xdd   :  { %v2104_v13 = vpop.permute.xlu1 %2103  ;;  %v2102_v21 = vpop.permute.xlu0 %2101  ;;  %5494 = vmatmul.mubr.msk.f32.vlgmr.msra.gmra.mxu1 %vm821_vm1, %v7627_v43 }
  0xde   :  { %v2140_v14 = vsel %vm2127_vm2, %v2100_v60, %v2102_v21  ;;  %v2141_v2 = vsel %vm2127_vm2, %v2102_v21, %v2104_v13  ;;  %2456 = vmatprep.mubr.f32.mxu1 %v8157_v40 }
  0xdf   :  { %4567 = vrot.lane.b32.xlu1 %v4514_v41, %s5633_s7  ;;  %2349 = vmatprep.subr.mxu0 %v2141_v2 }
  0xe0   :  { %4565 = vrot.lane.b32.xlu0 %v4465_v45, %s5633_s7  ;;  %2350 = vmatpush1.msra.mxu0 %v2140_v14 }
  0xe1   :  { %v2086_v52 = vpop.permute.xlu1 %2085  ;;  %v2084_v18 = vpop.permute.xlu0 %2083 }
  0xe2   :  { %v2132_v8 = vsel %vm2127_vm2, %v2082_v6, %v2084_v18  ;;  %v2133_v29 = vsel %vm2127_vm2, %v2084_v18, %v2086_v52 }
  0xe3   :  { %4549 = vrot.lane.b32.xlu1 %v4329_v33, %s5633_s7  ;;  %2351 = vmatprep.subr.mxu0 %v2133_v29  ;;  %v8180_v29 = vld [vmem:[#allocation20_spill] sm:$0xff] }
  0xe4   :  { %4547 = vrot.lane.b32.xlu0 %v4280_v19, %s5633_s7  ;;  %2352 = vmatpush1.msra.mxu0 %v2132_v8 }
  0xe5   :  { %v2126_v30 = vpop.permute.xlu1 %2125  ;;  %v2124_v35 = vpop.permute.xlu0 %2123  ;;  %5495 = vmatmul.mubr.msk.f32.vlgmr.msra.gmra.mxu0 %vm821_vm1, %v7627_v43 }
  0xe6   :  { %v2150_v49 = vsel %vm2127_vm2, %v2122_v17, %v2124_v35  ;;  %v2151_v59 = vsel %vm2127_vm2, %v2124_v35, %v2126_v30  ;;  %3336 = vmatprep.mubr.f32.mxu0 %v8157_v40  ;;  %v8182_v35 = vld [vmem:[#allocation22_spill] sm:$0xff] }
  0xe7   :  { %4531 = vrot.lane.b32.xlu1 %v4144_v4, %s5633_s7  ;;  %2418 = vmatprep.subr.mxu1 %v2151_v59  ;;  %v8183_v59 = vld [vmem:[#allocation23_spill] sm:$0xff] }
  0xe8   :  { %4529 = vrot.lane.b32.xlu0 %v4095_v44, %s5633_s7  ;;  %2419 = vmatpush1.msra.mxu1 %v2150_v49  ;;  %v8181_v44 = vld [vmem:[#allocation21_spill] sm:$0xff] }
  0xe9   :  { %v2108_v61 = vpop.permute.xlu1 %2107  ;;  %v2106_v26 = vpop.permute.xlu0 %2105 }
  0xea   :  { %v2142_v54 = vsel %vm2127_vm2, %v2104_v13, %v2106_v26  ;;  %v2143_v60 = vsel %vm2127_vm2, %v2106_v26, %v2108_v61  ;;  %v8184_v26 = vld [vmem:[#allocation27_spill] sm:$0xff] }
  0xeb   :  { %2420 = vmatprep.subr.mxu1 %v2143_v60  ;;  %v8185_v60 = vld [vmem:[#allocation30_spill] sm:$0xff] }
  0xec   :  { %2421 = vmatpush1.msra.mxu1 %v2142_v54 }
  0xed   :  { %v3211_v3 = vpop.permute.xlu1 %3210  ;;  %v3209_v23 = vpop.permute.xlu0 %3208 }
  0xee   :  { %v3241_v7 = vsel %vm772_vm0, %v3209_v23, %v3211_v3 }
  0xef   :  { %3298 = vmatprep.subr.mxu0 %v3241_v7 }
  0xf1   :  { %v2088_v31 = vpop.permute.xlu1 %2087  ;;  %v3207_v53 = vpop.permute.xlu0 %3206 }
  0xf2   :  { %v3240_v10 = vsel %vm772_vm0, %v3207_v53, %v3209_v23  ;;  %v2134_v15 = vsel %vm2127_vm2, %v2086_v52, %v2088_v31  ;;  %v8186_v23 = vld [vmem:[#allocation31_spill] sm:$0xff]  ;;  %v8187_v53 = vld [vmem:[#allocation28_spill] sm:$0xff] }
  0xf3   :  { %3299 = vmatpush1.msra.mxu0 %v3240_v10 }
  0xf5   :  { %v3191_v5 = vpop.permute.xlu1 %3190  ;;  %v2090_v47 = vpop.permute.xlu0 %2089 }
  0xf6   :  { %v2135_v24 = vsel %vm2127_vm2, %v2088_v31, %v2090_v47 }
  0xf7   :  { %2422 = vmatprep.subr.mxu1 %v2135_v24  ;;  %v8189_v24 = vld [vmem:[#allocation34_spill] sm:$0xff] }
  0xf8   :  { %2423 = vmatpush1.msra.mxu1 %v2134_v15 }
  0xf9   :  { %v3189_v28 = vpop.permute.xlu1 %3188  ;;  %v3193_v62 = vpop.permute.xlu0 %3192  ;;  %5496 = vmatmul.mubr.msk.f32.vlgmr.msra.gmra.mxu1 %vm821_vm1, %v7627_v43 }
  0xfa   :  { %v3232_v17 = vsel %vm772_vm0, %v3189_v28, %v3191_v5  ;;  %v3233_v0 = vsel %vm772_vm0, %v3191_v5, %v3193_v62  ;;  %3407 = vmatprep.mubr.f32.mxu1 %v8157_v40  ;;  %v8188_v5 = vld [vmem:[#allocation35_spill] sm:$0xff]  ;;  %v8190_v28 = vld [vmem:[#allocation40_spill] sm:$0xff] }
  0xfb   :  { %3300 = vmatprep.subr.mxu0 %v3233_v0  ;;  %v8191_v0 = vld [vmem:[#allocation38_spill] sm:$0xff] }
  0xfc   :  { %3301 = vmatpush1.msra.mxu0 %v3232_v17 }
  0xfd   :  { %v3175_v57 = vpop.permute.xlu1 %3174 }
  0xfe   :  { %v3173_v48 = vpop.permute.xlu0 %3172 }
  0xff   :  { %v3225_v1 = vsel %vm772_vm0, %v3173_v48, %v3175_v57 }
 0x100   :  { %3302 = vmatprep.subr.mxu0 %v3225_v1  ;;  %v8193_v1 = vld [vmem:[#allocation19_spill] sm:$0xff] }
 0x101   :  { %v3215_v34 = vpop.permute.xlu1 %3214 }
 0x102   :  { %v3213_v25 = vpop.permute.xlu0 %3212 }
 0x103   :  { %v3242_v39 = vsel %vm772_vm0, %v3211_v3, %v3213_v25  ;;  %v3243_v51 = vsel %vm772_vm0, %v3213_v25, %v3215_v34  ;;  %v8194_v25 = vld [vmem:[#allocation29_spill] sm:$0xff] }
 0x104   :  { %3369 = vmatprep.subr.mxu1 %v3243_v51  ;;  %v8195_v51 = vld [vmem:[#allocation24_spill] sm:$0xff] }
 0x105   :  { %3370 = vmatpush1.msra.mxu1 %v3242_v39  ;;  %v3195_v55 = vpop.permute.xlu1 %3194 }
 0x106   :  { %v3171_v16 = vpop.permute.xlu0 %3170  ;;  %v3234_v42 = vsel %vm772_vm0, %v3193_v62, %v3195_v55 }
 0x107   :  { %v3224_v9 = vsel %vm772_vm0, %v3171_v16, %v3173_v48  ;;  %v8196_v16 = vld [vmem:[#allocation32_spill] sm:$0xff] }
 0x108   :  { %3303 = vmatpush1.msra.mxu0 %v3224_v9  ;;  %v8197_v9 = vld [vmem:[#allocation25_spill] sm:$0xff] }
 0x109   :  { %v3217_v36 = vpop.permute.xlu1 %3216  ;;  %5545 = vmatmul.mubr.msk.f32.vlgmr.msra.gmra.mxu0 %vm821_vm1, %v7010_v12 }
 0x10a   :  { %v3197_v6 = vpop.permute.xlu0 %3196  ;;  %3478 = vmatprep.mubr.f32.mxu0 %v8157_v40  ;;  %v3244_v11 = vsel %vm772_vm0, %v3215_v34, %v3217_v36 }
 0x10b   :  { %v3235_v50 = vsel %vm772_vm0, %v3195_v55, %v3197_v6 }
 0x10c   :  { %3371 = vmatprep.subr.mxu1 %v3235_v50 }
 0x10d   :  { %3372 = vmatpush1.msra.mxu1 %v3234_v42  ;;  %v3177_v27 = vpop.permute.xlu1 %3176  ;;  %v8199_v42 = vld [vmem:[#allocation33_spill] sm:$0xff] }
 0x10e   :  { %v3219_v41 = vpop.permute.xlu0 %3218  ;;  %v3226_v13 = vsel %vm772_vm0, %v3175_v57, %v3177_v27  ;;  %v8192_v57 = vld [vmem:[#allocation26_spill] sm:$0xff] }
 0x10f   :  { %v3245_v32 = vsel %vm772_vm0, %v3217_v36, %v3219_v41 }
 0x110   :  { %3440 = vmatprep.subr.mxu0 %v3245_v32 }
 0x111   :  { %3441 = vmatpush1.msra.mxu0 %v3244_v11  ;;  %v3199_v46 = vpop.permute.xlu1 %3198 }
 0x112   :  { %v3179_v22 = vpop.permute.xlu0 %3178  ;;  %v3236_v33 = vsel %vm772_vm0, %v3197_v6, %v3199_v46  ;;  %v8198_v6 = vld [vmem:[#allocation37_spill] sm:$0xff] }
 0x113   :  { %v3227_v45 = vsel %vm772_vm0, %v3177_v27, %v3179_v22 }
 0x114   :  { %3373 = vmatprep.subr.mxu1 %v3227_v45 }
 0x115   :  { %3374 = vmatpush1.msra.mxu1 %v3226_v13  ;;  %v3181_v21 = vpop.permute.xlu1 %3180 }
 0x116   :  { %v3201_v14 = vpop.permute.xlu0 %3200  ;;  %5546 = vmatmul.mubr.msk.f32.vlgmr.msra.gmra.mxu1 %vm821_vm1, %v7010_v12  ;;  %v3228_v52 = vsel %vm772_vm0, %v3179_v22, %v3181_v21  ;;  %v5629_v12 = vld [vmem:[%s8071_s1 + $0x8] sm:$0xff] }
 0x117   :  { %v3237_v2 = vsel %vm772_vm0, %v3199_v46, %v3201_v14  ;;  %3549 = vmatprep.mubr.f32.mxu1 %v8157_v40  ;;  %v8201_v46 = vld [vmem:[#allocation39_spill] sm:$0xff] }
 0x118   :  { %3442 = vmatprep.subr.mxu0 %v3237_v2 }
 0x119   :  { %3443 = vmatpush1.msra.mxu0 %v3236_v33  ;;  %v3221_v38 = vpop.permute.xlu1 %3220 }
 0x11a   :  { %v3183_v37 = vpop.permute.xlu0 %3182  ;;  %v3246_v30 = vsel %vm772_vm0, %v3219_v41, %v3221_v38  ;;  %v8200_v41 = vld [vmem:[#allocation36_spill] sm:$0xff] }
 0x11b   :  { %v3229_v19 = vsel %vm772_vm0, %v3181_v21, %v3183_v37 }
 0x11c   :  { %3444 = vmatprep.subr.mxu0 %v3229_v19 }
 0x11d   :  { %3445 = vmatpush1.msra.mxu0 %v3228_v52  ;;  %v3203_v18 = vpop.permute.xlu1 %3202 }
 0x11e   :  { %v3223_v8 = vpop.permute.xlu0 %3222  ;;  %3606 = vmatprep.subr.mxu0 %v8180_v29  ;;  %5547 = vmatmul.mubr.msk.f32.vlgmr.msra.gmra.mxu0 %vm821_vm1, %v5629_v12  ;;  %v3238_v3 = vsel %vm772_vm0, %v3201_v14, %v3203_v18 }
 0x11f   :  { %v3247_v4 = vsel %vm772_vm0, %v3221_v38, %v3223_v8  ;;  %3607 = vmatpush1.msra.mxu0 %v8181_v44  ;;  %3644 = vmatprep.mubr.f32.mxu0 %v8157_v40 }
 0x120   :  { %3511 = vmatprep.subr.mxu1 %v3247_v4  ;;  %3608 = vmatprep.subr.mxu0 %v8182_v35 }
 0x121   :  { %3512 = vmatpush1.msra.mxu1 %v3246_v30  ;;  %v3185_v49 = vpop.permute.xlu1 %3184  ;;  %3609 = vmatpush1.msra.mxu0 %v8183_v59 }
 0x122   :  { %v3205_v61 = vpop.permute.xlu0 %3204  ;;  %3610 = vmatprep.subr.mxu0 %v8184_v26  ;;  %v3230_v47 = vsel %vm772_vm0, %v3183_v37, %v3185_v49 }
 0x123   :  { %v3239_v54 = vsel %vm772_vm0, %v3203_v18, %v3205_v61  ;;  %3611 = vmatpush1.msra.mxu0 %v8185_v60 }
 0x124   :  { %3513 = vmatprep.subr.mxu1 %v3239_v54  ;;  %3748 = vmatprep.subr.mxu0 %v8186_v23 }
 0x125   :  { %3514 = vmatpush1.msra.mxu1 %v3238_v3  ;;  %v4554_v7 = vpop.permute.xlu1 %4553  ;;  %5549 = vmatmul.mubr.msk.f32.vlgmr.msra.gmra.mxu0 %vm821_vm1, %v7379_v63 }
 0x126   :  { %v3187_v31 = vpop.permute.xlu0 %3186  ;;  %3749 = vmatpush1.msra.mxu0 %v8187_v53  ;;  %3786 = vmatprep.mubr.f32.mxu0 %v8157_v40 }
 0x127   :  { %v3231_v10 = vsel %vm772_vm0, %v3185_v49, %v3187_v31  ;;  %3750 = vmatprep.subr.mxu0 %v8188_v5 }
 0x128   :  { %3515 = vmatprep.subr.mxu1 %v3231_v10  ;;  %3751 = vmatpush1.msra.mxu0 %v8189_v24 }
 0x129   :  { %3516 = vmatpush1.msra.mxu1 %v3230_v47  ;;  %v4552_v15 = vpop.permute.xlu1 %4551  ;;  %3752 = vmatprep.subr.mxu0 %v8190_v28 }
 0x12a   :  { %v4585_v62 = vsel %vm2127_vm2, %v4552_v15, %v4554_v7  ;;  %v4556_v17 = vpop.permute.xlu0 %4555  ;;  %3753 = vmatpush1.msra.mxu0 %v8191_v0  ;;  %3677 = vmatprep.subr.mxu1 %v8192_v57 }
 0x12b   :  { %v4586_v48 = vsel %vm2127_vm2, %v4554_v7, %v4556_v17  ;;  %5551 = vmatmul.mubr.msk.f32.vlgmr.msra.gmra.mxu0 %vm821_vm1, %v7379_v63  ;;  %5548 = vmatmul.mubr.msk.f32.vlgmr.msra.gmra.mxu1 %vm821_vm1, %v5629_v12 }
 0x12c   :  { %4643 = vmatprep.subr.mxu0 %v4586_v48  ;;  %3678 = vmatpush1.msra.mxu1 %v8193_v1 }
 0x12d   :  { %4644 = vmatpush1.msra.mxu0 %v4585_v62  ;;  %v4538_v34 = vpop.permute.xlu1 %4537  ;;  %3679 = vmatprep.subr.mxu1 %v8194_v25 }
 0x12e   :  { %v4536_v39 = vpop.permute.xlu0 %4535  ;;  %3680 = vmatpush1.msra.mxu1 %v8195_v51  ;;  %3715 = vmatprep.mubr.f32.mxu1 %v8157_v40 }
 0x12f   :  { %v4578_v55 = vsel %vm2127_vm2, %v4536_v39, %v4538_v34  ;;  %3681 = vmatprep.subr.mxu1 %v8196_v16  ;;  %4681 = vmatprep.mubr.f32.mxu0 %v8157_v40 }
 0x130   :  { %4645 = vmatprep.subr.mxu0 %v4578_v55  ;;  %3682 = vmatpush1.msra.mxu1 %v8197_v9 }
 0x131   :  { %v4518_v36 = vpop.permute.xlu1 %4517  ;;  %3819 = vmatprep.subr.mxu1 %v8198_v6  ;;  %5550 = vmatmul.mubr.msk.f32.vlgmr.msra.gmra.mxu1 %vm821_vm1, %v7379_v63 }
 0x132   :  { %v4534_v50 = vpop.permute.xlu0 %4533  ;;  %3820 = vmatpush1.msra.mxu1 %v8199_v42  ;;  %3857 = vmatprep.mubr.f32.mxu1 %v8157_v40 }
 0x133   :  { %v4577_v27 = vsel %vm2127_vm2, %v4534_v50, %v4536_v39  ;;  %3821 = vmatprep.subr.mxu1 %v7055_v58 }
 0x134   :  { %4646 = vmatpush1.msra.mxu0 %v4577_v27  ;;  %3822 = vmatpush1.msra.mxu1 %v8200_v41 }
 0x135   :  { %v4558_v32 = vpop.permute.xlu1 %4557  ;;  %3823 = vmatprep.subr.mxu1 %v7193_v56 }
 0x136   :  { %v4520_v11 = vpop.permute.xlu0 %4519  ;;  %3824 = vmatpush1.msra.mxu1 %v8201_v46  ;;  %v4587_v56 = vsel %vm2127_vm2, %v4556_v17, %v4558_v32 }
 0x137   :  { %v4570_v22 = vsel %vm2127_vm2, %v4518_v36, %v4520_v11  ;;  %5552 = vmatmul.mubr.msk.f32.vlgmr.msra.gmra.mxu1 %vm821_vm1, %v7379_v63 }
 0x138   :  { %4647 = vmatprep.subr.mxu0 %v4570_v22  ;;  %4752 = vmatprep.mubr.f32.mxu1 %v8157_v40 }
 0x139   :  { %v4516_v45 = vpop.permute.xlu1 %4515 }
 0x13a   :  { %v4569_v58 = vsel %vm2127_vm2, %v4516_v45, %v4518_v36  ;;  %v4560_v13 = vpop.permute.xlu0 %4559 }
 0x13b   :  { %4648 = vmatpush1.msra.mxu0 %v4569_v58  ;;  %v4588_v21 = vsel %vm2127_vm2, %v4558_v32, %v4560_v13 }
 0x13c   :  { %4714 = vmatprep.subr.mxu1 %v4588_v21  ;;  %5601 = vmatmul.mubr.msk.f32.vlgmr.msra.gmra.mxu0 %vm821_vm1, %v7627_v43 }
 0x13d   :  { %4715 = vmatpush1.msra.mxu1 %v4587_v56  ;;  %v4542_v14 = vpop.permute.xlu1 %4541  ;;  %4823 = vmatprep.mubr.f32.mxu0 %v8157_v40 }
 0x13e   :  { %v4540_v63 = vpop.permute.xlu0 %4539 }
 0x13f   :  { %v4579_v2 = vsel %vm2127_vm2, %v4538_v34, %v4540_v63  ;;  %v4580_v33 = vsel %vm2127_vm2, %v4540_v63, %v4542_v14 }
 0x140   :  { %4716 = vmatprep.subr.mxu1 %v4580_v33 }
 0x141   :  { %4717 = vmatpush1.msra.mxu1 %v4579_v2  ;;  %v4524_v38 = vpop.permute.xlu1 %4523 }
 0x142   :  { %v4522_v37 = vpop.permute.xlu0 %4521 }
 0x143   :  { %v4571_v19 = vsel %vm2127_vm2, %v4520_v11, %v4522_v37  ;;  %v4572_v52 = vsel %vm2127_vm2, %v4522_v37, %v4524_v38 }
 0x144   :  { %4718 = vmatprep.subr.mxu1 %v4572_v52 }
 0x145   :  { %4719 = vmatpush1.msra.mxu1 %v4571_v19  ;;  %v4564_v18 = vpop.permute.xlu1 %4563 }
 0x146   :  { %5602 = vmatmul.mubr.msk.f32.vlgmr.msra.gmra.mxu1 %vm821_vm1, %v7627_v43  ;;  %v4562_v8 = vpop.permute.xlu0 %4561 }
 0x147   :  { %v4589_v29 = vsel %vm2127_vm2, %v4560_v13, %v4562_v8  ;;  %v4590_v12 = vsel %vm2127_vm2, %v4562_v8, %v4564_v18  ;;  %4894 = vmatprep.mubr.f32.mxu1 %v8157_v40 }
 0x148   :  { %4785 = vmatprep.subr.mxu0 %v4590_v12 }
 0x149   :  { %4786 = vmatpush1.msra.mxu0 %v4589_v29  ;;  %v4546_v4 = vpop.permute.xlu1 %4545 }
 0x14a   :  { %v4544_v44 = vpop.permute.xlu0 %4543 }
 0x14b   :  { %v4581_v30 = vsel %vm2127_vm2, %v4542_v14, %v4544_v44  ;;  %v4582_v35 = vsel %vm2127_vm2, %v4544_v44, %v4546_v4 }
 0x14c   :  { %4787 = vmatprep.subr.mxu0 %v4582_v35 }
 0x14d   :  { %4788 = vmatpush1.msra.mxu0 %v4581_v30  ;;  %v4528_v49 = vpop.permute.xlu1 %4527 }
 0x14e   :  { %v4526_v59 = vpop.permute.xlu0 %4525 }
 0x14f   :  { %v4573_v61 = vsel %vm2127_vm2, %v4524_v38, %v4526_v59  ;;  %v4574_v26 = vsel %vm2127_vm2, %v4526_v59, %v4528_v49 }
 0x150   :  { %4789 = vmatprep.subr.mxu0 %v4574_v26 }
 0x151   :  { %4790 = vmatpush1.msra.mxu0 %v4573_v61  ;;  %v4568_v54 = vpop.permute.xlu1 %4567 }
 0x152   :  { %5603 = vmatmul.mubr.msk.f32.vlgmr.msra.gmra.mxu0 %vm821_vm1, %v7627_v43  ;;  %v4566_v40 = vpop.permute.xlu0 %4565 }
 0x153   :  { %v4591_v60 = vsel %vm2127_vm2, %v4564_v18, %v4566_v40  ;;  %v4592_v3 = vsel %vm2127_vm2, %v4566_v40, %v4568_v54 }
 0x154   :  { %4856 = vmatprep.subr.mxu1 %v4592_v3 }
 0x155   :  { %4857 = vmatpush1.msra.mxu1 %v4591_v60  ;;  %v4550_v23 = vpop.permute.xlu1 %4549 }
 0x156   :  { %v4548_v7 = vpop.permute.xlu0 %4547 }
 0x157   :  { %v4583_v31 = vsel %vm2127_vm2, %v4546_v4, %v4548_v7  ;;  %v4584_v53 = vsel %vm2127_vm2, %v4548_v7, %v4550_v23 }
 0x158   :  { %4858 = vmatprep.subr.mxu1 %v4584_v53 }
 0x159   :  { %4859 = vmatpush1.msra.mxu1 %v4583_v31  ;;  %v4532_v10 = vpop.permute.xlu1 %4531 }
 0x15a   :  { %v4530_v5 = vpop.permute.xlu0 %4529 }
 0x15b   :  { %v4575_v47 = vsel %vm2127_vm2, %v4528_v49, %v4530_v5  ;;  %v4576_v24 = vsel %vm2127_vm2, %v4530_v5, %v4532_v10 }
 0x15c   :  { %4860 = vmatprep.subr.mxu1 %v4576_v24  ;;  %v891_v15 = vpop.f32.mrf.mxu0 }
 0x15d   :  { %4861 = vmatpush1.msra.mxu1 %v4575_v47 }
 0x15e   :  { %5604 = vmatmul.mubr.msk.f32.vlgmr.msra.gmra.mxu1 %vm821_vm1, %v7627_v43  ;;  %v893_v28 = vpop.f32.mrf.mxu0 }
 0x169   :  { %v962_v62 = vpop.f32.mrf.mxu1 }
 0x16b   :  { %v964_v0 = vpop.f32.mrf.mxu1 }
 0x171   :  { %v1033_v17 = vpop.f32.mrf.mxu0 }
 0x173   :  { %v1035_v57 = vpop.f32.mrf.mxu0 }
 0x17a   :  { %v1202_v1 = vpop.f32.mrf.mxu0 }
 0x17b   :  { %v1203_v6 = vadd.f32 %v1202_v1, %v891_v15 }
 0x17c   :  { %v1204_v25 = vpop.f32.mrf.mxu0 }
 0x17d   :  { %v1205_v50 = vadd.f32 %v1204_v25, %v893_v28 }
 0x181   :  { %v1344_v51 = vpop.f32.mrf.mxu0 }
 0x182   :  { %v1345_v63 = vadd.f32 %v1344_v51, %v1033_v17 }
 0x183   :  { %v1346_v16 = vpop.f32.mrf.mxu0 }
 0x184   :  { %v1104_v48 = vpop.f32.mrf.mxu1  ;;  %v1347_v52 = vadd.f32 %v1346_v16, %v1035_v57 }
 0x186   :  { %v1106_v34 = vpop.f32.mrf.mxu1 }
 0x18a   :  { %v1273_v39 = vpop.f32.mrf.mxu1 }
 0x18b   :  { %v1274_v27 = vadd.f32 %v1273_v39, %v962_v62 }
 0x18c   :  { %v1275_v55 = vpop.f32.mrf.mxu1 }
 0x18d   :  { %v1276_v45 = vadd.f32 %v1275_v55, %v964_v0 }
 0x191   :  { %v1415_v9 = vpop.f32.mrf.mxu1 }
 0x192   :  { %v2245_v36 = vpop.f32.mrf.mxu0  ;;  %v1416_v35 = vadd.f32 %v1415_v9, %v1104_v48 }
 0x193   :  { %v1417_v42 = vpop.f32.mrf.mxu1  ;;  %v7868_v41 = vadd.f32 %v2245_v36, %v1203_v6 }
 0x194   :  { %v2247_v43 = vpop.f32.mrf.mxu0  ;;  %v1418_v61 = vadd.f32 %v1417_v42, %v1106_v34 }
 0x195   :  { %v7870_v32 = vadd.f32 %v2247_v43, %v1205_v50  ;;  %v4919_v46 = vmul.f32 %v7868_v41, %v7868_v41 }
 0x197   :  { %v4920_v22 = vmul.f32 %v7870_v32, %v7870_v32  ;;  %v4909_v58 = vadd.f32 %v7870_v32, %v7868_v41 }
 0x199   :  { %v4927_v56 = vadd.f32 %v4920_v22, %v4919_v46 }
 0x19d   :  { %v2316_v11 = vpop.f32.mrf.mxu1 }
 0x19e   :  { %v7878_v13 = vadd.f32 %v2316_v11, %v1274_v27 }
 0x19f   :  { %v2318_v21 = vpop.f32.mrf.mxu1 }
 0x1a0   :  { %v4921_v14 = vmul.f32 %v7878_v13, %v7878_v13  ;;  %v4910_v2 = vadd.f32 %v4909_v58, %v7878_v13  ;;  %v7883_v33 = vadd.f32 %v2318_v21, %v1276_v45 }
 0x1a2   :  { %v4928_v37 = vadd.f32 %v4927_v56, %v4921_v14  ;;  %v4922_v19 = vmul.f32 %v7883_v33, %v7883_v33  ;;  %v4911_v18 = vadd.f32 %v4910_v2, %v7883_v33 }
 0x1a4   :  { %v4929_v12 = vadd.f32 %v4928_v37, %v4922_v19 }
 0x1a5   :  { %v2387_v38 = vpop.f32.mrf.mxu0 }
 0x1a6   :  { %v7888_v8 = vadd.f32 %v2387_v38, %v1345_v63 }
 0x1a7   :  { %v2389_v29 = vpop.f32.mrf.mxu0 }
 0x1a8   :  { %v4923_v4 = vmul.f32 %v7888_v8, %v7888_v8  ;;  %v4912_v44 = vadd.f32 %v4911_v18, %v7888_v8  ;;  %v7893_v30 = vadd.f32 %v2389_v29, %v1347_v52 }
 0x1aa   :  { %v4930_v49 = vadd.f32 %v4929_v12, %v4923_v4  ;;  %v4924_v59 = vmul.f32 %v7893_v30, %v7893_v30  ;;  %v4913_v26 = vadd.f32 %v4912_v44, %v7893_v30 }
 0x1ac   :  { %v4931_v40 = vadd.f32 %v4930_v49, %v4924_v59 }
 0x1b9   :  { %v2458_v54 = vpop.f32.mrf.mxu1 }
 0x1ba   :  { %v7898_v60 = vadd.f32 %v2458_v54, %v1416_v35 }
 0x1bb   :  { %v2460_v3 = vpop.f32.mrf.mxu1 }
 0x1bc   :  { %v4914_v23 = vadd.f32 %v4913_v26, %v7898_v60  ;;  %v4925_v7 = vmul.f32 %v7898_v60, %v7898_v60  ;;  %v7903_v31 = vadd.f32 %v2460_v3, %v1418_v61 }
 0x1be   :  { %v4926_v53 = vmul.f32 %v7903_v31, %v7903_v31  ;;  %v4915_v10 = vadd.f32 %v4914_v23, %v7903_v31  ;;  %v4932_v5 = vadd.f32 %v4931_v40, %v4925_v7 }
 0x1c0   :  { %4916 = vadd.xlane.f32.xlu0 %v4915_v10  ;;  %v4933_v47 = vadd.f32 %v4932_v5, %v4926_v53 }
 0x1c4   :  { %4934 = vadd.xlane.f32.xlu0 %v4933_v47 }
 0x1c9   :  { %v3338_v24 = vpop.f32.mrf.mxu0 }
 0x1cb   :  { %v3340_v15 = vpop.f32.mrf.mxu0 }
 0x1d6   :  { %v3409_v28 = vpop.f32.mrf.mxu1 }
 0x1d8   :  { %v3411_v17 = vpop.f32.mrf.mxu1 }
 0x1de   :  { %v3480_v62 = vpop.f32.mrf.mxu0 }
 0x1e0   :  { %v3482_v0 = vpop.f32.mrf.mxu0 }
 0x1e5   :  { %v3646_v48 = vpop.f32.mrf.mxu0 }
 0x1e6   :  { %v3647_v50 = vadd.f32 %v3646_v48, %v3338_v24 }
 0x1e7   :  { %v3648_v34 = vpop.f32.mrf.mxu0 }
 0x1e8   :  { %v3649_v42 = vadd.f32 %v3648_v34, %v3340_v15  ;;  %v5634_v34 = vmov 0  }
 0x1e9   :  { %5625 = vset.pattern.permute.xlu1 %v5634_v34  ;;  %5626 = vset.pattern.permute.xlu0 %v5634_v34 }
 0x1eb   :  { %v3551_v57 = vpop.f32.mrf.mxu1  ;;  %v3788_v39 = vpop.f32.mrf.mxu0 }
 0x1ec   :  { %v3789_v56 = vadd.f32 %v3788_v39, %v3480_v62 }
 0x1ed   :  { %v3553_v1 = vpop.f32.mrf.mxu1  ;;  %v3790_v55 = vpop.f32.mrf.mxu0 }
 0x1ee   :  { %v3791_v12 = vadd.f32 %v3790_v55, %v3482_v0 }
 0x1f1   :  { %v3717_v25 = vpop.f32.mrf.mxu1 }
 0x1f2   :  { %v3718_v27 = vadd.f32 %v3717_v25, %v3409_v28 }
 0x1f3   :  { %v3719_v51 = vpop.f32.mrf.mxu1 }
 0x1f4   :  { %v3720_v58 = vadd.f32 %v3719_v51, %v3411_v17 }
 0x1f7   :  { %v3859_v16 = vpop.f32.mrf.mxu1 }
 0x1f8   :  { %v3860_v54 = vadd.f32 %v3859_v16, %v3551_v57 }
 0x1f9   :  { %v3861_v36 = vpop.f32.mrf.mxu1 }
 0x1fa   :  { %v3862_v7 = vadd.f32 %v3861_v36, %v3553_v1 }
 0x1fc   :  { %v4683_v9 = vpop.f32.mrf.mxu0 }
 0x1fd   :  { %v7910_v46 = vadd.f32 %v4683_v9, %v3647_v50 }
 0x1fe   :  { %v4685_v6 = vpop.f32.mrf.mxu0 }
 0x1ff   :  { %v7908_v11 = vadd.f32 %v4685_v6, %v3649_v42  ;;  %v4947_v63 = vmul.f32 %v7910_v46, %v7910_v46  ;;  %v4969_v42 = vld [vmem:[%s8072_s2] sm:$0xff] }
 0x201   :  { %v4948_v21 = vmul.f32 %v7908_v11, %v7908_v11  ;;  %v4937_v2 = vadd.f32 %v7908_v11, %v7910_v46 }
 0x203   :  { %v4955_v19 = vadd.f32 %v4948_v21, %v4947_v63 }
 0x206   :  { %v4754_v43 = vpop.f32.mrf.mxu1 }
 0x207   :  { %v7912_v22 = vadd.f32 %v4754_v43, %v3718_v27 }
 0x208   :  { %v4756_v45 = vpop.f32.mrf.mxu1 }
 0x209   :  { %v4949_v38 = vmul.f32 %v7912_v22, %v7912_v22  ;;  %v7922_v37 = vadd.f32 %v4756_v45, %v3720_v58  ;;  %v4938_v52 = vadd.f32 %v4937_v2, %v7912_v22  ;;  %v4973_v45 = vld [vmem:[%s8073_s3] sm:$0xff] }
 0x20b   :  { %v4956_v4 = vadd.f32 %v4955_v19, %v4949_v38  ;;  %v4950_v44 = vmul.f32 %v7922_v37, %v7922_v37  ;;  %v4939_v35 = vadd.f32 %v4938_v52, %v7922_v37 }
 0x20d   :  { %v4957_v61 = vadd.f32 %v4956_v4, %v4950_v44 }
 0x212   :  { %v4825_v14 = vpop.f32.mrf.mxu0 }
 0x213   :  { %v7925_v18 = vadd.f32 %v4825_v14, %v3789_v56 }
 0x214   :  { %v4827_v29 = vpop.f32.mrf.mxu0 }
 0x215   :  { %v4951_v49 = vmul.f32 %v7925_v18, %v7925_v18  ;;  %v4906_v59 = vadd.f32 %v4827_v29, %v3791_v12  ;;  %v4940_v26 = vadd.f32 %v4939_v35, %v7925_v18 }
 0x217   :  { %v4958_v40 = vadd.f32 %v4957_v61, %v4951_v49  ;;  %v4952_v3 = vmul.f32 %v4906_v59, %v4906_v59  ;;  %v4941_v53 = vadd.f32 %v4940_v26, %v4906_v59 }
 0x219   :  { %v4959_v47 = vadd.f32 %v4958_v40, %v4952_v3 }
 0x21e   :  { %v4896_v23 = vpop.f32.mrf.mxu1 }
 0x21f   :  { %v4907_v10 = vadd.f32 %v4896_v23, %v3860_v54 }
 0x220   :  { %v4898_v5 = vpop.f32.mrf.mxu1 }
 0x221   :  { %v4942_v24 = vadd.f32 %v4941_v53, %v4907_v10  ;;  %v4953_v15 = vmul.f32 %v4907_v10, %v4907_v10  ;;  %v4908_v28 = vadd.f32 %v4898_v5, %v3862_v7 }
 0x223   :  { %v4954_v62 = vmul.f32 %v4908_v28, %v4908_v28  ;;  %v4943_v17 = vadd.f32 %v4942_v24, %v4908_v28  ;;  %v4960_v0 = vadd.f32 %v4959_v47, %v4953_v15 }
 0x225   :  { %4944 = vadd.xlane.f32.xlu1 %v4943_v17  ;;  %v4961_v48 = vadd.f32 %v4960_v0, %v4954_v62 }
 0x227   :  { %4962 = vadd.xlane.f32.xlu0 %v4961_v48 }
 0x249   :  { %v4917_v57 = vpop.xlane.xlu0 %4916 }
 0x24d   :  { %v4935_v25 = vpop.xlane.xlu0 %4934 }
 0x2ae   :  { %v4945_v39 = vpop.xlane.xlu1 %4944 }
 0x2af   :  { %v4946_v1 = vadd.f32 %v4945_v39, %v4917_v57 }
 0x2b0   :  { %v4963_v51 = vpop.xlane.xlu0 %4962 }
 0x2b1   :  { %v4965_v55 = vmul.f32 0.00048828125, %v4946_v1  ;;  %v4964_v16 = vadd.f32 %v4963_v51, %v4935_v25 }
 0x2b3   :  { %v4967_v9 = vmul.f32 %v4965_v55, %v4965_v55  ;;  %v4966_v36 = vmul.f32 0.00048828125, %v4964_v16 }
 0x2b5   :  { %v4968_v6 = vsub.f32 %v4966_v36, %v4967_v9 }
 0x2b7   :  { %v4970_v50 = vadd.f32 1e-05, %v4968_v6 }
 0x2b9   :  { %5627 = vrsqrt.f32 %v4970_v50 }
 0x2c6   :  { %v5628_v43 = vpop.eup %5627 }
 0x2c7   :  { %v4972_v27 = vmul.f32 %v5628_v43, %v4969_v42 }
 0x2c9   :  { %4978 = vperm.xlu1 %5625, %v4972_v27   ;;  %v4974_v58 = vmul.f32 %v4972_v27, %v4965_v55 }
 0x2cb   :  { %v4975_v21 = vsub.f32 %v4973_v45, %v4974_v58 }
 0x2cd   :  { %4991 = vperm.xlu0 %5626, %v4975_v21  }
 0x344   :  { %v4979_v56 = vpop.permute.xlu1 %4978 }
 0x345   :  { %v4981_v14 = vmul.f32 %v4979_v56, %v7868_v41  ;;  %v4982_v63 = vmul.f32 %v4979_v56, %v7870_v32  ;;  %v4983_v2 = vmul.f32 %v4979_v56, %v7878_v13  ;;  %v4984_v38 = vmul.f32 %v4979_v56, %v7883_v33 }
 0x346   :  { %v4985_v19 = vmul.f32 %v4979_v56, %v7888_v8  ;;  %v4986_v52 = vmul.f32 %v4979_v56, %v7893_v30  ;;  %v4987_v29 = vmul.f32 %v4979_v56, %v7898_v60  ;;  %v4988_v12 = vmul.f32 %v4979_v56, %v7903_v31 }
 0x347   :  { %v5185_v4 = vmul.f32 %v4979_v56, %v7910_v46  ;;  %v5186_v44 = vmul.f32 %v4979_v56, %v7908_v11  ;;  %v5187_v41 = vmul.f32 %v4979_v56, %v7912_v22  ;;  %v5188_v32 = vmul.f32 %v4979_v56, %v7922_v37 }
 0x348   :  { %v7952_v13 = vmul.f32 %v4979_v56, %v7925_v18  ;;  %v7954_v33 = vmul.f32 %v4979_v56, %v4906_v59  ;;  %v7956_v8 = vmul.f32 %v4979_v56, %v4907_v10  ;;  %v7958_v30 = vmul.f32 %v4979_v56, %v4908_v28  ;;  %v7960_v60 = vpop.permute.xlu0 %4991 }
 0x349   :  { %v4994_v31 = vadd.f32 %v7960_v60, %v4981_v14  ;;  %v4995_v46 = vadd.f32 %v7960_v60, %v4982_v63  ;;  %v4996_v11 = vadd.f32 %v7960_v60, %v4983_v2  ;;  %v4997_v22 = vadd.f32 %v7960_v60, %v4984_v38 }
 0x34a   :  { %v4998_v37 = vadd.f32 %v7960_v60, %v4985_v19  ;;  %v4999_v18 = vadd.f32 %v7960_v60, %v4986_v52  ;;  %v5000_v35 = vadd.f32 %v7960_v60, %v4987_v29  ;;  %v5001_v49 = vadd.f32 %v7960_v60, %v4988_v12 }
 0x34b   :  { %v5002_v59 = vmul.f32 0.2, %v4994_v31  ;;  %v5003_v61 = vmul.f32 0.2, %v4995_v46  ;;  %v5004_v26 = vmul.f32 0.2, %v4996_v11  ;;  %v7971_v54 = vadd.f32 %v5185_v4, %v7960_v60 }
 0x34c   :  { %v5005_v40 = vmul.f32 0.2, %v4997_v22  ;;  %v5006_v3 = vmul.f32 0.2, %v4998_v37  ;;  %v5007_v23 = vmul.f32 0.2, %v4999_v18  ;;  %v7974_v7 = vadd.f32 %v5186_v44, %v7960_v60 }
 0x34d   :  { %v5008_v53 = vmul.f32 0.2, %v5000_v35  ;;  %v5009_v10 = vmul.f32 0.2, %v5001_v49  ;;  %v5010_v5 = vmax.f32 %v4994_v31, %v5002_v59  ;;  %v5011_v47 = vmax.f32 %v4995_v46, %v5003_v61 }
 0x34e   :  { %v5012_v24 = vmax.f32 %v4996_v11, %v5004_v26  ;;  %v5013_v15 = vmax.f32 %v4997_v22, %v5005_v40  ;;  %v5014_v28 = vmax.f32 %v4998_v37, %v5006_v3  ;;  %v5015_v62 = vmax.f32 %v4999_v18, %v5007_v23 }
 0x34f   :  { %v5016_v17 = vmax.f32 %v5000_v35, %v5008_v53  ;;  %v5017_v0 = vmax.f32 %v5001_v49, %v5009_v10  ;;  %v5026_v48 = vcombine.low %v5010_v5, %v5011_v47  ;;  %v5027_v34 = vcombine.high %v5010_v5, %v5011_v47 }
 0x350   :  { %v5028_v57 = vcombine.low %v5012_v24, %v5013_v15  ;;  %v5029_v25 = vcombine.high %v5012_v24, %v5013_v15  ;;  %v5030_v39 = vcombine.low %v5014_v28, %v5015_v62  ;;  %v5031_v1 = vcombine.high %v5014_v28, %v5015_v62 }
 0x351   :  { %v5032_v51 = vcombine.low %v5016_v17, %v5017_v0  ;;  %v5033_v55 = vcombine.high %v5016_v17, %v5017_v0  ;;  %v5040_v16 = vrot.slane %v5026_v48, %v5723_v20  ;;  %v5047_v9 = vrot.slane %v5027_v34, %v5723_v20 }
 0x352   :  { %v5054_v36 = vrot.slane %v5028_v57, %v5723_v20  ;;  %v5061_v6 = vrot.slane %v5029_v25, %v5723_v20  ;;  %v5068_v50 = vrot.slane %v5030_v39, %v5723_v20  ;;  %v5075_v42 = vrot.slane %v5031_v1, %v5723_v20 }
 0x353   :  { %v5082_v43 = vrot.slane %v5032_v51, %v5723_v20  ;;  %v5089_v27 = vrot.slane %v5033_v55, %v5723_v20  ;;  %v5195_v45 = vadd.f32 %v5187_v41, %v7960_v60  ;;  %v5196_v58 = vadd.f32 %v5188_v32, %v7960_v60 }
 0x354   :  { %v5090_v21 = vcombine.low %v5040_v16, %v5054_v36  ;;  %v5091_v56 = vcombine.high %v5040_v16, %v5054_v36  ;;  %v5092_v14 = vcombine.low %v5047_v9, %v5061_v6  ;;  %v5093_v63 = vcombine.high %v5047_v9, %v5061_v6 }
 0x355   :  { %v5094_v2 = vcombine.low %v5068_v50, %v5082_v43  ;;  %v5095_v38 = vcombine.high %v5068_v50, %v5082_v43  ;;  %v5096_v19 = vcombine.low %v5075_v42, %v5089_v27  ;;  %v5097_v52 = vcombine.high %v5075_v42, %v5089_v27 }
 0x356   :  { %v5104_v29 = vrot.slane %v5090_v21, %v5723_v20  ;;  %v5111_v12 = vrot.slane %v5092_v14, %v5723_v20  ;;  %v5118_v4 = vrot.slane %v5091_v56, %v5723_v20  ;;  %v5125_v44 = vrot.slane %v5093_v63, %v5723_v20 }
 0x357   :  { %v5132_v41 = vrot.slane %v5094_v2, %v5723_v20  ;;  %v5139_v32 = vrot.slane %v5096_v19, %v5723_v20  ;;  %v5146_v31 = vrot.slane %v5095_v38, %v5723_v20  ;;  %v5153_v46 = vrot.slane %v5097_v52, %v5723_v20 }
 0x358   :  { %v5197_v11 = vadd.f32 %v7952_v13, %v7960_v60  ;;  %v5198_v22 = vadd.f32 %v7954_v33, %v7960_v60  ;;  %v5199_v37 = vadd.f32 %v7956_v8, %v7960_v60  ;;  %v5200_v18 = vadd.f32 %v7958_v30, %v7960_v60 }
 0x359   :  { %v5154_v35 = vcombine.low %v5104_v29, %v5132_v41  ;;  %v5155_v49 = vcombine.high %v5104_v29, %v5132_v41  ;;  %v5156_v59 = vcombine.low %v5111_v12, %v5139_v32  ;;  %v5157_v61 = vcombine.high %v5111_v12, %v5139_v32 }
 0x35a   :  { %v5158_v26 = vcombine.low %v5118_v4, %v5146_v31  ;;  %v5159_v40 = vcombine.high %v5118_v4, %v5146_v31  ;;  %v5160_v3 = vcombine.low %v5125_v44, %v5153_v46  ;;  %v5161_v23 = vcombine.high %v5125_v44, %v5153_v46 }
 0x35b   :  { %5170 = vst [vmem:[%s8074_s4] ss:$2 sm:$0xff] %v5154_v35  ;;  %5606 = vst [vmem:[%s8074_s4 + $0x20] ss:$2 sm:$0xff] %v5155_v49  ;;  %v5201_v13 = vmul.f32 0.2, %v7971_v54 }
 0x35c   :  { %5608 = vst [vmem:[%s8074_s4 + $0x40] ss:$2 sm:$0xff] %v5156_v59  ;;  %5610 = vst [vmem:[%s8074_s4 + $0x60] ss:$2 sm:$0xff] %v5157_v61  ;;  %v5202_v33 = vmul.f32 0.2, %v7974_v7 }
 0x35d   :  { %v5203_v8 = vmul.f32 0.2, %v5195_v45  ;;  %5605 = vst [vmem:[%s8074_s4 + $0x10] ss:$2 sm:$0xff] %v5158_v26  ;;  %5607 = vst [vmem:[%s8074_s4 + $0x30] ss:$2 sm:$0xff] %v5159_v40  ;;  %v5209_v47 = vmax.f32 %v7971_v54, %v5201_v13 }
 0x35e   :  { %5609 = vst [vmem:[%s8074_s4 + $0x50] ss:$2 sm:$0xff] %v5160_v3  ;;  %5611 = vst [vmem:[%s8074_s4 + $0x70] ss:$2 sm:$0xff] %v5161_v23  ;;  %v5204_v30 = vmul.f32 0.2, %v5196_v58  ;;  %v5210_v24 = vmax.f32 %v7974_v7, %v5202_v33 }
 0x35f   :  { %v5205_v60 = vmul.f32 0.2, %v5197_v11  ;;  %v5206_v53 = vmul.f32 0.2, %v5198_v22  ;;  %v5207_v10 = vmul.f32 0.2, %v5199_v37  ;;  %v5211_v15 = vmax.f32 %v5195_v45, %v5203_v8 }
 0x360   :  { %v5208_v5 = vmul.f32 0.2, %v5200_v18  ;;  %v5212_v28 = vmax.f32 %v5196_v58, %v5204_v30  ;;  %v5225_v34 = vcombine.low %v5209_v47, %v5210_v24  ;;  %v5226_v57 = vcombine.high %v5209_v47, %v5210_v24 }
 0x361   :  { %v5213_v62 = vmax.f32 %v5197_v11, %v5205_v60  ;;  %v5214_v17 = vmax.f32 %v5198_v22, %v5206_v53  ;;  %v5215_v0 = vmax.f32 %v5199_v37, %v5207_v10 }
 0x362   :  { %v5216_v48 = vmax.f32 %v5200_v18, %v5208_v5  ;;  %v5227_v25 = vcombine.low %v5211_v15, %v5212_v28  ;;  %v5228_v39 = vcombine.high %v5211_v15, %v5212_v28  ;;  %v5239_v9 = vrot.slane %v5225_v34, %v5723_v20 }
 0x363   :  { %v5229_v1 = vcombine.low %v5213_v62, %v5214_v17  ;;  %v5230_v51 = vcombine.high %v5213_v62, %v5214_v17  ;;  %v5246_v54 = vrot.slane %v5226_v57, %v5723_v20 }
 0x364   :  { %v5231_v55 = vcombine.low %v5215_v0, %v5216_v48  ;;  %v5232_v16 = vcombine.high %v5215_v0, %v5216_v48  ;;  %v5253_v7 = vrot.slane %v5227_v25, %v5723_v20  ;;  %v5260_v36 = vrot.slane %v5228_v39, %v5723_v20 }
 0x365   :  { %v5267_v6 = vrot.slane %v5229_v1, %v5723_v20  ;;  %v5274_v50 = vrot.slane %v5230_v51, %v5723_v20 }
 0x366   :  { %v5281_v42 = vrot.slane %v5231_v55, %v5723_v20  ;;  %v5288_v43 = vrot.slane %v5232_v16, %v5723_v20  ;;  %v5289_v27 = vcombine.low %v5239_v9, %v5253_v7  ;;  %v5290_v45 = vcombine.high %v5239_v9, %v5253_v7 }
 0x367   :  { %v5291_v58 = vcombine.low %v5246_v54, %v5260_v36  ;;  %v5292_v21 = vcombine.high %v5246_v54, %v5260_v36 }
 0x368   :  { %v5293_v56 = vcombine.low %v5267_v6, %v5281_v42  ;;  %v5294_v14 = vcombine.high %v5267_v6, %v5281_v42  ;;  %v5295_v63 = vcombine.low %v5274_v50, %v5288_v43  ;;  %v5296_v2 = vcombine.high %v5274_v50, %v5288_v43 }
 0x369   :  { %v5303_v38 = vrot.slane %v5289_v27, %v5723_v20  ;;  %v5310_v19 = vrot.slane %v5291_v58, %v5723_v20  ;;  %v5317_v52 = vrot.slane %v5290_v45, %v5723_v20  ;;  %v5324_v29 = vrot.slane %v5292_v21, %v5723_v20 }
 0x36a   :  { %v5331_v12 = vrot.slane %v5293_v56, %v5723_v20  ;;  %v5338_v4 = vrot.slane %v5295_v63, %v5723_v20  ;;  %v5345_v44 = vrot.slane %v5294_v14, %v5723_v20  ;;  %v5352_v41 = vrot.slane %v5296_v2, %v5723_v20 }
 0x36c   :  { %v5353_v32 = vcombine.low %v5303_v38, %v5331_v12  ;;  %v5354_v31 = vcombine.high %v5303_v38, %v5331_v12  ;;  %v5355_v46 = vcombine.low %v5310_v19, %v5338_v4  ;;  %v5356_v11 = vcombine.high %v5310_v19, %v5338_v4 }
 0x36d   :  { %v5357_v22 = vcombine.low %v5317_v52, %v5345_v44  ;;  %v5358_v37 = vcombine.high %v5317_v52, %v5345_v44  ;;  %v5359_v18 = vcombine.low %v5324_v29, %v5352_v41  ;;  %v5360_v35 = vcombine.high %v5324_v29, %v5352_v41 }
 0x36e   :  { %5612 = vst [vmem:[%s8074_s4 + $0x1] ss:$2 sm:$0xff] %v5353_v32  ;;  %5614 = vst [vmem:[%s8074_s4 + $0x21] ss:$2 sm:$0xff] %v5354_v31 }
 0x36f   :  { %5616 = vst [vmem:[%s8074_s4 + $0x41] ss:$2 sm:$0xff] %v5355_v46  ;;  %5618 = vst [vmem:[%s8074_s4 + $0x61] ss:$2 sm:$0xff] %v5356_v11 }
 0x370   :  { %5613 = vst [vmem:[%s8074_s4 + $0x11] ss:$2 sm:$0xff] %v5357_v22  ;;  %5615 = vst [vmem:[%s8074_s4 + $0x31] ss:$2 sm:$0xff] %v5358_v37 }
 0x371   :  { %5617 = vst [vmem:[%s8074_s4 + $0x51] ss:$2 sm:$0xff] %v5359_v18  ;;  %5619 = vst [vmem:[%s8074_s4 + $0x71] ss:$2 sm:$0xff] %v5360_v35 }

</bundles_post_ra>
